<compile_context>
chip_gen: v6e
topology: v6e:2x2x1
jax: 0.10.0
libtpu: 0.0.40
codegen_flags: <defaults>
</compile_context>

<pallas_src>
import functools

import numpy as np
import jax
import jax.numpy as jnp
from jax.experimental import pallas as pl
from jax.experimental.pallas import tpu as pltpu


_BN_EVAL_SCALE = float(1.0 / np.sqrt(1.0 + 1e-5))  # fresh running stats, eval mode
_LANE = 128


def _round_up(v, m):
    return ((v + m - 1) // m) * m


# -----------------------------------------------------------------------------
# Fused per-scale Pallas kernel
# -----------------------------------------------------------------------------
def _fused_scale_kernel(
    x_ref, w1_ref, b1_ref, w2_ref, b2_ref, wst_ref, peb_ref,
    g1w_ref, g1b_ref, nd1_ref, dm1_ref, p1_ref,
    g2w_ref, g2b_ref, nd2_ref, dm2_ref, p2_ref,
    f1a_ref, f1b_ref, f1bb_ref, f2w_ref, f2b_ref, f3w_ref, f3b_ref,
    o_ref,
    xmp_ref, pa_ref, pb_ref,
    *, bs, num_nodes, snn, win1, win2, pool_mean):
    f32 = jnp.float32
    bf16 = jnp.bfloat16

    def mm(a_bf, b_bf):
        # MXU matmul: bf16 operands, f32 accumulation.
        return jnp.dot(a_bf, b_bf, preferred_element_type=f32)

    # ---------------- stage 1: conv chain + pooled linear, 3 matmuls ---------
    # Host folded: w1f/w2f are banded (im2col) conv matrices, wst = pool224 o
    # Linear(224,2H) o BN(eval) o BN_mpnn(eval); peb = (PE + linear bias)*BN_mpnn.
    xb = x_ref[...].astype(bf16)                                       # (n, scale)
    h1 = jnp.maximum(mm(xb, w1_ref[...]) + b1_ref[...], 0.0)           # (n, P1)
    h2 = jnp.maximum(mm(h1.astype(bf16), w2_ref[...]) + b2_ref[...], 0.0)  # (n, P2)
    xmp_ref[...] = mm(h2.astype(bf16), wst_ref[...]) + peb_ref[...]    # (n, 2H)

    # ---------------- stage 2: two MPNN blocks + window pooling --------------
    def mpnn_pooled(b, gw, gb, nd, dm, pool, meta):
        w_eff, num_win, stride = meta
        nn = w_eff * num_nodes
        acc = None
        for j in range(num_win):
            start = b * snn + j * stride * num_nodes
            xg = xmp_ref[pl.ds(start, nn), :]                          # (nn, 2H) f32
            xg_b = xg.astype(bf16)
            # dot-product graph construction (LeakyReLU + masked softmax)
            logits = jax.lax.dot_general(xg_b, xg_b, (((1,), (1,)), ((), ())),
                                         preferred_element_type=f32)  # (nn, nn)
            logits = jnp.where(logits >= 0.0, logits, 0.01 * logits) + nd   # no self edges
            logits = logits - jnp.max(logits, axis=-1, keepdims=True)
            e = jnp.exp(logits)
            adj = e * pl.reciprocal(jnp.sum(e, axis=-1, keepdims=True), approx=True)
            adj = adj * dm                                             # temporal decay
            # "+ xg" == folded identity self-edge:  (softmax + I) * dmask @ xg
            msg = mm(adj.astype(bf16), xg_b) + xg                      # (nn, 2H)
            hg = jnp.maximum(mm(msg.astype(bf16), gw) + gb, 0.0)       # (nn, Hd)
            if pool_mean:
                # pool folds the 1/(w_eff*num_win) mean over window-time & window-count
                contrib = mm(pool, hg.astype(bf16))                    # (nodes, Hd)
                acc = contrib if acc is None else acc + contrib
            else:
                # TODO(synk): exact pooling convention of GraphConvpoolMPNN_block unknown.
                mx = hg[0:num_nodes, :]
                for tt in range(1, w_eff):
                    mx = jnp.maximum(mx, hg[tt * num_nodes:(tt + 1) * num_nodes, :])
                acc = mx if acc is None else jnp.maximum(acc, mx)
        return acc                                                     # (nodes, Hd)

    # Hoist constant operand loads out of the batch/window loops.
    g1w, g1b, nd1, dm1, p1 = g1w_ref[...], g1b_ref[...], nd1_ref[...], dm1_ref[...], p1_ref[...]
    g2w, g2b, nd2, dm2, p2 = g2w_ref[...], g2b_ref[...], nd2_ref[...], dm2_ref[...], p2_ref[...]
    for b in range(bs):
        pa_ref[b * num_nodes:(b + 1) * num_nodes, :] = mpnn_pooled(b, g1w, g1b, nd1, dm1, p1, win1)
        pb_ref[b * num_nodes:(b + 1) * num_nodes, :] = mpnn_pooled(b, g2w, g2b, nd2, dm2, p2, win2)

    # ---------------- stage 3: fc head over all batches at once --------------
    # concat([pa, pb], -1) @ fc1_w  ==  pa @ fc1_w[:Hd] + pb @ fc1_w[Hd:]
    h = jnp.maximum(mm(pa_ref[...].astype(bf16), f1a_ref[...])
                    + mm(pb_ref[...].astype(bf16), f1b_ref[...]) + f1bb_ref[...], 0.0)
    h = jnp.maximum(mm(h.astype(bf16), f2w_ref[...]) + f2b_ref[...], 0.0)
    o_ref[...] = (mm(h.astype(bf16), f3w_ref[...]) + f3b_ref[...]).astype(o_ref.dtype)


# -----------------------------------------------------------------------------
# Host-side preparation (folds, band matrices, masks, positional encoding)
# -----------------------------------------------------------------------------
def adaptive_avg_pool_matrix(l_in, l_out):
    # F.adaptive_avg_pool1d as an (l_in, l_out) matrix (reference flattens C x L first).
    P = np.zeros((l_in, l_out), np.float32)
    for i in range(l_out):
        s = (i * l_in) // l_out
        e = -(-((i + 1) * l_in) // l_out)
        P[s:e, i] = 1.0 / (e - s)
    return P


def sinusoidal_pe(length, d):
    pos = np.arange(length, dtype=np.float32)[:, None]
    div = np.exp(np.arange(0, d, 2, dtype=np.float32) * (-np.log(10000.0) / d))
    pe = np.zeros((length, d), np.float32)
    pe[:, 0::2] = np.sin(pos * div)
    pe[:, 1::2] = np.cos(pos * div)
    return pe


def _band_conv1(w1, b1, scale, kc, lh):
    """Conv1d(1, lh, kc, valid) as a banded matrix: (scale, P1) with P1 = pad(l1*lh, 128)."""
    l1 = scale - (kc - 1)
    P1 = _round_up(l1 * lh, _LANE)
    W = np.zeros((scale, P1), np.float32)
    B = np.zeros((1, P1), np.float32)
    for t in range(l1):
        for d in range(kc):
            W[t + d, t * lh:(t + 1) * lh] = w1[d]
        B[0, t * lh:(t + 1) * lh] = b1
    return W, B, P1, l1


def _band_conv2(w2, b2, l1, kc, lh, lo, P1):
    """Conv1d(lh, lo, kc, valid) as a banded block matrix: (P1, P2), P2 = pad(l2*lo, 128)."""
    l2 = l1 - (kc - 1)
    P2 = _round_up(l2 * lo, _LANE)
    W = np.zeros((P1, P2), np.float32)
    B = np.zeros((1, P2), np.float32)
    for t in range(l2):
        for d in range(kc):
            W[(t + d) * lh:(t + d + 1) * lh, t * lo:(t + 1) * lo] = w2[d * lh:(d + 1) * lh]
        B[0, t * lo:(t + 1) * lo] = b2
    return W, B, P2, l2


def _window_meta(window, stride, scale_num, num_nodes, decay):
    w_eff = min(window, scale_num)
    num_win = max((scale_num - w_eff) // stride + 1, 1)
    nn = w_eff * num_nodes
    t_idx = np.repeat(np.arange(w_eff), num_nodes)
    dmask = np.power(decay, np.abs(t_idx[:, None] - t_idx[None, :])).astype(np.float32)
    negdiag = np.where(np.eye(nn, dtype=bool), np.float32(-1e9), np.float32(0.0)).astype(np.float32)
    pool = np.tile(np.eye(num_nodes, dtype=np.float32), (1, w_eff)) / float(w_eff * num_win)
    return (w_eff, num_win, stride), negdiag, dmask, pool


def fft_for_period(x, k=2):
    # NOTE: the top-k index read-back mirrors the reference's `.detach().cpu().numpy()`;
    # it is the only host sync per forward (per-scale branch shapes depend on it).
    xf = jnp.fft.rfft(x, axis=1)
    amp = jnp.abs(xf).mean(0).mean(-1)
    amp = amp.at[0].set(0.0)
    _, top_idx = jax.lax.top_k(amp, k)
    top_idx = np.asarray(jax.device_get(top_idx))
    top_idx = np.maximum(top_idx, 1)                  # guard against degenerate 0 index
    period = x.shape[1] // top_idx
    scale_weight = jnp.abs(xf).mean(-1)[:, top_idx]   # unused by ScaleGraphBlock (parity)
    return period, scale_weight


# -----------------------------------------------------------------------------
# Per-scale GraphBlock forward: exactly ONE pallas_call
# -----------------------------------------------------------------------------
def graph_block_forward(x_scaled, p, cfg):
    bs, scale_num, scale, num_nodes = (int(s) for s in x_scaled.shape)
    kc = cfg["conv_kernel"]
    lh, lo = cfg["lstmhidden_dim"], cfg["lstmout_dim"]
    hd = cfg["hidden_dim"]
    h2 = 2 * hd
    seq_len = cfg["seq_len"]
    pool_out = lo * cfg["conv_out"]                   # == 224 for the reference config
    n_rows = bs * scale_num * num_nodes
    bf16 = jnp.bfloat16

    # ---- host-side algebraic folding (numpy, weights already host-resident) ----
    w1f, b1f, P1, l1 = _band_conv1(p["conv1_w"], p["conv1_b"], scale, kc, lh)
    w2f, b2f, P2, l2 = _band_conv2(p["conv2_w"], p["conv2_b"], l1, kc, lh, lo, P1)
    assert l2 >= 1, "scale too small for conv_kernel"

    # adaptive_avg_pool1d(., 224) o Linear(224, 2H) o BN(eval) o BN_mpnn(eval) == one matrix,
    # re-ordered so the kernel contracts the (time, channel)-blocked conv output directly.
    P_pool = adaptive_avg_pool_matrix(lo * l2, pool_out)
    wfold = P_pool @ (p["map2_w"] * _BN_EVAL_SCALE)                        # (lo*l2, 2H)
    wstack = wfold.reshape(lo, l2, h2).transpose(1, 0, 2).reshape(l2 * lo, h2)
    wst = np.zeros((P2, h2), np.float32)
    wst[:l2 * lo] = wstack
    wst *= _BN_EVAL_SCALE                                                  # MPNN-input BN (eval)
    # TODO(synk): the extra MPNN-input BatchNorm (applied after PE) matches FC-STGNN's
    # GraphConvpoolMPNN_block; verify against the true reference implementation.
    pe = sinusoidal_pe(scale_num, h2)
    peb = (np.tile(np.repeat(pe, num_nodes, axis=0), (bs, 1))
           + (p["map2_b"] * _BN_EVAL_SCALE).reshape(1, h2)) * _BN_EVAL_SCALE  # (n_rows, 2H)

    win1, nd1, dm1, pool1 = _window_meta(cfg["moving_windows"][0], cfg["stride"][0],
                                         scale_num, num_nodes, cfg["decay"])
    win2, nd2, dm2, pool2 = _window_meta(cfg["moving_windows"][1], cfg["stride"][1],
                                         scale_num, num_nodes, cfg["decay"])

    # A_input = reshape(x, [bs*scale_num*num_nodes, scale]) — same row-major
    # reinterpretation as torch.reshape; kept lane-dense (last dim = scale).
    x2d = x_scaled.reshape(n_rows, scale).astype(jnp.float32)

    operands = (
        x2d,
        jnp.asarray(w1f, bf16), jnp.asarray(b1f),
        jnp.asarray(w2f, bf16), jnp.asarray(b2f),
        jnp.asarray(wst, bf16), jnp.asarray(peb),
        jnp.asarray(p["mpnn1_w"], bf16), jnp.asarray(p["mpnn1_b"].reshape(1, hd)),
        jnp.asarray(nd1), jnp.asarray(dm1), jnp.asarray(pool1, bf16),
        jnp.asarray(p["mpnn2_w"], bf16), jnp.asarray(p["mpnn2_b"].reshape(1, hd)),
        jnp.asarray(nd2), jnp.asarray(dm2), jnp.asarray(pool2, bf16),
        jnp.asarray(p["fc1_w"][:hd], bf16), jnp.asarray(p["fc1_w"][hd:], bf16),
        jnp.asarray(p["fc1_b"].reshape(1, h2)),
        jnp.asarray(p["fc2_w"], bf16), jnp.asarray(p["fc2_b"].reshape(1, h2)),
        jnp.asarray(p["fc3_w"], bf16), jnp.asarray(p["fc3_b"].reshape(1, seq_len)),
    )

    kernel = functools.partial(
        _fused_scale_kernel, bs=bs, num_nodes=num_nodes, snn=scale_num * num_nodes,
        win1=win1, win2=win2, pool_mean=(cfg["pooling_choice"] == "mean"))

    # Single grid step: everything (weights + activations << 1 MiB) stays in VMEM.
    # TODO(synk): when bs / scale_num grow, split the batch over a leading "parallel"
    # grid axis (2 TensorCores on v7x) and budget scratch against v7x's 64 MiB VMEM.
    out = pl.pallas_call(
        kernel,
        out_shape=jax.ShapeDtypeStruct((bs * num_nodes, seq_len), jnp.float32),
        grid=(1,),
        in_specs=[pl.BlockSpec(op.shape, lambda i: (0, 0)) for op in operands],
        out_specs=pl.BlockSpec((bs * num_nodes, seq_len), lambda i: (0, 0)),
        scratch_shapes=[pltpu.VMEM((n_rows, h2), jnp.float32),
                        pltpu.VMEM((bs * num_nodes, hd), jnp.float32),
                        pltpu.VMEM((bs * num_nodes, hd), jnp.float32)],
        compiler_params=pltpu.CompilerParams(dimension_semantics=("arbitrary",)),
    )(*operands)

    # (bs*num_nodes, seq) -> (bs, seq_len, num_nodes), matching the reference transpose.
    return jnp.transpose(out.reshape(bs, num_nodes, seq_len), (0, 2, 1))


def scale_graph_block_forward(x_enc, params, cfg):
    bs, seq_len, num_nodes = x_enc.shape
    k = cfg["top_k"]
    scale_list, _scale_weight = fft_for_period(x_enc, k)
    outputs = []
    for i in range(k - 1):
        scale = max(int(scale_list[i + 1]), 1)
        if seq_len % scale != 0:
            length = (seq_len // scale + 1) * scale
            pad = jnp.zeros((bs, length - seq_len, num_nodes), x_enc.dtype)
            xp = jnp.concatenate([x_enc, pad], axis=1)
        else:
            length = seq_len
            xp = x_enc
        scale_num = length // scale
        x_scaled = xp.reshape(bs, scale_num, scale, num_nodes)
        outputs.append(graph_block_forward(x_scaled, params[i], cfg))
    return outputs


# -----------------------------------------------------------------------------
# Deterministic synthetic parameters (host-resident numpy; no per-step D2H syncs)
# -----------------------------------------------------------------------------
def init_graph_block_params(key, cfg):
    hd = cfg["hidden_dim"]
    h2 = 2 * hd
    lh, lo, kc = cfg["lstmhidden_dim"], cfg["lstmout_dim"], cfg["conv_kernel"]
    pool_out = lo * cfg["conv_out"]
    ks = jax.random.split(key, 16)

    def u(k, shape, fan_in):
        s = 1.0 / np.sqrt(max(fan_in, 1))
        return np.asarray(jax.random.uniform(k, shape, jnp.float32, -s, s))

    return {
        "conv1_w": u(ks[0], (kc, lh), kc),
        "conv1_b": u(ks[1], (lh,), kc),
        "conv2_w": u(ks[2], (kc * lh, lo), kc * lh),
        "conv2_b": u(ks[3], (lo,), kc * lh),
        "map2_w": u(ks[4], (pool_out, h2), pool_out),
        "map2_b": u(ks[5], (h2,), pool_out),
        "mpnn1_w": u(ks[6], (h2, hd), h2),
        "mpnn1_b": u(ks[7], (hd,), h2),
        "mpnn2_w": u(ks[8], (h2, hd), h2),
        "mpnn2_b": u(ks[9], (hd,), h2),
        "fc1_w": u(ks[10], (h2, h2), h2),
        "fc1_b": u(ks[11], (h2,), h2),
        "fc2_w": u(ks[12], (h2, h2), h2),
        "fc2_b": u(ks[13], (h2,), h2),
        "fc3_w": u(ks[14], (h2, cfg["seq_len"]), h2),
        "fc3_b": u(ks[15], (cfg["seq_len"],), h2),
    }


# -----------------------------------------------------------------------------
if __name__ == "__main__":
    cfg = dict(
        num_nodes=4, seq_len=16, pred_len=4, top_k=3, d_model=8,
        conv_out=14, lstmhidden_dim=8, lstmout_dim=16, conv_kernel=1,
        hidden_dim=16, moving_windows=[1, 2], stride=[1, 2],
        decay=0.7, pooling_choice="mean",
    )
    key = jax.random.PRNGKey(0)
    kx, kp = jax.random.split(key)
    x_enc = jax.random.normal(kx, (2, cfg["seq_len"], cfg["num_nodes"]), jnp.float32)
    params = [init_graph_block_params(jax.random.fold_in(kp, i), cfg)
              for i in range(cfg["top_k"] - 1)]

    outs = scale_graph_block_forward(x_enc, params, cfg)
    outs = jax.block_until_ready(outs)

    for o in outs:
        assert o.shape == (2, cfg["seq_len"], cfg["num_nodes"]), o.shape
        assert bool(jnp.all(jnp.isfinite(o)))
    print("KERNEL_OK")
</pallas_src>

<mosaic_0001>
module attributes {stable_mosaic.version = 11 : i64} {
  func.func @_fused_scale_kernel(%arg0: i32, %arg1: memref<64x2xf32, #tpu.memory_space<vmem>>, %arg2: memref<2x128xbf16, #tpu.memory_space<vmem>>, %arg3: memref<1x128xf32, #tpu.memory_space<vmem>>, %arg4: memref<128x128xbf16, #tpu.memory_space<vmem>>, %arg5: memref<1x128xf32, #tpu.memory_space<vmem>>, %arg6: memref<128x32xbf16, #tpu.memory_space<vmem>>, %arg7: memref<64x32xf32, #tpu.memory_space<vmem>>, %arg8: memref<32x16xbf16, #tpu.memory_space<vmem>>, %arg9: memref<1x16xf32, #tpu.memory_space<vmem>>, %arg10: memref<4x4xf32, #tpu.memory_space<vmem>>, %arg11: memref<4x4xf32, #tpu.memory_space<vmem>>, %arg12: memref<4x4xbf16, #tpu.memory_space<vmem>>, %arg13: memref<32x16xbf16, #tpu.memory_space<vmem>>, %arg14: memref<1x16xf32, #tpu.memory_space<vmem>>, %arg15: memref<8x8xf32, #tpu.memory_space<vmem>>, %arg16: memref<8x8xf32, #tpu.memory_space<vmem>>, %arg17: memref<4x8xbf16, #tpu.memory_space<vmem>>, %arg18: memref<16x32xbf16, #tpu.memory_space<vmem>>, %arg19: memref<16x32xbf16, #tpu.memory_space<vmem>>, %arg20: memref<1x32xf32, #tpu.memory_space<vmem>>, %arg21: memref<32x32xbf16, #tpu.memory_space<vmem>>, %arg22: memref<1x32xf32, #tpu.memory_space<vmem>>, %arg23: memref<32x16xbf16, #tpu.memory_space<vmem>>, %arg24: memref<1x16xf32, #tpu.memory_space<vmem>>, %arg25: memref<8x16xf32, #tpu.memory_space<vmem>>, %arg26: memref<64x32xf32, #tpu.memory_space<vmem>>, %arg27: memref<8x16xf32, #tpu.memory_space<vmem>>, %arg28: memref<8x16xf32, #tpu.memory_space<vmem>>) attributes {dimension_semantics = [#tpu.dimension_semantics<arbitrary>], iteration_bounds = array<i64: 1>, scalar_prefetch = 0 : i64, scratch_operands = 3 : i64, tpu.core_type = #tpu.core_type<tc>, window_params = [{pipeline_mode = #tpu.pipeline_mode<synchronous>, transform_indices = @transform_0, window_bounds = array<i64: 64, 2>}, {pipeline_mode = #tpu.pipeline_mode<synchronous>, transform_indices = @transform_1, window_bounds = array<i64: 2, 128>}, {pipeline_mode = #tpu.pipeline_mode<synchronous>, transform_indices = @transform_2, window_bounds = array<i64: 1, 128>}, {pipeline_mode = #tpu.pipeline_mode<synchronous>, transform_indices = @transform_3, window_bounds = array<i64: 128, 128>}, {pipeline_mode = #tpu.pipeline_mode<synchronous>, transform_indices = @transform_4, window_bounds = array<i64: 1, 128>}, {pipeline_mode = #tpu.pipeline_mode<synchronous>, transform_indices = @transform_5, window_bounds = array<i64: 128, 32>}, {pipeline_mode = #tpu.pipeline_mode<synchronous>, transform_indices = @transform_6, window_bounds = array<i64: 64, 32>}, {pipeline_mode = #tpu.pipeline_mode<synchronous>, transform_indices = @transform_7, window_bounds = array<i64: 32, 16>}, {pipeline_mode = #tpu.pipeline_mode<synchronous>, transform_indices = @transform_8, window_bounds = array<i64: 1, 16>}, {pipeline_mode = #tpu.pipeline_mode<synchronous>, transform_indices = @transform_9, window_bounds = array<i64: 4, 4>}, {pipeline_mode = #tpu.pipeline_mode<synchronous>, transform_indices = @transform_10, window_bounds = array<i64: 4, 4>}, {pipeline_mode = #tpu.pipeline_mode<synchronous>, transform_indices = @transform_11, window_bounds = array<i64: 4, 4>}, {pipeline_mode = #tpu.pipeline_mode<synchronous>, transform_indices = @transform_12, window_bounds = array<i64: 32, 16>}, {pipeline_mode = #tpu.pipeline_mode<synchronous>, transform_indices = @transform_13, window_bounds = array<i64: 1, 16>}, {pipeline_mode = #tpu.pipeline_mode<synchronous>, transform_indices = @transform_14, window_bounds = array<i64: 8, 8>}, {pipeline_mode = #tpu.pipeline_mode<synchronous>, transform_indices = @transform_15, window_bounds = array<i64: 8, 8>}, {pipeline_mode = #tpu.pipeline_mode<synchronous>, transform_indices = @transform_16, window_bounds = array<i64: 4, 8>}, {pipeline_mode = #tpu.pipeline_mode<synchronous>, transform_indices = @transform_17, window_bounds = array<i64: 16, 32>}, {pipeline_mode = #tpu.pipeline_mode<synchronous>, transform_indices = @transform_18, window_bounds = array<i64: 16, 32>}, {pipeline_mode = #tpu.pipeline_mode<synchronous>, transform_indices = @transform_19, window_bounds = array<i64: 1, 32>}, {pipeline_mode = #tpu.pipeline_mode<synchronous>, transform_indices = @transform_20, window_bounds = array<i64: 32, 32>}, {pipeline_mode = #tpu.pipeline_mode<synchronous>, transform_indices = @transform_21, window_bounds = array<i64: 1, 32>}, {pipeline_mode = #tpu.pipeline_mode<synchronous>, transform_indices = @transform_22, window_bounds = array<i64: 32, 16>}, {pipeline_mode = #tpu.pipeline_mode<synchronous>, transform_indices = @transform_23, window_bounds = array<i64: 1, 16>}, {pipeline_mode = #tpu.pipeline_mode<synchronous>, transform_indices = @transform_24, window_bounds = array<i64: 8, 16>}]} {
    %c0 = arith.constant 0 : index
    %c0_0 = arith.constant 0 : index
    %0 = vector.load %arg1[%c0, %c0_0] : memref<64x2xf32, #tpu.memory_space<vmem>>, vector<64x2xf32>
    %1 = arith.truncf %0 : vector<64x2xf32> to vector<64x2xbf16>
    %c0_1 = arith.constant 0 : index
    %c0_2 = arith.constant 0 : index
    %2 = vector.load %arg2[%c0_1, %c0_2] : memref<2x128xbf16, #tpu.memory_space<vmem>>, vector<2x128xbf16>
    %cst = arith.constant dense<0.000000e+00> : vector<64x128xf32>
    %3 = tpu.matmul %1, %2, %cst {dimension_numbers = #tpu.dot_dimension_numbers<[1], [0], [0], [1], [0, 0, 1, 1], [], []>} : vector<64x2xbf16>, vector<2x128xbf16>, vector<64x128xf32> -> vector<64x128xf32>
    %c0_3 = arith.constant 0 : index
    %c0_4 = arith.constant 0 : index
    %4 = vector.load %arg3[%c0_3, %c0_4] : memref<1x128xf32, #tpu.memory_space<vmem>>, vector<1x128xf32>
    %5 = vector.broadcast %4 : vector<1x128xf32> to vector<64x128xf32>
    %6 = arith.addf %3, %5 : vector<64x128xf32>
    %cst_5 = arith.constant 0.000000e+00 : f32
    %7 = vector.broadcast %cst_5 : f32 to vector<64x128xf32>
    %8 = arith.maximumf %6, %7 : vector<64x128xf32>
    %9 = arith.truncf %8 : vector<64x128xf32> to vector<64x128xbf16>
    %c0_6 = arith.constant 0 : index
    %c0_7 = arith.constant 0 : index
    %10 = vector.load %arg4[%c0_6, %c0_7] : memref<128x128xbf16, #tpu.memory_space<vmem>>, vector<128x128xbf16>
    %cst_8 = arith.constant dense<0.000000e+00> : vector<64x128xf32>
    %11 = tpu.matmul %9, %10, %cst_8 {dimension_numbers = #tpu.dot_dimension_numbers<[1], [0], [0], [1], [0, 0, 1, 1], [], []>} : vector<64x128xbf16>, vector<128x128xbf16>, vector<64x128xf32> -> vector<64x128xf32>
    %c0_9 = arith.constant 0 : index
    %c0_10 = arith.constant 0 : index
    %12 = vector.load %arg5[%c0_9, %c0_10] : memref<1x128xf32, #tpu.memory_space<vmem>>, vector<1x128xf32>
    %13 = vector.broadcast %12 : vector<1x128xf32> to vector<64x128xf32>
    %14 = arith.addf %11, %13 : vector<64x128xf32>
    %cst_11 = arith.constant 0.000000e+00 : f32
    %15 = vector.broadcast %cst_11 : f32 to vector<64x128xf32>
    %16 = arith.maximumf %14, %15 : vector<64x128xf32>
    %17 = arith.truncf %16 : vector<64x128xf32> to vector<64x128xbf16>
    %c0_12 = arith.constant 0 : index
    %c0_13 = arith.constant 0 : index
    %18 = vector.load %arg6[%c0_12, %c0_13] : memref<128x32xbf16, #tpu.memory_space<vmem>>, vector<128x32xbf16>
    %cst_14 = arith.constant dense<0.000000e+00> : vector<64x32xf32>
    %19 = tpu.matmul %17, %18, %cst_14 {dimension_numbers = #tpu.dot_dimension_numbers<[1], [0], [0], [1], [0, 0, 1, 1], [], []>} : vector<64x128xbf16>, vector<128x32xbf16>, vector<64x32xf32> -> vector<64x32xf32>
    %c0_15 = arith.constant 0 : index
    %c0_16 = arith.constant 0 : index
    %20 = vector.load %arg7[%c0_15, %c0_16] : memref<64x32xf32, #tpu.memory_space<vmem>>, vector<64x32xf32>
    %21 = arith.addf %19, %20 : vector<64x32xf32>
    %c0_17 = arith.constant 0 : index
    %c0_18 = arith.constant 0 : index
    %22 = vector.load %arg26[%c0_17, %c0_18] : memref<64x32xf32, #tpu.memory_space<vmem>>, vector<64x32xf32>
    tpu.vector_store %arg26[%c0_17, %c0_18], %21 {strides = array<i32>} : memref<64x32xf32, #tpu.memory_space<vmem>>, vector<64x32xf32>,
    %c0_19 = arith.constant 0 : index
    %c0_20 = arith.constant 0 : index
    %23 = vector.load %arg8[%c0_19, %c0_20] : memref<32x16xbf16, #tpu.memory_space<vmem>>, vector<32x16xbf16>
    %c0_21 = arith.constant 0 : index
    %c0_22 = arith.constant 0 : index
    %24 = vector.load %arg9[%c0_21, %c0_22] : memref<1x16xf32, #tpu.memory_space<vmem>>, vector<1x16xf32>
    %c0_23 = arith.constant 0 : index
    %c0_24 = arith.constant 0 : index
    %25 = vector.load %arg10[%c0_23, %c0_24] : memref<4x4xf32, #tpu.memory_space<vmem>>, vector<4x4xf32>
    %c0_25 = arith.constant 0 : index
    %c0_26 = arith.constant 0 : index
    %26 = vector.load %arg11[%c0_25, %c0_26] : memref<4x4xf32, #tpu.memory_space<vmem>>, vector<4x4xf32>
    %c0_27 = arith.constant 0 : index
    %c0_28 = arith.constant 0 : index
    %27 = vector.load %arg12[%c0_27, %c0_28] : memref<4x4xbf16, #tpu.memory_space<vmem>>, vector<4x4xbf16>
    %c0_29 = arith.constant 0 : index
    %c0_30 = arith.constant 0 : index
    %28 = vector.load %arg13[%c0_29, %c0_30] : memref<32x16xbf16, #tpu.memory_space<vmem>>, vector<32x16xbf16>
    %c0_31 = arith.constant 0 : index
    %c0_32 = arith.constant 0 : index
    %29 = vector.load %arg14[%c0_31, %c0_32] : memref<1x16xf32, #tpu.memory_space<vmem>>, vector<1x16xf32>
    %c0_33 = arith.constant 0 : index
    %c0_34 = arith.constant 0 : index
    %30 = vector.load %arg15[%c0_33, %c0_34] : memref<8x8xf32, #tpu.memory_space<vmem>>, vector<8x8xf32>
    %c0_35 = arith.constant 0 : index
    %c0_36 = arith.constant 0 : index
    %31 = vector.load %arg16[%c0_35, %c0_36] : memref<8x8xf32, #tpu.memory_space<vmem>>, vector<8x8xf32>
    %c0_37 = arith.constant 0 : index
    %c0_38 = arith.constant 0 : index
    %32 = vector.load %arg17[%c0_37, %c0_38] : memref<4x8xbf16, #tpu.memory_space<vmem>>, vector<4x8xbf16>
    %c0_39 = arith.constant 0 : index
    %c0_40 = arith.constant 0 : index
    %33 = vector.load %arg26[%c0_39, %c0_40] : memref<64x32xf32, #tpu.memory_space<vmem>>, vector<4x32xf32>
    %34 = arith.truncf %33 : vector<4x32xf32> to vector<4x32xbf16>
    %cst_41 = arith.constant dense<0.000000e+00> : vector<4x4xf32>
    %35 = tpu.matmul %34, %34, %cst_41 {dimension_numbers = #tpu.dot_dimension_numbers<[1], [1], [0], [0], [0, 0, 1, 0], [], []>} : vector<4x32xbf16>, vector<4x32xbf16>, vector<4x4xf32> -> vector<4x4xf32>
    %cst_42 = arith.constant 0.000000e+00 : f32
    %36 = vector.broadcast %cst_42 : f32 to vector<4x4xf32>
    %37 = arith.cmpf oge, %35, %36 : vector<4x4xf32>
    %cst_43 = arith.constant 0.00999999977 : f32
    %38 = vector.broadcast %cst_43 : f32 to vector<4x4xf32>
    %39 = arith.mulf %38, %35 : vector<4x4xf32>
    %40 = arith.select %37, %35, %39 : vector<4x4xi1>, vector<4x4xf32>
    %41 = arith.addf %40, %25 : vector<4x4xf32>
    %cst_44 = arith.constant dense<0xFF800000> : vector<4xf32>
    %42 = vector.multi_reduction <maximumf>, %41, %cst_44 [1] : vector<4x4xf32> to vector<4xf32>
    %43 = vector.shape_cast %42 : vector<4xf32> to vector<4x1xf32>
    %44 = vector.broadcast %43 : vector<4x1xf32> to vector<4x4xf32>
    %45 = arith.subf %41, %44 : vector<4x4xf32>
    %46 = math.exp %45 : vector<4x4xf32>
    %cst_45 = arith.constant dense<0.000000e+00> : vector<4xf32>
    %47 = vector.multi_reduction <add>, %46, %cst_45 [1] : vector<4x4xf32> to vector<4xf32>
    %48 = vector.shape_cast %47 : vector<4xf32> to vector<4x1xf32>
    %49 = tpu.reciprocal %48 {approx = true} : vector<4x1xf32> -> vector<4x1xf32>
    %50 = vector.broadcast %49 : vector<4x1xf32> to vector<4x4xf32>
    %51 = arith.mulf %46, %50 : vector<4x4xf32>
    %52 = arith.mulf %51, %26 : vector<4x4xf32>
    %53 = arith.truncf %52 : vector<4x4xf32> to vector<4x4xbf16>
    %cst_46 = arith.constant dense<0.000000e+00> : vector<4x32xf32>
    %54 = tpu.matmul %53, %34, %cst_46 {dimension_numbers = #tpu.dot_dimension_numbers<[1], [0], [0], [1], [0, 0, 1, 1], [], []>} : vector<4x4xbf16>, vector<4x32xbf16>, vector<4x32xf32> -> vector<4x32xf32>
    %55 = arith.addf %54, %33 : vector<4x32xf32>
    %56 = arith.truncf %55 : vector<4x32xf32> to vector<4x32xbf16>
    %cst_47 = arith.constant dense<0.000000e+00> : vector<4x16xf32>
    %57 = tpu.matmul %56, %23, %cst_47 {dimension_numbers = #tpu.dot_dimension_numbers<[1], [0], [0], [1], [0, 0, 1, 1], [], []>} : vector<4x32xbf16>, vector<32x16xbf16>, vector<4x16xf32> -> vector<4x16xf32>
    %58 = vector.broadcast %24 : vector<1x16xf32> to vector<4x16xf32>
    %59 = arith.addf %57, %58 : vector<4x16xf32>
    %cst_48 = arith.constant 0.000000e+00 : f32
    %60 = vector.broadcast %cst_48 : f32 to vector<4x16xf32>
    %61 = arith.maximumf %59, %60 : vector<4x16xf32>
    %62 = arith.truncf %61 : vector<4x16xf32> to vector<4x16xbf16>
    %cst_49 = arith.constant dense<0.000000e+00> : vector<4x16xf32>
    %63 = tpu.matmul %27, %62, %cst_49 {dimension_numbers = #tpu.dot_dimension_numbers<[1], [0], [0], [1], [0, 0, 1, 1], [], []>} : vector<4x4xbf16>, vector<4x16xbf16>, vector<4x16xf32> -> vector<4x16xf32>
    %c4 = arith.constant 4 : index
    %c0_50 = arith.constant 0 : index
    %64 = vector.load %arg26[%c4, %c0_50] : memref<64x32xf32, #tpu.memory_space<vmem>>, vector<4x32xf32>
    %65 = arith.truncf %64 : vector<4x32xf32> to vector<4x32xbf16>
    %cst_51 = arith.constant dense<0.000000e+00> : vector<4x4xf32>
    %66 = tpu.matmul %65, %65, %cst_51 {dimension_numbers = #tpu.dot_dimension_numbers<[1], [1], [0], [0], [0, 0, 1, 0], [], []>} : vector<4x32xbf16>, vector<4x32xbf16>, vector<4x4xf32> -> vector<4x4xf32>
    %cst_52 = arith.constant 0.000000e+00 : f32
    %67 = vector.broadcast %cst_52 : f32 to vector<4x4xf32>
    %68 = arith.cmpf oge, %66, %67 : vector<4x4xf32>
    %cst_53 = arith.constant 0.00999999977 : f32
    %69 = vector.broadcast %cst_53 : f32 to vector<4x4xf32>
    %70 = arith.mulf %69, %66 : vector<4x4xf32>
    %71 = arith.select %68, %66, %70 : vector<4x4xi1>, vector<4x4xf32>
    %72 = arith.addf %71, %25 : vector<4x4xf32>
    %cst_54 = arith.constant dense<0xFF800000> : vector<4xf32>
    %73 = vector.multi_reduction <maximumf>, %72, %cst_54 [1] : vector<4x4xf32> to vector<4xf32>
    %74 = vector.shape_cast %73 : vector<4xf32> to vector<4x1xf32>
    %75 = vector.broadcast %74 : vector<4x1xf32> to vector<4x4xf32>
    %76 = arith.subf %72, %75 : vector<4x4xf32>
    %77 = math.exp %76 : vector<4x4xf32>
    %cst_55 = arith.constant dense<0.000000e+00> : vector<4xf32>
    %78 = vector.multi_reduction <add>, %77, %cst_55 [1] : vector<4x4xf32> to vector<4xf32>
    %79 = vector.shape_cast %78 : vector<4xf32> to vector<4x1xf32>
    %80 = tpu.reciprocal %79 {approx = true} : vector<4x1xf32> -> vector<4x1xf32>
    %81 = vector.broadcast %80 : vector<4x1xf32> to vector<4x4xf32>
    %82 = arith.mulf %77, %81 : vector<4x4xf32>
    %83 = arith.mulf %82, %26 : vector<4x4xf32>
    %84 = arith.truncf %83 : vector<4x4xf32> to vector<4x4xbf16>
    %cst_56 = arith.constant dense<0.000000e+00> : vector<4x32xf32>
    %85 = tpu.matmul %84, %65, %cst_56 {dimension_numbers = #tpu.dot_dimension_numbers<[1], [0], [0], [1], [0, 0, 1, 1], [], []>} : vector<4x4xbf16>, vector<4x32xbf16>, vector<4x32xf32> -> vector<4x32xf32>
    %86 = arith.addf %85, %64 : vector<4x32xf32>
    %87 = arith.truncf %86 : vector<4x32xf32> to vector<4x32xbf16>
    %cst_57 = arith.constant dense<0.000000e+00> : vector<4x16xf32>
    %88 = tpu.matmul %87, %23, %cst_57 {dimension_numbers = #tpu.dot_dimension_numbers<[1], [0], [0], [1], [0, 0, 1, 1], [], []>} : vector<4x32xbf16>, vector<32x16xbf16>, vector<4x16xf32> -> vector<4x16xf32>
    %89 = vector.broadcast %24 : vector<1x16xf32> to vector<4x16xf32>
    %90 = arith.addf %88, %89 : vector<4x16xf32>
    %cst_58 = arith.constant 0.000000e+00 : f32
    %91 = vector.broadcast %cst_58 : f32 to vector<4x16xf32>
    %92 = arith.maximumf %90, %91 : vector<4x16xf32>
    %93 = arith.truncf %92 : vector<4x16xf32> to vector<4x16xbf16>
    %cst_59 = arith.constant dense<0.000000e+00> : vector<4x16xf32>
    %94 = tpu.matmul %27, %93, %cst_59 {dimension_numbers = #tpu.dot_dimension_numbers<[1], [0], [0], [1], [0, 0, 1, 1], [], []>} : vector<4x4xbf16>, vector<4x16xbf16>, vector<4x16xf32> -> vector<4x16xf32>
    %95 = arith.addf %63, %94 : vector<4x16xf32>
    %c8 = arith.constant 8 : index
    %c0_60 = arith.constant 0 : index
    %96 = vector.load %arg26[%c8, %c0_60] : memref<64x32xf32, #tpu.memory_space<vmem>>, vector<4x32xf32>
    %97 = arith.truncf %96 : vector<4x32xf32> to vector<4x32xbf16>
    %cst_61 = arith.constant dense<0.000000e+00> : vector<4x4xf32>
    %98 = tpu.matmul %97, %97, %cst_61 {dimension_numbers = #tpu.dot_dimension_numbers<[1], [1], [0], [0], [0, 0, 1, 0], [], []>} : vector<4x32xbf16>, vector<4x32xbf16>, vector<4x4xf32> -> vector<4x4xf32>
    %cst_62 = arith.constant 0.000000e+00 : f32
    %99 = vector.broadcast %cst_62 : f32 to vector<4x4xf32>
    %100 = arith.cmpf oge, %98, %99 : vector<4x4xf32>
    %cst_63 = arith.constant 0.00999999977 : f32
    %101 = vector.broadcast %cst_63 : f32 to vector<4x4xf32>
    %102 = arith.mulf %101, %98 : vector<4x4xf32>
    %103 = arith.select %100, %98, %102 : vector<4x4xi1>, vector<4x4xf32>
    %104 = arith.addf %103, %25 : vector<4x4xf32>
    %cst_64 = arith.constant dense<0xFF800000> : vector<4xf32>
    %105 = vector.multi_reduction <maximumf>, %104, %cst_64 [1] : vector<4x4xf32> to vector<4xf32>
    %106 = vector.shape_cast %105 : vector<4xf32> to vector<4x1xf32>
    %107 = vector.broadcast %106 : vector<4x1xf32> to vector<4x4xf32>
    %108 = arith.subf %104, %107 : vector<4x4xf32>
    %109 = math.exp %108 : vector<4x4xf32>
    %cst_65 = arith.constant dense<0.000000e+00> : vector<4xf32>
    %110 = vector.multi_reduction <add>, %109, %cst_65 [1] : vector<4x4xf32> to vector<4xf32>
    %111 = vector.shape_cast %110 : vector<4xf32> to vector<4x1xf32>
    %112 = tpu.reciprocal %111 {approx = true} : vector<4x1xf32> -> vector<4x1xf32>
    %113 = vector.broadcast %112 : vector<4x1xf32> to vector<4x4xf32>
    %114 = arith.mulf %109, %113 : vector<4x4xf32>
    %115 = arith.mulf %114, %26 : vector<4x4xf32>
    %116 = arith.truncf %115 : vector<4x4xf32> to vector<4x4xbf16>
    %cst_66 = arith.constant dense<0.000000e+00> : vector<4x32xf32>
    %117 = tpu.matmul %116, %97, %cst_66 {dimension_numbers = #tpu.dot_dimension_numbers<[1], [0], [0], [1], [0, 0, 1, 1], [], []>} : vector<4x4xbf16>, vector<4x32xbf16>, vector<4x32xf32> -> vector<4x32xf32>
    %118 = arith.addf %117, %96 : vector<4x32xf32>
    %119 = arith.truncf %118 : vector<4x32xf32> to vector<4x32xbf16>
    %cst_67 = arith.constant dense<0.000000e+00> : vector<4x16xf32>
    %120 = tpu.matmul %119, %23, %cst_67 {dimension_numbers = #tpu.dot_dimension_numbers<[1], [0], [0], [1], [0, 0, 1, 1], [], []>} : vector<4x32xbf16>, vector<32x16xbf16>, vector<4x16xf32> -> vector<4x16xf32>
    %121 = vector.broadcast %24 : vector<1x16xf32> to vector<4x16xf32>
    %122 = arith.addf %120, %121 : vector<4x16xf32>
    %cst_68 = arith.constant 0.000000e+00 : f32
    %123 = vector.broadcast %cst_68 : f32 to vector<4x16xf32>
    %124 = arith.maximumf %122, %123 : vector<4x16xf32>
    %125 = arith.truncf %124 : vector<4x16xf32> to vector<4x16xbf16>
    %cst_69 = arith.constant dense<0.000000e+00> : vector<4x16xf32>
    %126 = tpu.matmul %27, %125, %cst_69 {dimension_numbers = #tpu.dot_dimension_numbers<[1], [0], [0], [1], [0, 0, 1, 1], [], []>} : vector<4x4xbf16>, vector<4x16xbf16>, vector<4x16xf32> -> vector<4x16xf32>
    %127 = arith.addf %95, %126 : vector<4x16xf32>
    %c12 = arith.constant 12 : index
    %c0_70 = arith.constant 0 : index
    %128 = vector.load %arg26[%c12, %c0_70] : memref<64x32xf32, #tpu.memory_space<vmem>>, vector<4x32xf32>
    %129 = arith.truncf %128 : vector<4x32xf32> to vector<4x32xbf16>
    %cst_71 = arith.constant dense<0.000000e+00> : vector<4x4xf32>
    %130 = tpu.matmul %129, %129, %cst_71 {dimension_numbers = #tpu.dot_dimension_numbers<[1], [1], [0], [0], [0, 0, 1, 0], [], []>} : vector<4x32xbf16>, vector<4x32xbf16>, vector<4x4xf32> -> vector<4x4xf32>
    %cst_72 = arith.constant 0.000000e+00 : f32
    %131 = vector.broadcast %cst_72 : f32 to vector<4x4xf32>
    %132 = arith.cmpf oge, %130, %131 : vector<4x4xf32>
    %cst_73 = arith.constant 0.00999999977 : f32
    %133 = vector.broadcast %cst_73 : f32 to vector<4x4xf32>
    %134 = arith.mulf %133, %130 : vector<4x4xf32>
    %135 = arith.select %132, %130, %134 : vector<4x4xi1>, vector<4x4xf32>
    %136 = arith.addf %135, %25 : vector<4x4xf32>
    %cst_74 = arith.constant dense<0xFF800000> : vector<4xf32>
    %137 = vector.multi_reduction <maximumf>, %136, %cst_74 [1] : vector<4x4xf32> to vector<4xf32>
    %138 = vector.shape_cast %137 : vector<4xf32> to vector<4x1xf32>
    %139 = vector.broadcast %138 : vector<4x1xf32> to vector<4x4xf32>
    %140 = arith.subf %136, %139 : vector<4x4xf32>
    %141 = math.exp %140 : vector<4x4xf32>
    %cst_75 = arith.constant dense<0.000000e+00> : vector<4xf32>
    %142 = vector.multi_reduction <add>, %141, %cst_75 [1] : vector<4x4xf32> to vector<4xf32>
    %143 = vector.shape_cast %142 : vector<4xf32> to vector<4x1xf32>
    %144 = tpu.reciprocal %143 {approx = true} : vector<4x1xf32> -> vector<4x1xf32>
    %145 = vector.broadcast %144 : vector<4x1xf32> to vector<4x4xf32>
    %146 = arith.mulf %141, %145 : vector<4x4xf32>
    %147 = arith.mulf %146, %26 : vector<4x4xf32>
    %148 = arith.truncf %147 : vector<4x4xf32> to vector<4x4xbf16>
    %cst_76 = arith.constant dense<0.000000e+00> : vector<4x32xf32>
    %149 = tpu.matmul %148, %129, %cst_76 {dimension_numbers = #tpu.dot_dimension_numbers<[1], [0], [0], [1], [0, 0, 1, 1], [], []>} : vector<4x4xbf16>, vector<4x32xbf16>, vector<4x32xf32> -> vector<4x32xf32>
    %150 = arith.addf %149, %128 : vector<4x32xf32>
    %151 = arith.truncf %150 : vector<4x32xf32> to vector<4x32xbf16>
    %cst_77 = arith.constant dense<0.000000e+00> : vector<4x16xf32>
    %152 = tpu.matmul %151, %23, %cst_77 {dimension_numbers = #tpu.dot_dimension_numbers<[1], [0], [0], [1], [0, 0, 1, 1], [], []>} : vector<4x32xbf16>, vector<32x16xbf16>, vector<4x16xf32> -> vector<4x16xf32>
    %153 = vector.broadcast %24 : vector<1x16xf32> to vector<4x16xf32>
    %154 = arith.addf %152, %153 : vector<4x16xf32>
    %cst_78 = arith.constant 0.000000e+00 : f32
    %155 = vector.broadcast %cst_78 : f32 to vector<4x16xf32>
    %156 = arith.maximumf %154, %155 : vector<4x16xf32>
    %157 = arith.truncf %156 : vector<4x16xf32> to vector<4x16xbf16>
    %cst_79 = arith.constant dense<0.000000e+00> : vector<4x16xf32>
    %158 = tpu.matmul %27, %157, %cst_79 {dimension_numbers = #tpu.dot_dimension_numbers<[1], [0], [0], [1], [0, 0, 1, 1], [], []>} : vector<4x4xbf16>, vector<4x16xbf16>, vector<4x16xf32> -> vector<4x16xf32>
    %159 = arith.addf %127, %158 : vector<4x16xf32>
    %c16 = arith.constant 16 : index
    %c0_80 = arith.constant 0 : index
    %160 = vector.load %arg26[%c16, %c0_80] : memref<64x32xf32, #tpu.memory_space<vmem>>, vector<4x32xf32>
    %161 = arith.truncf %160 : vector<4x32xf32> to vector<4x32xbf16>
    %cst_81 = arith.constant dense<0.000000e+00> : vector<4x4xf32>
    %162 = tpu.matmul %161, %161, %cst_81 {dimension_numbers = #tpu.dot_dimension_numbers<[1], [1], [0], [0], [0, 0, 1, 0], [], []>} : vector<4x32xbf16>, vector<4x32xbf16>, vector<4x4xf32> -> vector<4x4xf32>
    %cst_82 = arith.constant 0.000000e+00 : f32
    %163 = vector.broadcast %cst_82 : f32 to vector<4x4xf32>
    %164 = arith.cmpf oge, %162, %163 : vector<4x4xf32>
    %cst_83 = arith.constant 0.00999999977 : f32
    %165 = vector.broadcast %cst_83 : f32 to vector<4x4xf32>
    %166 = arith.mulf %165, %162 : vector<4x4xf32>
    %167 = arith.select %164, %162, %166 : vector<4x4xi1>, vector<4x4xf32>
    %168 = arith.addf %167, %25 : vector<4x4xf32>
    %cst_84 = arith.constant dense<0xFF800000> : vector<4xf32>
    %169 = vector.multi_reduction <maximumf>, %168, %cst_84 [1] : vector<4x4xf32> to vector<4xf32>
    %170 = vector.shape_cast %169 : vector<4xf32> to vector<4x1xf32>
    %171 = vector.broadcast %170 : vector<4x1xf32> to vector<4x4xf32>
    %172 = arith.subf %168, %171 : vector<4x4xf32>
    %173 = math.exp %172 : vector<4x4xf32>
    %cst_85 = arith.constant dense<0.000000e+00> : vector<4xf32>
    %174 = vector.multi_reduction <add>, %173, %cst_85 [1] : vector<4x4xf32> to vector<4xf32>
    %175 = vector.shape_cast %174 : vector<4xf32> to vector<4x1xf32>
    %176 = tpu.reciprocal %175 {approx = true} : vector<4x1xf32> -> vector<4x1xf32>
    %177 = vector.broadcast %176 : vector<4x1xf32> to vector<4x4xf32>
    %178 = arith.mulf %173, %177 : vector<4x4xf32>
    %179 = arith.mulf %178, %26 : vector<4x4xf32>
    %180 = arith.truncf %179 : vector<4x4xf32> to vector<4x4xbf16>
    %cst_86 = arith.constant dense<0.000000e+00> : vector<4x32xf32>
    %181 = tpu.matmul %180, %161, %cst_86 {dimension_numbers = #tpu.dot_dimension_numbers<[1], [0], [0], [1], [0, 0, 1, 1], [], []>} : vector<4x4xbf16>, vector<4x32xbf16>, vector<4x32xf32> -> vector<4x32xf32>
    %182 = arith.addf %181, %160 : vector<4x32xf32>
    %183 = arith.truncf %182 : vector<4x32xf32> to vector<4x32xbf16>
    %cst_87 = arith.constant dense<0.000000e+00> : vector<4x16xf32>
    %184 = tpu.matmul %183, %23, %cst_87 {dimension_numbers = #tpu.dot_dimension_numbers<[1], [0], [0], [1], [0, 0, 1, 1], [], []>} : vector<4x32xbf16>, vector<32x16xbf16>, vector<4x16xf32> -> vector<4x16xf32>
    %185 = vector.broadcast %24 : vector<1x16xf32> to vector<4x16xf32>
    %186 = arith.addf %184, %185 : vector<4x16xf32>
    %cst_88 = arith.constant 0.000000e+00 : f32
    %187 = vector.broadcast %cst_88 : f32 to vector<4x16xf32>
    %188 = arith.maximumf %186, %187 : vector<4x16xf32>
    %189 = arith.truncf %188 : vector<4x16xf32> to vector<4x16xbf16>
    %cst_89 = arith.constant dense<0.000000e+00> : vector<4x16xf32>
    %190 = tpu.matmul %27, %189, %cst_89 {dimension_numbers = #tpu.dot_dimension_numbers<[1], [0], [0], [1], [0, 0, 1, 1], [], []>} : vector<4x4xbf16>, vector<4x16xbf16>, vector<4x16xf32> -> vector<4x16xf32>
    %191 = arith.addf %159, %190 : vector<4x16xf32>
    %c20 = arith.constant 20 : index
    %c0_90 = arith.constant 0 : index
    %192 = vector.load %arg26[%c20, %c0_90] : memref<64x32xf32, #tpu.memory_space<vmem>>, vector<4x32xf32>
    %193 = arith.truncf %192 : vector<4x32xf32> to vector<4x32xbf16>
    %cst_91 = arith.constant dense<0.000000e+00> : vector<4x4xf32>
    %194 = tpu.matmul %193, %193, %cst_91 {dimension_numbers = #tpu.dot_dimension_numbers<[1], [1], [0], [0], [0, 0, 1, 0], [], []>} : vector<4x32xbf16>, vector<4x32xbf16>, vector<4x4xf32> -> vector<4x4xf32>
    %cst_92 = arith.constant 0.000000e+00 : f32
    %195 = vector.broadcast %cst_92 : f32 to vector<4x4xf32>
    %196 = arith.cmpf oge, %194, %195 : vector<4x4xf32>
    %cst_93 = arith.constant 0.00999999977 : f32
    %197 = vector.broadcast %cst_93 : f32 to vector<4x4xf32>
    %198 = arith.mulf %197, %194 : vector<4x4xf32>
    %199 = arith.select %196, %194, %198 : vector<4x4xi1>, vector<4x4xf32>
    %200 = arith.addf %199, %25 : vector<4x4xf32>
    %cst_94 = arith.constant dense<0xFF800000> : vector<4xf32>
    %201 = vector.multi_reduction <maximumf>, %200, %cst_94 [1] : vector<4x4xf32> to vector<4xf32>
    %202 = vector.shape_cast %201 : vector<4xf32> to vector<4x1xf32>
    %203 = vector.broadcast %202 : vector<4x1xf32> to vector<4x4xf32>
    %204 = arith.subf %200, %203 : vector<4x4xf32>
    %205 = math.exp %204 : vector<4x4xf32>
    %cst_95 = arith.constant dense<0.000000e+00> : vector<4xf32>
    %206 = vector.multi_reduction <add>, %205, %cst_95 [1] : vector<4x4xf32> to vector<4xf32>
    %207 = vector.shape_cast %206 : vector<4xf32> to vector<4x1xf32>
    %208 = tpu.reciprocal %207 {approx = true} : vector<4x1xf32> -> vector<4x1xf32>
    %209 = vector.broadcast %208 : vector<4x1xf32> to vector<4x4xf32>
    %210 = arith.mulf %205, %209 : vector<4x4xf32>
    %211 = arith.mulf %210, %26 : vector<4x4xf32>
    %212 = arith.truncf %211 : vector<4x4xf32> to vector<4x4xbf16>
    %cst_96 = arith.constant dense<0.000000e+00> : vector<4x32xf32>
    %213 = tpu.matmul %212, %193, %cst_96 {dimension_numbers = #tpu.dot_dimension_numbers<[1], [0], [0], [1], [0, 0, 1, 1], [], []>} : vector<4x4xbf16>, vector<4x32xbf16>, vector<4x32xf32> -> vector<4x32xf32>
    %214 = arith.addf %213, %192 : vector<4x32xf32>
    %215 = arith.truncf %214 : vector<4x32xf32> to vector<4x32xbf16>
    %cst_97 = arith.constant dense<0.000000e+00> : vector<4x16xf32>
    %216 = tpu.matmul %215, %23, %cst_97 {dimension_numbers = #tpu.dot_dimension_numbers<[1], [0], [0], [1], [0, 0, 1, 1], [], []>} : vector<4x32xbf16>, vector<32x16xbf16>, vector<4x16xf32> -> vector<4x16xf32>
    %217 = vector.broadcast %24 : vector<1x16xf32> to vector<4x16xf32>
    %218 = arith.addf %216, %217 : vector<4x16xf32>
    %cst_98 = arith.constant 0.000000e+00 : f32
    %219 = vector.broadcast %cst_98 : f32 to vector<4x16xf32>
    %220 = arith.maximumf %218, %219 : vector<4x16xf32>
    %221 = arith.truncf %220 : vector<4x16xf32> to vector<4x16xbf16>
    %cst_99 = arith.constant dense<0.000000e+00> : vector<4x16xf32>
    %222 = tpu.matmul %27, %221, %cst_99 {dimension_numbers = #tpu.dot_dimension_numbers<[1], [0], [0], [1], [0, 0, 1, 1], [], []>} : vector<4x4xbf16>, vector<4x16xbf16>, vector<4x16xf32> -> vector<4x16xf32>
    %223 = arith.addf %191, %222 : vector<4x16xf32>
    %c24 = arith.constant 24 : index
    %c0_100 = arith.constant 0 : index
    %224 = vector.load %arg26[%c24, %c0_100] : memref<64x32xf32, #tpu.memory_space<vmem>>, vector<4x32xf32>
    %225 = arith.truncf %224 : vector<4x32xf32> to vector<4x32xbf16>
    %cst_101 = arith.constant dense<0.000000e+00> : vector<4x4xf32>
    %226 = tpu.matmul %225, %225, %cst_101 {dimension_numbers = #tpu.dot_dimension_numbers<[1], [1], [0], [0], [0, 0, 1, 0], [], []>} : vector<4x32xbf16>, vector<4x32xbf16>, vector<4x4xf32> -> vector<4x4xf32>
    %cst_102 = arith.constant 0.000000e+00 : f32
    %227 = vector.broadcast %cst_102 : f32 to vector<4x4xf32>
    %228 = arith.cmpf oge, %226, %227 : vector<4x4xf32>
    %cst_103 = arith.constant 0.00999999977 : f32
    %229 = vector.broadcast %cst_103 : f32 to vector<4x4xf32>
    %230 = arith.mulf %229, %226 : vector<4x4xf32>
    %231 = arith.select %228, %226, %230 : vector<4x4xi1>, vector<4x4xf32>
    %232 = arith.addf %231, %25 : vector<4x4xf32>
    %cst_104 = arith.constant dense<0xFF800000> : vector<4xf32>
    %233 = vector.multi_reduction <maximumf>, %232, %cst_104 [1] : vector<4x4xf32> to vector<4xf32>
    %234 = vector.shape_cast %233 : vector<4xf32> to vector<4x1xf32>
    %235 = vector.broadcast %234 : vector<4x1xf32> to vector<4x4xf32>
    %236 = arith.subf %232, %235 : vector<4x4xf32>
    %237 = math.exp %236 : vector<4x4xf32>
    %cst_105 = arith.constant dense<0.000000e+00> : vector<4xf32>
    %238 = vector.multi_reduction <add>, %237, %cst_105 [1] : vector<4x4xf32> to vector<4xf32>
    %239 = vector.shape_cast %238 : vector<4xf32> to vector<4x1xf32>
    %240 = tpu.reciprocal %239 {approx = true} : vector<4x1xf32> -> vector<4x1xf32>
    %241 = vector.broadcast %240 : vector<4x1xf32> to vector<4x4xf32>
    %242 = arith.mulf %237, %241 : vector<4x4xf32>
    %243 = arith.mulf %242, %26 : vector<4x4xf32>
    %244 = arith.truncf %243 : vector<4x4xf32> to vector<4x4xbf16>
    %cst_106 = arith.constant dense<0.000000e+00> : vector<4x32xf32>
    %245 = tpu.matmul %244, %225, %cst_106 {dimension_numbers = #tpu.dot_dimension_numbers<[1], [0], [0], [1], [0, 0, 1, 1], [], []>} : vector<4x4xbf16>, vector<4x32xbf16>, vector<4x32xf32> -> vector<4x32xf32>
    %246 = arith.addf %245, %224 : vector<4x32xf32>
    %247 = arith.truncf %246 : vector<4x32xf32> to vector<4x32xbf16>
    %cst_107 = arith.constant dense<0.000000e+00> : vector<4x16xf32>
    %248 = tpu.matmul %247, %23, %cst_107 {dimension_numbers = #tpu.dot_dimension_numbers<[1], [0], [0], [1], [0, 0, 1, 1], [], []>} : vector<4x32xbf16>, vector<32x16xbf16>, vector<4x16xf32> -> vector<4x16xf32>
    %249 = vector.broadcast %24 : vector<1x16xf32> to vector<4x16xf32>
    %250 = arith.addf %248, %249 : vector<4x16xf32>
    %cst_108 = arith.constant 0.000000e+00 : f32
    %251 = vector.broadcast %cst_108 : f32 to vector<4x16xf32>
    %252 = arith.maximumf %250, %251 : vector<4x16xf32>
    %253 = arith.truncf %252 : vector<4x16xf32> to vector<4x16xbf16>
    %cst_109 = arith.constant dense<0.000000e+00> : vector<4x16xf32>
    %254 = tpu.matmul %27, %253, %cst_109 {dimension_numbers = #tpu.dot_dimension_numbers<[1], [0], [0], [1], [0, 0, 1, 1], [], []>} : vector<4x4xbf16>, vector<4x16xbf16>, vector<4x16xf32> -> vector<4x16xf32>
    %255 = arith.addf %223, %254 : vector<4x16xf32>
    %c28 = arith.constant 28 : index
    %c0_110 = arith.constant 0 : index
    %256 = vector.load %arg26[%c28, %c0_110] : memref<64x32xf32, #tpu.memory_space<vmem>>, vector<4x32xf32>
    %257 = arith.truncf %256 : vector<4x32xf32> to vector<4x32xbf16>
    %cst_111 = arith.constant dense<0.000000e+00> : vector<4x4xf32>
    %258 = tpu.matmul %257, %257, %cst_111 {dimension_numbers = #tpu.dot_dimension_numbers<[1], [1], [0], [0], [0, 0, 1, 0], [], []>} : vector<4x32xbf16>, vector<4x32xbf16>, vector<4x4xf32> -> vector<4x4xf32>
    %cst_112 = arith.constant 0.000000e+00 : f32
    %259 = vector.broadcast %cst_112 : f32 to vector<4x4xf32>
    %260 = arith.cmpf oge, %258, %259 : vector<4x4xf32>
    %cst_113 = arith.constant 0.00999999977 : f32
    %261 = vector.broadcast %cst_113 : f32 to vector<4x4xf32>
    %262 = arith.mulf %261, %258 : vector<4x4xf32>
    %263 = arith.select %260, %258, %262 : vector<4x4xi1>, vector<4x4xf32>
    %264 = arith.addf %263, %25 : vector<4x4xf32>
    %cst_114 = arith.constant dense<0xFF800000> : vector<4xf32>
    %265 = vector.multi_reduction <maximumf>, %264, %cst_114 [1] : vector<4x4xf32> to vector<4xf32>
    %266 = vector.shape_cast %265 : vector<4xf32> to vector<4x1xf32>
    %267 = vector.broadcast %266 : vector<4x1xf32> to vector<4x4xf32>
    %268 = arith.subf %264, %267 : vector<4x4xf32>
    %269 = math.exp %268 : vector<4x4xf32>
    %cst_115 = arith.constant dense<0.000000e+00> : vector<4xf32>
    %270 = vector.multi_reduction <add>, %269, %cst_115 [1] : vector<4x4xf32> to vector<4xf32>
    %271 = vector.shape_cast %270 : vector<4xf32> to vector<4x1xf32>
    %272 = tpu.reciprocal %271 {approx = true} : vector<4x1xf32> -> vector<4x1xf32>
    %273 = vector.broadcast %272 : vector<4x1xf32> to vector<4x4xf32>
    %274 = arith.mulf %269, %273 : vector<4x4xf32>
    %275 = arith.mulf %274, %26 : vector<4x4xf32>
    %276 = arith.truncf %275 : vector<4x4xf32> to vector<4x4xbf16>
    %cst_116 = arith.constant dense<0.000000e+00> : vector<4x32xf32>
    %277 = tpu.matmul %276, %257, %cst_116 {dimension_numbers = #tpu.dot_dimension_numbers<[1], [0], [0], [1], [0, 0, 1, 1], [], []>} : vector<4x4xbf16>, vector<4x32xbf16>, vector<4x32xf32> -> vector<4x32xf32>
    %278 = arith.addf %277, %256 : vector<4x32xf32>
    %279 = arith.truncf %278 : vector<4x32xf32> to vector<4x32xbf16>
    %cst_117 = arith.constant dense<0.000000e+00> : vector<4x16xf32>
    %280 = tpu.matmul %279, %23, %cst_117 {dimension_numbers = #tpu.dot_dimension_numbers<[1], [0], [0], [1], [0, 0, 1, 1], [], []>} : vector<4x32xbf16>, vector<32x16xbf16>, vector<4x16xf32> -> vector<4x16xf32>
    %281 = vector.broadcast %24 : vector<1x16xf32> to vector<4x16xf32>
    %282 = arith.addf %280, %281 : vector<4x16xf32>
    %cst_118 = arith.constant 0.000000e+00 : f32
    %283 = vector.broadcast %cst_118 : f32 to vector<4x16xf32>
    %284 = arith.maximumf %282, %283 : vector<4x16xf32>
    %285 = arith.truncf %284 : vector<4x16xf32> to vector<4x16xbf16>
    %cst_119 = arith.constant dense<0.000000e+00> : vector<4x16xf32>
    %286 = tpu.matmul %27, %285, %cst_119 {dimension_numbers = #tpu.dot_dimension_numbers<[1], [0], [0], [1], [0, 0, 1, 1], [], []>} : vector<4x4xbf16>, vector<4x16xbf16>, vector<4x16xf32> -> vector<4x16xf32>
    %287 = arith.addf %255, %286 : vector<4x16xf32>
    %c0_120 = arith.constant 0 : index
    %c0_121 = arith.constant 0 : index
    %288 = vector.load %arg27[%c0_120, %c0_121] : memref<8x16xf32, #tpu.memory_space<vmem>>, vector<4x16xf32>
    tpu.vector_store %arg27[%c0_120, %c0_121], %287 {strides = array<i32>} : memref<8x16xf32, #tpu.memory_space<vmem>>, vector<4x16xf32>,
    %c0_122 = arith.constant 0 : index
    %c0_123 = arith.constant 0 : index
    %289 = vector.load %arg26[%c0_122, %c0_123] : memref<64x32xf32, #tpu.memory_space<vmem>>, vector<8x32xf32>
    %290 = arith.truncf %289 : vector<8x32xf32> to vector<8x32xbf16>
    %cst_124 = arith.constant dense<0.000000e+00> : vector<8x8xf32>
    %291 = tpu.matmul %290, %290, %cst_124 {dimension_numbers = #tpu.dot_dimension_numbers<[1], [1], [0], [0], [0, 0, 1, 0], [], []>} : vector<8x32xbf16>, vector<8x32xbf16>, vector<8x8xf32> -> vector<8x8xf32>
    %cst_125 = arith.constant 0.000000e+00 : f32
    %292 = vector.broadcast %cst_125 : f32 to vector<8x8xf32>
    %293 = arith.cmpf oge, %291, %292 : vector<8x8xf32>
    %cst_126 = arith.constant 0.00999999977 : f32
    %294 = vector.broadcast %cst_126 : f32 to vector<8x8xf32>
    %295 = arith.mulf %294, %291 : vector<8x8xf32>
    %296 = arith.select %293, %291, %295 : vector<8x8xi1>, vector<8x8xf32>
    %297 = arith.addf %296, %30 : vector<8x8xf32>
    %cst_127 = arith.constant dense<0xFF800000> : vector<8xf32>
    %298 = vector.multi_reduction <maximumf>, %297, %cst_127 [1] : vector<8x8xf32> to vector<8xf32>
    %299 = vector.shape_cast %298 : vector<8xf32> to vector<8x1xf32>
    %300 = vector.broadcast %299 : vector<8x1xf32> to vector<8x8xf32>
    %301 = arith.subf %297, %300 : vector<8x8xf32>
    %302 = math.exp %301 : vector<8x8xf32>
    %cst_128 = arith.constant dense<0.000000e+00> : vector<8xf32>
    %303 = vector.multi_reduction <add>, %302, %cst_128 [1] : vector<8x8xf32> to vector<8xf32>
    %304 = vector.shape_cast %303 : vector<8xf32> to vector<8x1xf32>
    %305 = tpu.reciprocal %304 {approx = true} : vector<8x1xf32> -> vector<8x1xf32>
    %306 = vector.broadcast %305 : vector<8x1xf32> to vector<8x8xf32>
    %307 = arith.mulf %302, %306 : vector<8x8xf32>
    %308 = arith.mulf %307, %31 : vector<8x8xf32>
    %309 = arith.truncf %308 : vector<8x8xf32> to vector<8x8xbf16>
    %cst_129 = arith.constant dense<0.000000e+00> : vector<8x32xf32>
    %310 = tpu.matmul %309, %290, %cst_129 {dimension_numbers = #tpu.dot_dimension_numbers<[1], [0], [0], [1], [0, 0, 1, 1], [], []>} : vector<8x8xbf16>, vector<8x32xbf16>, vector<8x32xf32> -> vector<8x32xf32>
    %311 = arith.addf %310, %289 : vector<8x32xf32>
    %312 = arith.truncf %311 : vector<8x32xf32> to vector<8x32xbf16>
    %cst_130 = arith.constant dense<0.000000e+00> : vector<8x16xf32>
    %313 = tpu.matmul %312, %28, %cst_130 {dimension_numbers = #tpu.dot_dimension_numbers<[1], [0], [0], [1], [0, 0, 1, 1], [], []>} : vector<8x32xbf16>, vector<32x16xbf16>, vector<8x16xf32> -> vector<8x16xf32>
    %314 = vector.broadcast %29 : vector<1x16xf32> to vector<8x16xf32>
    %315 = arith.addf %313, %314 : vector<8x16xf32>
    %cst_131 = arith.constant 0.000000e+00 : f32
    %316 = vector.broadcast %cst_131 : f32 to vector<8x16xf32>
    %317 = arith.maximumf %315, %316 : vector<8x16xf32>
    %318 = arith.truncf %317 : vector<8x16xf32> to vector<8x16xbf16>
    %cst_132 = arith.constant dense<0.000000e+00> : vector<4x16xf32>
    %319 = tpu.matmul %32, %318, %cst_132 {dimension_numbers = #tpu.dot_dimension_numbers<[1], [0], [0], [1], [0, 0, 1, 1], [], []>} : vector<4x8xbf16>, vector<8x16xbf16>, vector<4x16xf32> -> vector<4x16xf32>
    %c8_133 = arith.constant 8 : index
    %c0_134 = arith.constant 0 : index
    %320 = vector.load %arg26[%c8_133, %c0_134] : memref<64x32xf32, #tpu.memory_space<vmem>>, vector<8x32xf32>
    %321 = arith.truncf %320 : vector<8x32xf32> to vector<8x32xbf16>
    %cst_135 = arith.constant dense<0.000000e+00> : vector<8x8xf32>
    %322 = tpu.matmul %321, %321, %cst_135 {dimension_numbers = #tpu.dot_dimension_numbers<[1], [1], [0], [0], [0, 0, 1, 0], [], []>} : vector<8x32xbf16>, vector<8x32xbf16>, vector<8x8xf32> -> vector<8x8xf32>
    %cst_136 = arith.constant 0.000000e+00 : f32
    %323 = vector.broadcast %cst_136 : f32 to vector<8x8xf32>
    %324 = arith.cmpf oge, %322, %323 : vector<8x8xf32>
    %cst_137 = arith.constant 0.00999999977 : f32
    %325 = vector.broadcast %cst_137 : f32 to vector<8x8xf32>
    %326 = arith.mulf %325, %322 : vector<8x8xf32>
    %327 = arith.select %324, %322, %326 : vector<8x8xi1>, vector<8x8xf32>
    %328 = arith.addf %327, %30 : vector<8x8xf32>
    %cst_138 = arith.constant dense<0xFF800000> : vector<8xf32>
    %329 = vector.multi_reduction <maximumf>, %328, %cst_138 [1] : vector<8x8xf32> to vector<8xf32>
    %330 = vector.shape_cast %329 : vector<8xf32> to vector<8x1xf32>
    %331 = vector.broadcast %330 : vector<8x1xf32> to vector<8x8xf32>
    %332 = arith.subf %328, %331 : vector<8x8xf32>
    %333 = math.exp %332 : vector<8x8xf32>
    %cst_139 = arith.constant dense<0.000000e+00> : vector<8xf32>
    %334 = vector.multi_reduction <add>, %333, %cst_139 [1] : vector<8x8xf32> to vector<8xf32>
    %335 = vector.shape_cast %334 : vector<8xf32> to vector<8x1xf32>
    %336 = tpu.reciprocal %335 {approx = true} : vector<8x1xf32> -> vector<8x1xf32>
    %337 = vector.broadcast %336 : vector<8x1xf32> to vector<8x8xf32>
    %338 = arith.mulf %333, %337 : vector<8x8xf32>
    %339 = arith.mulf %338, %31 : vector<8x8xf32>
    %340 = arith.truncf %339 : vector<8x8xf32> to vector<8x8xbf16>
    %cst_140 = arith.constant dense<0.000000e+00> : vector<8x32xf32>
    %341 = tpu.matmul %340, %321, %cst_140 {dimension_numbers = #tpu.dot_dimension_numbers<[1], [0], [0], [1], [0, 0, 1, 1], [], []>} : vector<8x8xbf16>, vector<8x32xbf16>, vector<8x32xf32> -> vector<8x32xf32>
    %342 = arith.addf %341, %320 : vector<8x32xf32>
    %343 = arith.truncf %342 : vector<8x32xf32> to vector<8x32xbf16>
    %cst_141 = arith.constant dense<0.000000e+00> : vector<8x16xf32>
    %344 = tpu.matmul %343, %28, %cst_141 {dimension_numbers = #tpu.dot_dimension_numbers<[1], [0], [0], [1], [0, 0, 1, 1], [], []>} : vector<8x32xbf16>, vector<32x16xbf16>, vector<8x16xf32> -> vector<8x16xf32>
    %345 = vector.broadcast %29 : vector<1x16xf32> to vector<8x16xf32>
    %346 = arith.addf %344, %345 : vector<8x16xf32>
    %cst_142 = arith.constant 0.000000e+00 : f32
    %347 = vector.broadcast %cst_142 : f32 to vector<8x16xf32>
    %348 = arith.maximumf %346, %347 : vector<8x16xf32>
    %349 = arith.truncf %348 : vector<8x16xf32> to vector<8x16xbf16>
    %cst_143 = arith.constant dense<0.000000e+00> : vector<4x16xf32>
    %350 = tpu.matmul %32, %349, %cst_143 {dimension_numbers = #tpu.dot_dimension_numbers<[1], [0], [0], [1], [0, 0, 1, 1], [], []>} : vector<4x8xbf16>, vector<8x16xbf16>, vector<4x16xf32> -> vector<4x16xf32>
    %351 = arith.addf %319, %350 : vector<4x16xf32>
    %c16_144 = arith.constant 16 : index
    %c0_145 = arith.constant 0 : index
    %352 = vector.load %arg26[%c16_144, %c0_145] : memref<64x32xf32, #tpu.memory_space<vmem>>, vector<8x32xf32>
    %353 = arith.truncf %352 : vector<8x32xf32> to vector<8x32xbf16>
    %cst_146 = arith.constant dense<0.000000e+00> : vector<8x8xf32>
    %354 = tpu.matmul %353, %353, %cst_146 {dimension_numbers = #tpu.dot_dimension_numbers<[1], [1], [0], [0], [0, 0, 1, 0], [], []>} : vector<8x32xbf16>, vector<8x32xbf16>, vector<8x8xf32> -> vector<8x8xf32>
    %cst_147 = arith.constant 0.000000e+00 : f32
    %355 = vector.broadcast %cst_147 : f32 to vector<8x8xf32>
    %356 = arith.cmpf oge, %354, %355 : vector<8x8xf32>
    %cst_148 = arith.constant 0.00999999977 : f32
    %357 = vector.broadcast %cst_148 : f32 to vector<8x8xf32>
    %358 = arith.mulf %357, %354 : vector<8x8xf32>
    %359 = arith.select %356, %354, %358 : vector<8x8xi1>, vector<8x8xf32>
    %360 = arith.addf %359, %30 : vector<8x8xf32>
    %cst_149 = arith.constant dense<0xFF800000> : vector<8xf32>
    %361 = vector.multi_reduction <maximumf>, %360, %cst_149 [1] : vector<8x8xf32> to vector<8xf32>
    %362 = vector.shape_cast %361 : vector<8xf32> to vector<8x1xf32>
    %363 = vector.broadcast %362 : vector<8x1xf32> to vector<8x8xf32>
    %364 = arith.subf %360, %363 : vector<8x8xf32>
    %365 = math.exp %364 : vector<8x8xf32>
    %cst_150 = arith.constant dense<0.000000e+00> : vector<8xf32>
    %366 = vector.multi_reduction <add>, %365, %cst_150 [1] : vector<8x8xf32> to vector<8xf32>
    %367 = vector.shape_cast %366 : vector<8xf32> to vector<8x1xf32>
    %368 = tpu.reciprocal %367 {approx = true} : vector<8x1xf32> -> vector<8x1xf32>
    %369 = vector.broadcast %368 : vector<8x1xf32> to vector<8x8xf32>
    %370 = arith.mulf %365, %369 : vector<8x8xf32>
    %371 = arith.mulf %370, %31 : vector<8x8xf32>
    %372 = arith.truncf %371 : vector<8x8xf32> to vector<8x8xbf16>
    %cst_151 = arith.constant dense<0.000000e+00> : vector<8x32xf32>
    %373 = tpu.matmul %372, %353, %cst_151 {dimension_numbers = #tpu.dot_dimension_numbers<[1], [0], [0], [1], [0, 0, 1, 1], [], []>} : vector<8x8xbf16>, vector<8x32xbf16>, vector<8x32xf32> -> vector<8x32xf32>
    %374 = arith.addf %373, %352 : vector<8x32xf32>
    %375 = arith.truncf %374 : vector<8x32xf32> to vector<8x32xbf16>
    %cst_152 = arith.constant dense<0.000000e+00> : vector<8x16xf32>
    %376 = tpu.matmul %375, %28, %cst_152 {dimension_numbers = #tpu.dot_dimension_numbers<[1], [0], [0], [1], [0, 0, 1, 1], [], []>} : vector<8x32xbf16>, vector<32x16xbf16>, vector<8x16xf32> -> vector<8x16xf32>
    %377 = vector.broadcast %29 : vector<1x16xf32> to vector<8x16xf32>
    %378 = arith.addf %376, %377 : vector<8x16xf32>
    %cst_153 = arith.constant 0.000000e+00 : f32
    %379 = vector.broadcast %cst_153 : f32 to vector<8x16xf32>
    %380 = arith.maximumf %378, %379 : vector<8x16xf32>
    %381 = arith.truncf %380 : vector<8x16xf32> to vector<8x16xbf16>
    %cst_154 = arith.constant dense<0.000000e+00> : vector<4x16xf32>
    %382 = tpu.matmul %32, %381, %cst_154 {dimension_numbers = #tpu.dot_dimension_numbers<[1], [0], [0], [1], [0, 0, 1, 1], [], []>} : vector<4x8xbf16>, vector<8x16xbf16>, vector<4x16xf32> -> vector<4x16xf32>
    %383 = arith.addf %351, %382 : vector<4x16xf32>
    %c24_155 = arith.constant 24 : index
    %c0_156 = arith.constant 0 : index
    %384 = vector.load %arg26[%c24_155, %c0_156] : memref<64x32xf32, #tpu.memory_space<vmem>>, vector<8x32xf32>
    %385 = arith.truncf %384 : vector<8x32xf32> to vector<8x32xbf16>
    %cst_157 = arith.constant dense<0.000000e+00> : vector<8x8xf32>
    %386 = tpu.matmul %385, %385, %cst_157 {dimension_numbers = #tpu.dot_dimension_numbers<[1], [1], [0], [0], [0, 0, 1, 0], [], []>} : vector<8x32xbf16>, vector<8x32xbf16>, vector<8x8xf32> -> vector<8x8xf32>
    %cst_158 = arith.constant 0.000000e+00 : f32
    %387 = vector.broadcast %cst_158 : f32 to vector<8x8xf32>
    %388 = arith.cmpf oge, %386, %387 : vector<8x8xf32>
    %cst_159 = arith.constant 0.00999999977 : f32
    %389 = vector.broadcast %cst_159 : f32 to vector<8x8xf32>
    %390 = arith.mulf %389, %386 : vector<8x8xf32>
    %391 = arith.select %388, %386, %390 : vector<8x8xi1>, vector<8x8xf32>
    %392 = arith.addf %391, %30 : vector<8x8xf32>
    %cst_160 = arith.constant dense<0xFF800000> : vector<8xf32>
    %393 = vector.multi_reduction <maximumf>, %392, %cst_160 [1] : vector<8x8xf32> to vector<8xf32>
    %394 = vector.shape_cast %393 : vector<8xf32> to vector<8x1xf32>
    %395 = vector.broadcast %394 : vector<8x1xf32> to vector<8x8xf32>
    %396 = arith.subf %392, %395 : vector<8x8xf32>
    %397 = math.exp %396 : vector<8x8xf32>
    %cst_161 = arith.constant dense<0.000000e+00> : vector<8xf32>
    %398 = vector.multi_reduction <add>, %397, %cst_161 [1] : vector<8x8xf32> to vector<8xf32>
    %399 = vector.shape_cast %398 : vector<8xf32> to vector<8x1xf32>
    %400 = tpu.reciprocal %399 {approx = true} : vector<8x1xf32> -> vector<8x1xf32>
    %401 = vector.broadcast %400 : vector<8x1xf32> to vector<8x8xf32>
    %402 = arith.mulf %397, %401 : vector<8x8xf32>
    %403 = arith.mulf %402, %31 : vector<8x8xf32>
    %404 = arith.truncf %403 : vector<8x8xf32> to vector<8x8xbf16>
    %cst_162 = arith.constant dense<0.000000e+00> : vector<8x32xf32>
    %405 = tpu.matmul %404, %385, %cst_162 {dimension_numbers = #tpu.dot_dimension_numbers<[1], [0], [0], [1], [0, 0, 1, 1], [], []>} : vector<8x8xbf16>, vector<8x32xbf16>, vector<8x32xf32> -> vector<8x32xf32>
    %406 = arith.addf %405, %384 : vector<8x32xf32>
    %407 = arith.truncf %406 : vector<8x32xf32> to vector<8x32xbf16>
    %cst_163 = arith.constant dense<0.000000e+00> : vector<8x16xf32>
    %408 = tpu.matmul %407, %28, %cst_163 {dimension_numbers = #tpu.dot_dimension_numbers<[1], [0], [0], [1], [0, 0, 1, 1], [], []>} : vector<8x32xbf16>, vector<32x16xbf16>, vector<8x16xf32> -> vector<8x16xf32>
    %409 = vector.broadcast %29 : vector<1x16xf32> to vector<8x16xf32>
    %410 = arith.addf %408, %409 : vector<8x16xf32>
    %cst_164 = arith.constant 0.000000e+00 : f32
    %411 = vector.broadcast %cst_164 : f32 to vector<8x16xf32>
    %412 = arith.maximumf %410, %411 : vector<8x16xf32>
    %413 = arith.truncf %412 : vector<8x16xf32> to vector<8x16xbf16>
    %cst_165 = arith.constant dense<0.000000e+00> : vector<4x16xf32>
    %414 = tpu.matmul %32, %413, %cst_165 {dimension_numbers = #tpu.dot_dimension_numbers<[1], [0], [0], [1], [0, 0, 1, 1], [], []>} : vector<4x8xbf16>, vector<8x16xbf16>, vector<4x16xf32> -> vector<4x16xf32>
    %415 = arith.addf %383, %414 : vector<4x16xf32>
    %c0_166 = arith.constant 0 : index
    %c0_167 = arith.constant 0 : index
    %416 = vector.load %arg28[%c0_166, %c0_167] : memref<8x16xf32, #tpu.memory_space<vmem>>, vector<4x16xf32>
    tpu.vector_store %arg28[%c0_166, %c0_167], %415 {strides = array<i32>} : memref<8x16xf32, #tpu.memory_space<vmem>>, vector<4x16xf32>,
    %c32 = arith.constant 32 : index
    %c0_168 = arith.constant 0 : index
    %417 = vector.load %arg26[%c32, %c0_168] : memref<64x32xf32, #tpu.memory_space<vmem>>, vector<4x32xf32>
    %418 = arith.truncf %417 : vector<4x32xf32> to vector<4x32xbf16>
    %cst_169 = arith.constant dense<0.000000e+00> : vector<4x4xf32>
    %419 = tpu.matmul %418, %418, %cst_169 {dimension_numbers = #tpu.dot_dimension_numbers<[1], [1], [0], [0], [0, 0, 1, 0], [], []>} : vector<4x32xbf16>, vector<4x32xbf16>, vector<4x4xf32> -> vector<4x4xf32>
    %cst_170 = arith.constant 0.000000e+00 : f32
    %420 = vector.broadcast %cst_170 : f32 to vector<4x4xf32>
    %421 = arith.cmpf oge, %419, %420 : vector<4x4xf32>
    %cst_171 = arith.constant 0.00999999977 : f32
    %422 = vector.broadcast %cst_171 : f32 to vector<4x4xf32>
    %423 = arith.mulf %422, %419 : vector<4x4xf32>
    %424 = arith.select %421, %419, %423 : vector<4x4xi1>, vector<4x4xf32>
    %425 = arith.addf %424, %25 : vector<4x4xf32>
    %cst_172 = arith.constant dense<0xFF800000> : vector<4xf32>
    %426 = vector.multi_reduction <maximumf>, %425, %cst_172 [1] : vector<4x4xf32> to vector<4xf32>
    %427 = vector.shape_cast %426 : vector<4xf32> to vector<4x1xf32>
    %428 = vector.broadcast %427 : vector<4x1xf32> to vector<4x4xf32>
    %429 = arith.subf %425, %428 : vector<4x4xf32>
    %430 = math.exp %429 : vector<4x4xf32>
    %cst_173 = arith.constant dense<0.000000e+00> : vector<4xf32>
    %431 = vector.multi_reduction <add>, %430, %cst_173 [1] : vector<4x4xf32> to vector<4xf32>
    %432 = vector.shape_cast %431 : vector<4xf32> to vector<4x1xf32>
    %433 = tpu.reciprocal %432 {approx = true} : vector<4x1xf32> -> vector<4x1xf32>
    %434 = vector.broadcast %433 : vector<4x1xf32> to vector<4x4xf32>
    %435 = arith.mulf %430, %434 : vector<4x4xf32>
    %436 = arith.mulf %435, %26 : vector<4x4xf32>
    %437 = arith.truncf %436 : vector<4x4xf32> to vector<4x4xbf16>
    %cst_174 = arith.constant dense<0.000000e+00> : vector<4x32xf32>
    %438 = tpu.matmul %437, %418, %cst_174 {dimension_numbers = #tpu.dot_dimension_numbers<[1], [0], [0], [1], [0, 0, 1, 1], [], []>} : vector<4x4xbf16>, vector<4x32xbf16>, vector<4x32xf32> -> vector<4x32xf32>
    %439 = arith.addf %438, %417 : vector<4x32xf32>
    %440 = arith.truncf %439 : vector<4x32xf32> to vector<4x32xbf16>
    %cst_175 = arith.constant dense<0.000000e+00> : vector<4x16xf32>
    %441 = tpu.matmul %440, %23, %cst_175 {dimension_numbers = #tpu.dot_dimension_numbers<[1], [0], [0], [1], [0, 0, 1, 1], [], []>} : vector<4x32xbf16>, vector<32x16xbf16>, vector<4x16xf32> -> vector<4x16xf32>
    %442 = vector.broadcast %24 : vector<1x16xf32> to vector<4x16xf32>
    %443 = arith.addf %441, %442 : vector<4x16xf32>
    %cst_176 = arith.constant 0.000000e+00 : f32
    %444 = vector.broadcast %cst_176 : f32 to vector<4x16xf32>
    %445 = arith.maximumf %443, %444 : vector<4x16xf32>
    %446 = arith.truncf %445 : vector<4x16xf32> to vector<4x16xbf16>
    %cst_177 = arith.constant dense<0.000000e+00> : vector<4x16xf32>
    %447 = tpu.matmul %27, %446, %cst_177 {dimension_numbers = #tpu.dot_dimension_numbers<[1], [0], [0], [1], [0, 0, 1, 1], [], []>} : vector<4x4xbf16>, vector<4x16xbf16>, vector<4x16xf32> -> vector<4x16xf32>
    %c36 = arith.constant 36 : index
    %c0_178 = arith.constant 0 : index
    %448 = vector.load %arg26[%c36, %c0_178] : memref<64x32xf32, #tpu.memory_space<vmem>>, vector<4x32xf32>
    %449 = arith.truncf %448 : vector<4x32xf32> to vector<4x32xbf16>
    %cst_179 = arith.constant dense<0.000000e+00> : vector<4x4xf32>
    %450 = tpu.matmul %449, %449, %cst_179 {dimension_numbers = #tpu.dot_dimension_numbers<[1], [1], [0], [0], [0, 0, 1, 0], [], []>} : vector<4x32xbf16>, vector<4x32xbf16>, vector<4x4xf32> -> vector<4x4xf32>
    %cst_180 = arith.constant 0.000000e+00 : f32
    %451 = vector.broadcast %cst_180 : f32 to vector<4x4xf32>
    %452 = arith.cmpf oge, %450, %451 : vector<4x4xf32>
    %cst_181 = arith.constant 0.00999999977 : f32
    %453 = vector.broadcast %cst_181 : f32 to vector<4x4xf32>
    %454 = arith.mulf %453, %450 : vector<4x4xf32>
    %455 = arith.select %452, %450, %454 : vector<4x4xi1>, vector<4x4xf32>
    %456 = arith.addf %455, %25 : vector<4x4xf32>
    %cst_182 = arith.constant dense<0xFF800000> : vector<4xf32>
    %457 = vector.multi_reduction <maximumf>, %456, %cst_182 [1] : vector<4x4xf32> to vector<4xf32>
    %458 = vector.shape_cast %457 : vector<4xf32> to vector<4x1xf32>
    %459 = vector.broadcast %458 : vector<4x1xf32> to vector<4x4xf32>
    %460 = arith.subf %456, %459 : vector<4x4xf32>
    %461 = math.exp %460 : vector<4x4xf32>
    %cst_183 = arith.constant dense<0.000000e+00> : vector<4xf32>
    %462 = vector.multi_reduction <add>, %461, %cst_183 [1] : vector<4x4xf32> to vector<4xf32>
    %463 = vector.shape_cast %462 : vector<4xf32> to vector<4x1xf32>
    %464 = tpu.reciprocal %463 {approx = true} : vector<4x1xf32> -> vector<4x1xf32>
    %465 = vector.broadcast %464 : vector<4x1xf32> to vector<4x4xf32>
    %466 = arith.mulf %461, %465 : vector<4x4xf32>
    %467 = arith.mulf %466, %26 : vector<4x4xf32>
    %468 = arith.truncf %467 : vector<4x4xf32> to vector<4x4xbf16>
    %cst_184 = arith.constant dense<0.000000e+00> : vector<4x32xf32>
    %469 = tpu.matmul %468, %449, %cst_184 {dimension_numbers = #tpu.dot_dimension_numbers<[1], [0], [0], [1], [0, 0, 1, 1], [], []>} : vector<4x4xbf16>, vector<4x32xbf16>, vector<4x32xf32> -> vector<4x32xf32>
    %470 = arith.addf %469, %448 : vector<4x32xf32>
    %471 = arith.truncf %470 : vector<4x32xf32> to vector<4x32xbf16>
    %cst_185 = arith.constant dense<0.000000e+00> : vector<4x16xf32>
    %472 = tpu.matmul %471, %23, %cst_185 {dimension_numbers = #tpu.dot_dimension_numbers<[1], [0], [0], [1], [0, 0, 1, 1], [], []>} : vector<4x32xbf16>, vector<32x16xbf16>, vector<4x16xf32> -> vector<4x16xf32>
    %473 = vector.broadcast %24 : vector<1x16xf32> to vector<4x16xf32>
    %474 = arith.addf %472, %473 : vector<4x16xf32>
    %cst_186 = arith.constant 0.000000e+00 : f32
    %475 = vector.broadcast %cst_186 : f32 to vector<4x16xf32>
    %476 = arith.maximumf %474, %475 : vector<4x16xf32>
    %477 = arith.truncf %476 : vector<4x16xf32> to vector<4x16xbf16>
    %cst_187 = arith.constant dense<0.000000e+00> : vector<4x16xf32>
    %478 = tpu.matmul %27, %477, %cst_187 {dimension_numbers = #tpu.dot_dimension_numbers<[1], [0], [0], [1], [0, 0, 1, 1], [], []>} : vector<4x4xbf16>, vector<4x16xbf16>, vector<4x16xf32> -> vector<4x16xf32>
    %479 = arith.addf %447, %478 : vector<4x16xf32>
    %c40 = arith.constant 40 : index
    %c0_188 = arith.constant 0 : index
    %480 = vector.load %arg26[%c40, %c0_188] : memref<64x32xf32, #tpu.memory_space<vmem>>, vector<4x32xf32>
    %481 = arith.truncf %480 : vector<4x32xf32> to vector<4x32xbf16>
    %cst_189 = arith.constant dense<0.000000e+00> : vector<4x4xf32>
    %482 = tpu.matmul %481, %481, %cst_189 {dimension_numbers = #tpu.dot_dimension_numbers<[1], [1], [0], [0], [0, 0, 1, 0], [], []>} : vector<4x32xbf16>, vector<4x32xbf16>, vector<4x4xf32> -> vector<4x4xf32>
    %cst_190 = arith.constant 0.000000e+00 : f32
    %483 = vector.broadcast %cst_190 : f32 to vector<4x4xf32>
    %484 = arith.cmpf oge, %482, %483 : vector<4x4xf32>
    %cst_191 = arith.constant 0.00999999977 : f32
    %485 = vector.broadcast %cst_191 : f32 to vector<4x4xf32>
    %486 = arith.mulf %485, %482 : vector<4x4xf32>
    %487 = arith.select %484, %482, %486 : vector<4x4xi1>, vector<4x4xf32>
    %488 = arith.addf %487, %25 : vector<4x4xf32>
    %cst_192 = arith.constant dense<0xFF800000> : vector<4xf32>
    %489 = vector.multi_reduction <maximumf>, %488, %cst_192 [1] : vector<4x4xf32> to vector<4xf32>
    %490 = vector.shape_cast %489 : vector<4xf32> to vector<4x1xf32>
    %491 = vector.broadcast %490 : vector<4x1xf32> to vector<4x4xf32>
    %492 = arith.subf %488, %491 : vector<4x4xf32>
    %493 = math.exp %492 : vector<4x4xf32>
    %cst_193 = arith.constant dense<0.000000e+00> : vector<4xf32>
    %494 = vector.multi_reduction <add>, %493, %cst_193 [1] : vector<4x4xf32> to vector<4xf32>
    %495 = vector.shape_cast %494 : vector<4xf32> to vector<4x1xf32>
    %496 = tpu.reciprocal %495 {approx = true} : vector<4x1xf32> -> vector<4x1xf32>
    %497 = vector.broadcast %496 : vector<4x1xf32> to vector<4x4xf32>
    %498 = arith.mulf %493, %497 : vector<4x4xf32>
    %499 = arith.mulf %498, %26 : vector<4x4xf32>
    %500 = arith.truncf %499 : vector<4x4xf32> to vector<4x4xbf16>
    %cst_194 = arith.constant dense<0.000000e+00> : vector<4x32xf32>
    %501 = tpu.matmul %500, %481, %cst_194 {dimension_numbers = #tpu.dot_dimension_numbers<[1], [0], [0], [1], [0, 0, 1, 1], [], []>} : vector<4x4xbf16>, vector<4x32xbf16>, vector<4x32xf32> -> vector<4x32xf32>
    %502 = arith.addf %501, %480 : vector<4x32xf32>
    %503 = arith.truncf %502 : vector<4x32xf32> to vector<4x32xbf16>
    %cst_195 = arith.constant dense<0.000000e+00> : vector<4x16xf32>
    %504 = tpu.matmul %503, %23, %cst_195 {dimension_numbers = #tpu.dot_dimension_numbers<[1], [0], [0], [1], [0, 0, 1, 1], [], []>} : vector<4x32xbf16>, vector<32x16xbf16>, vector<4x16xf32> -> vector<4x16xf32>
    %505 = vector.broadcast %24 : vector<1x16xf32> to vector<4x16xf32>
    %506 = arith.addf %504, %505 : vector<4x16xf32>
    %cst_196 = arith.constant 0.000000e+00 : f32
    %507 = vector.broadcast %cst_196 : f32 to vector<4x16xf32>
    %508 = arith.maximumf %506, %507 : vector<4x16xf32>
    %509 = arith.truncf %508 : vector<4x16xf32> to vector<4x16xbf16>
    %cst_197 = arith.constant dense<0.000000e+00> : vector<4x16xf32>
    %510 = tpu.matmul %27, %509, %cst_197 {dimension_numbers = #tpu.dot_dimension_numbers<[1], [0], [0], [1], [0, 0, 1, 1], [], []>} : vector<4x4xbf16>, vector<4x16xbf16>, vector<4x16xf32> -> vector<4x16xf32>
    %511 = arith.addf %479, %510 : vector<4x16xf32>
    %c44 = arith.constant 44 : index
    %c0_198 = arith.constant 0 : index
    %512 = vector.load %arg26[%c44, %c0_198] : memref<64x32xf32, #tpu.memory_space<vmem>>, vector<4x32xf32>
    %513 = arith.truncf %512 : vector<4x32xf32> to vector<4x32xbf16>
    %cst_199 = arith.constant dense<0.000000e+00> : vector<4x4xf32>
    %514 = tpu.matmul %513, %513, %cst_199 {dimension_numbers = #tpu.dot_dimension_numbers<[1], [1], [0], [0], [0, 0, 1, 0], [], []>} : vector<4x32xbf16>, vector<4x32xbf16>, vector<4x4xf32> -> vector<4x4xf32>
    %cst_200 = arith.constant 0.000000e+00 : f32
    %515 = vector.broadcast %cst_200 : f32 to vector<4x4xf32>
    %516 = arith.cmpf oge, %514, %515 : vector<4x4xf32>
    %cst_201 = arith.constant 0.00999999977 : f32
    %517 = vector.broadcast %cst_201 : f32 to vector<4x4xf32>
    %518 = arith.mulf %517, %514 : vector<4x4xf32>
    %519 = arith.select %516, %514, %518 : vector<4x4xi1>, vector<4x4xf32>
    %520 = arith.addf %519, %25 : vector<4x4xf32>
    %cst_202 = arith.constant dense<0xFF800000> : vector<4xf32>
    %521 = vector.multi_reduction <maximumf>, %520, %cst_202 [1] : vector<4x4xf32> to vector<4xf32>
    %522 = vector.shape_cast %521 : vector<4xf32> to vector<4x1xf32>
    %523 = vector.broadcast %522 : vector<4x1xf32> to vector<4x4xf32>
    %524 = arith.subf %520, %523 : vector<4x4xf32>
    %525 = math.exp %524 : vector<4x4xf32>
    %cst_203 = arith.constant dense<0.000000e+00> : vector<4xf32>
    %526 = vector.multi_reduction <add>, %525, %cst_203 [1] : vector<4x4xf32> to vector<4xf32>
    %527 = vector.shape_cast %526 : vector<4xf32> to vector<4x1xf32>
    %528 = tpu.reciprocal %527 {approx = true} : vector<4x1xf32> -> vector<4x1xf32>
    %529 = vector.broadcast %528 : vector<4x1xf32> to vector<4x4xf32>
    %530 = arith.mulf %525, %529 : vector<4x4xf32>
    %531 = arith.mulf %530, %26 : vector<4x4xf32>
    %532 = arith.truncf %531 : vector<4x4xf32> to vector<4x4xbf16>
    %cst_204 = arith.constant dense<0.000000e+00> : vector<4x32xf32>
    %533 = tpu.matmul %532, %513, %cst_204 {dimension_numbers = #tpu.dot_dimension_numbers<[1], [0], [0], [1], [0, 0, 1, 1], [], []>} : vector<4x4xbf16>, vector<4x32xbf16>, vector<4x32xf32> -> vector<4x32xf32>
    %534 = arith.addf %533, %512 : vector<4x32xf32>
    %535 = arith.truncf %534 : vector<4x32xf32> to vector<4x32xbf16>
    %cst_205 = arith.constant dense<0.000000e+00> : vector<4x16xf32>
    %536 = tpu.matmul %535, %23, %cst_205 {dimension_numbers = #tpu.dot_dimension_numbers<[1], [0], [0], [1], [0, 0, 1, 1], [], []>} : vector<4x32xbf16>, vector<32x16xbf16>, vector<4x16xf32> -> vector<4x16xf32>
    %537 = vector.broadcast %24 : vector<1x16xf32> to vector<4x16xf32>
    %538 = arith.addf %536, %537 : vector<4x16xf32>
    %cst_206 = arith.constant 0.000000e+00 : f32
    %539 = vector.broadcast %cst_206 : f32 to vector<4x16xf32>
    %540 = arith.maximumf %538, %539 : vector<4x16xf32>
    %541 = arith.truncf %540 : vector<4x16xf32> to vector<4x16xbf16>
    %cst_207 = arith.constant dense<0.000000e+00> : vector<4x16xf32>
    %542 = tpu.matmul %27, %541, %cst_207 {dimension_numbers = #tpu.dot_dimension_numbers<[1], [0], [0], [1], [0, 0, 1, 1], [], []>} : vector<4x4xbf16>, vector<4x16xbf16>, vector<4x16xf32> -> vector<4x16xf32>
    %543 = arith.addf %511, %542 : vector<4x16xf32>
    %c48 = arith.constant 48 : index
    %c0_208 = arith.constant 0 : index
    %544 = vector.load %arg26[%c48, %c0_208] : memref<64x32xf32, #tpu.memory_space<vmem>>, vector<4x32xf32>
    %545 = arith.truncf %544 : vector<4x32xf32> to vector<4x32xbf16>
    %cst_209 = arith.constant dense<0.000000e+00> : vector<4x4xf32>
    %546 = tpu.matmul %545, %545, %cst_209 {dimension_numbers = #tpu.dot_dimension_numbers<[1], [1], [0], [0], [0, 0, 1, 0], [], []>} : vector<4x32xbf16>, vector<4x32xbf16>, vector<4x4xf32> -> vector<4x4xf32>
    %cst_210 = arith.constant 0.000000e+00 : f32
    %547 = vector.broadcast %cst_210 : f32 to vector<4x4xf32>
    %548 = arith.cmpf oge, %546, %547 : vector<4x4xf32>
    %cst_211 = arith.constant 0.00999999977 : f32
    %549 = vector.broadcast %cst_211 : f32 to vector<4x4xf32>
    %550 = arith.mulf %549, %546 : vector<4x4xf32>
    %551 = arith.select %548, %546, %550 : vector<4x4xi1>, vector<4x4xf32>
    %552 = arith.addf %551, %25 : vector<4x4xf32>
    %cst_212 = arith.constant dense<0xFF800000> : vector<4xf32>
    %553 = vector.multi_reduction <maximumf>, %552, %cst_212 [1] : vector<4x4xf32> to vector<4xf32>
    %554 = vector.shape_cast %553 : vector<4xf32> to vector<4x1xf32>
    %555 = vector.broadcast %554 : vector<4x1xf32> to vector<4x4xf32>
    %556 = arith.subf %552, %555 : vector<4x4xf32>
    %557 = math.exp %556 : vector<4x4xf32>
    %cst_213 = arith.constant dense<0.000000e+00> : vector<4xf32>
    %558 = vector.multi_reduction <add>, %557, %cst_213 [1] : vector<4x4xf32> to vector<4xf32>
    %559 = vector.shape_cast %558 : vector<4xf32> to vector<4x1xf32>
    %560 = tpu.reciprocal %559 {approx = true} : vector<4x1xf32> -> vector<4x1xf32>
    %561 = vector.broadcast %560 : vector<4x1xf32> to vector<4x4xf32>
    %562 = arith.mulf %557, %561 : vector<4x4xf32>
    %563 = arith.mulf %562, %26 : vector<4x4xf32>
    %564 = arith.truncf %563 : vector<4x4xf32> to vector<4x4xbf16>
    %cst_214 = arith.constant dense<0.000000e+00> : vector<4x32xf32>
    %565 = tpu.matmul %564, %545, %cst_214 {dimension_numbers = #tpu.dot_dimension_numbers<[1], [0], [0], [1], [0, 0, 1, 1], [], []>} : vector<4x4xbf16>, vector<4x32xbf16>, vector<4x32xf32> -> vector<4x32xf32>
    %566 = arith.addf %565, %544 : vector<4x32xf32>
    %567 = arith.truncf %566 : vector<4x32xf32> to vector<4x32xbf16>
    %cst_215 = arith.constant dense<0.000000e+00> : vector<4x16xf32>
    %568 = tpu.matmul %567, %23, %cst_215 {dimension_numbers = #tpu.dot_dimension_numbers<[1], [0], [0], [1], [0, 0, 1, 1], [], []>} : vector<4x32xbf16>, vector<32x16xbf16>, vector<4x16xf32> -> vector<4x16xf32>
    %569 = vector.broadcast %24 : vector<1x16xf32> to vector<4x16xf32>
    %570 = arith.addf %568, %569 : vector<4x16xf32>
    %cst_216 = arith.constant 0.000000e+00 : f32
    %571 = vector.broadcast %cst_216 : f32 to vector<4x16xf32>
    %572 = arith.maximumf %570, %571 : vector<4x16xf32>
    %573 = arith.truncf %572 : vector<4x16xf32> to vector<4x16xbf16>
    %cst_217 = arith.constant dense<0.000000e+00> : vector<4x16xf32>
    %574 = tpu.matmul %27, %573, %cst_217 {dimension_numbers = #tpu.dot_dimension_numbers<[1], [0], [0], [1], [0, 0, 1, 1], [], []>} : vector<4x4xbf16>, vector<4x16xbf16>, vector<4x16xf32> -> vector<4x16xf32>
    %575 = arith.addf %543, %574 : vector<4x16xf32>
    %c52 = arith.constant 52 : index
    %c0_218 = arith.constant 0 : index
    %576 = vector.load %arg26[%c52, %c0_218] : memref<64x32xf32, #tpu.memory_space<vmem>>, vector<4x32xf32>
    %577 = arith.truncf %576 : vector<4x32xf32> to vector<4x32xbf16>
    %cst_219 = arith.constant dense<0.000000e+00> : vector<4x4xf32>
    %578 = tpu.matmul %577, %577, %cst_219 {dimension_numbers = #tpu.dot_dimension_numbers<[1], [1], [0], [0], [0, 0, 1, 0], [], []>} : vector<4x32xbf16>, vector<4x32xbf16>, vector<4x4xf32> -> vector<4x4xf32>
    %cst_220 = arith.constant 0.000000e+00 : f32
    %579 = vector.broadcast %cst_220 : f32 to vector<4x4xf32>
    %580 = arith.cmpf oge, %578, %579 : vector<4x4xf32>
    %cst_221 = arith.constant 0.00999999977 : f32
    %581 = vector.broadcast %cst_221 : f32 to vector<4x4xf32>
    %582 = arith.mulf %581, %578 : vector<4x4xf32>
    %583 = arith.select %580, %578, %582 : vector<4x4xi1>, vector<4x4xf32>
    %584 = arith.addf %583, %25 : vector<4x4xf32>
    %cst_222 = arith.constant dense<0xFF800000> : vector<4xf32>
    %585 = vector.multi_reduction <maximumf>, %584, %cst_222 [1] : vector<4x4xf32> to vector<4xf32>
    %586 = vector.shape_cast %585 : vector<4xf32> to vector<4x1xf32>
    %587 = vector.broadcast %586 : vector<4x1xf32> to vector<4x4xf32>
    %588 = arith.subf %584, %587 : vector<4x4xf32>
    %589 = math.exp %588 : vector<4x4xf32>
    %cst_223 = arith.constant dense<0.000000e+00> : vector<4xf32>
    %590 = vector.multi_reduction <add>, %589, %cst_223 [1] : vector<4x4xf32> to vector<4xf32>
    %591 = vector.shape_cast %590 : vector<4xf32> to vector<4x1xf32>
    %592 = tpu.reciprocal %591 {approx = true} : vector<4x1xf32> -> vector<4x1xf32>
    %593 = vector.broadcast %592 : vector<4x1xf32> to vector<4x4xf32>
    %594 = arith.mulf %589, %593 : vector<4x4xf32>
    %595 = arith.mulf %594, %26 : vector<4x4xf32>
    %596 = arith.truncf %595 : vector<4x4xf32> to vector<4x4xbf16>
    %cst_224 = arith.constant dense<0.000000e+00> : vector<4x32xf32>
    %597 = tpu.matmul %596, %577, %cst_224 {dimension_numbers = #tpu.dot_dimension_numbers<[1], [0], [0], [1], [0, 0, 1, 1], [], []>} : vector<4x4xbf16>, vector<4x32xbf16>, vector<4x32xf32> -> vector<4x32xf32>
    %598 = arith.addf %597, %576 : vector<4x32xf32>
    %599 = arith.truncf %598 : vector<4x32xf32> to vector<4x32xbf16>
    %cst_225 = arith.constant dense<0.000000e+00> : vector<4x16xf32>
    %600 = tpu.matmul %599, %23, %cst_225 {dimension_numbers = #tpu.dot_dimension_numbers<[1], [0], [0], [1], [0, 0, 1, 1], [], []>} : vector<4x32xbf16>, vector<32x16xbf16>, vector<4x16xf32> -> vector<4x16xf32>
    %601 = vector.broadcast %24 : vector<1x16xf32> to vector<4x16xf32>
    %602 = arith.addf %600, %601 : vector<4x16xf32>
    %cst_226 = arith.constant 0.000000e+00 : f32
    %603 = vector.broadcast %cst_226 : f32 to vector<4x16xf32>
    %604 = arith.maximumf %602, %603 : vector<4x16xf32>
    %605 = arith.truncf %604 : vector<4x16xf32> to vector<4x16xbf16>
    %cst_227 = arith.constant dense<0.000000e+00> : vector<4x16xf32>
    %606 = tpu.matmul %27, %605, %cst_227 {dimension_numbers = #tpu.dot_dimension_numbers<[1], [0], [0], [1], [0, 0, 1, 1], [], []>} : vector<4x4xbf16>, vector<4x16xbf16>, vector<4x16xf32> -> vector<4x16xf32>
    %607 = arith.addf %575, %606 : vector<4x16xf32>
    %c56 = arith.constant 56 : index
    %c0_228 = arith.constant 0 : index
    %608 = vector.load %arg26[%c56, %c0_228] : memref<64x32xf32, #tpu.memory_space<vmem>>, vector<4x32xf32>
    %609 = arith.truncf %608 : vector<4x32xf32> to vector<4x32xbf16>
    %cst_229 = arith.constant dense<0.000000e+00> : vector<4x4xf32>
    %610 = tpu.matmul %609, %609, %cst_229 {dimension_numbers = #tpu.dot_dimension_numbers<[1], [1], [0], [0], [0, 0, 1, 0], [], []>} : vector<4x32xbf16>, vector<4x32xbf16>, vector<4x4xf32> -> vector<4x4xf32>
    %cst_230 = arith.constant 0.000000e+00 : f32
    %611 = vector.broadcast %cst_230 : f32 to vector<4x4xf32>
    %612 = arith.cmpf oge, %610, %611 : vector<4x4xf32>
    %cst_231 = arith.constant 0.00999999977 : f32
    %613 = vector.broadcast %cst_231 : f32 to vector<4x4xf32>
    %614 = arith.mulf %613, %610 : vector<4x4xf32>
    %615 = arith.select %612, %610, %614 : vector<4x4xi1>, vector<4x4xf32>
    %616 = arith.addf %615, %25 : vector<4x4xf32>
    %cst_232 = arith.constant dense<0xFF800000> : vector<4xf32>
    %617 = vector.multi_reduction <maximumf>, %616, %cst_232 [1] : vector<4x4xf32> to vector<4xf32>
    %618 = vector.shape_cast %617 : vector<4xf32> to vector<4x1xf32>
    %619 = vector.broadcast %618 : vector<4x1xf32> to vector<4x4xf32>
    %620 = arith.subf %616, %619 : vector<4x4xf32>
    %621 = math.exp %620 : vector<4x4xf32>
    %cst_233 = arith.constant dense<0.000000e+00> : vector<4xf32>
    %622 = vector.multi_reduction <add>, %621, %cst_233 [1] : vector<4x4xf32> to vector<4xf32>
    %623 = vector.shape_cast %622 : vector<4xf32> to vector<4x1xf32>
    %624 = tpu.reciprocal %623 {approx = true} : vector<4x1xf32> -> vector<4x1xf32>
    %625 = vector.broadcast %624 : vector<4x1xf32> to vector<4x4xf32>
    %626 = arith.mulf %621, %625 : vector<4x4xf32>
    %627 = arith.mulf %626, %26 : vector<4x4xf32>
    %628 = arith.truncf %627 : vector<4x4xf32> to vector<4x4xbf16>
    %cst_234 = arith.constant dense<0.000000e+00> : vector<4x32xf32>
    %629 = tpu.matmul %628, %609, %cst_234 {dimension_numbers = #tpu.dot_dimension_numbers<[1], [0], [0], [1], [0, 0, 1, 1], [], []>} : vector<4x4xbf16>, vector<4x32xbf16>, vector<4x32xf32> -> vector<4x32xf32>
    %630 = arith.addf %629, %608 : vector<4x32xf32>
    %631 = arith.truncf %630 : vector<4x32xf32> to vector<4x32xbf16>
    %cst_235 = arith.constant dense<0.000000e+00> : vector<4x16xf32>
    %632 = tpu.matmul %631, %23, %cst_235 {dimension_numbers = #tpu.dot_dimension_numbers<[1], [0], [0], [1], [0, 0, 1, 1], [], []>} : vector<4x32xbf16>, vector<32x16xbf16>, vector<4x16xf32> -> vector<4x16xf32>
    %633 = vector.broadcast %24 : vector<1x16xf32> to vector<4x16xf32>
    %634 = arith.addf %632, %633 : vector<4x16xf32>
    %cst_236 = arith.constant 0.000000e+00 : f32
    %635 = vector.broadcast %cst_236 : f32 to vector<4x16xf32>
    %636 = arith.maximumf %634, %635 : vector<4x16xf32>
    %637 = arith.truncf %636 : vector<4x16xf32> to vector<4x16xbf16>
    %cst_237 = arith.constant dense<0.000000e+00> : vector<4x16xf32>
    %638 = tpu.matmul %27, %637, %cst_237 {dimension_numbers = #tpu.dot_dimension_numbers<[1], [0], [0], [1], [0, 0, 1, 1], [], []>} : vector<4x4xbf16>, vector<4x16xbf16>, vector<4x16xf32> -> vector<4x16xf32>
    %639 = arith.addf %607, %638 : vector<4x16xf32>
    %c60 = arith.constant 60 : index
    %c0_238 = arith.constant 0 : index
    %640 = vector.load %arg26[%c60, %c0_238] : memref<64x32xf32, #tpu.memory_space<vmem>>, vector<4x32xf32>
    %641 = arith.truncf %640 : vector<4x32xf32> to vector<4x32xbf16>
    %cst_239 = arith.constant dense<0.000000e+00> : vector<4x4xf32>
    %642 = tpu.matmul %641, %641, %cst_239 {dimension_numbers = #tpu.dot_dimension_numbers<[1], [1], [0], [0], [0, 0, 1, 0], [], []>} : vector<4x32xbf16>, vector<4x32xbf16>, vector<4x4xf32> -> vector<4x4xf32>
    %cst_240 = arith.constant 0.000000e+00 : f32
    %643 = vector.broadcast %cst_240 : f32 to vector<4x4xf32>
    %644 = arith.cmpf oge, %642, %643 : vector<4x4xf32>
    %cst_241 = arith.constant 0.00999999977 : f32
    %645 = vector.broadcast %cst_241 : f32 to vector<4x4xf32>
    %646 = arith.mulf %645, %642 : vector<4x4xf32>
    %647 = arith.select %644, %642, %646 : vector<4x4xi1>, vector<4x4xf32>
    %648 = arith.addf %647, %25 : vector<4x4xf32>
    %cst_242 = arith.constant dense<0xFF800000> : vector<4xf32>
    %649 = vector.multi_reduction <maximumf>, %648, %cst_242 [1] : vector<4x4xf32> to vector<4xf32>
    %650 = vector.shape_cast %649 : vector<4xf32> to vector<4x1xf32>
    %651 = vector.broadcast %650 : vector<4x1xf32> to vector<4x4xf32>
    %652 = arith.subf %648, %651 : vector<4x4xf32>
    %653 = math.exp %652 : vector<4x4xf32>
    %cst_243 = arith.constant dense<0.000000e+00> : vector<4xf32>
    %654 = vector.multi_reduction <add>, %653, %cst_243 [1] : vector<4x4xf32> to vector<4xf32>
    %655 = vector.shape_cast %654 : vector<4xf32> to vector<4x1xf32>
    %656 = tpu.reciprocal %655 {approx = true} : vector<4x1xf32> -> vector<4x1xf32>
    %657 = vector.broadcast %656 : vector<4x1xf32> to vector<4x4xf32>
    %658 = arith.mulf %653, %657 : vector<4x4xf32>
    %659 = arith.mulf %658, %26 : vector<4x4xf32>
    %660 = arith.truncf %659 : vector<4x4xf32> to vector<4x4xbf16>
    %cst_244 = arith.constant dense<0.000000e+00> : vector<4x32xf32>
    %661 = tpu.matmul %660, %641, %cst_244 {dimension_numbers = #tpu.dot_dimension_numbers<[1], [0], [0], [1], [0, 0, 1, 1], [], []>} : vector<4x4xbf16>, vector<4x32xbf16>, vector<4x32xf32> -> vector<4x32xf32>
    %662 = arith.addf %661, %640 : vector<4x32xf32>
    %663 = arith.truncf %662 : vector<4x32xf32> to vector<4x32xbf16>
    %cst_245 = arith.constant dense<0.000000e+00> : vector<4x16xf32>
    %664 = tpu.matmul %663, %23, %cst_245 {dimension_numbers = #tpu.dot_dimension_numbers<[1], [0], [0], [1], [0, 0, 1, 1], [], []>} : vector<4x32xbf16>, vector<32x16xbf16>, vector<4x16xf32> -> vector<4x16xf32>
    %665 = vector.broadcast %24 : vector<1x16xf32> to vector<4x16xf32>
    %666 = arith.addf %664, %665 : vector<4x16xf32>
    %cst_246 = arith.constant 0.000000e+00 : f32
    %667 = vector.broadcast %cst_246 : f32 to vector<4x16xf32>
    %668 = arith.maximumf %666, %667 : vector<4x16xf32>
    %669 = arith.truncf %668 : vector<4x16xf32> to vector<4x16xbf16>
    %cst_247 = arith.constant dense<0.000000e+00> : vector<4x16xf32>
    %670 = tpu.matmul %27, %669, %cst_247 {dimension_numbers = #tpu.dot_dimension_numbers<[1], [0], [0], [1], [0, 0, 1, 1], [], []>} : vector<4x4xbf16>, vector<4x16xbf16>, vector<4x16xf32> -> vector<4x16xf32>
    %671 = arith.addf %639, %670 : vector<4x16xf32>
    %c4_248 = arith.constant 4 : index
    %c0_249 = arith.constant 0 : index
    %672 = vector.load %arg27[%c4_248, %c0_249] : memref<8x16xf32, #tpu.memory_space<vmem>>, vector<4x16xf32>
    tpu.vector_store %arg27[%c4_248, %c0_249], %671 {strides = array<i32>} : memref<8x16xf32, #tpu.memory_space<vmem>>, vector<4x16xf32>,
    %c32_250 = arith.constant 32 : index
    %c0_251 = arith.constant 0 : index
    %673 = vector.load %arg26[%c32_250, %c0_251] : memref<64x32xf32, #tpu.memory_space<vmem>>, vector<8x32xf32>
    %674 = arith.truncf %673 : vector<8x32xf32> to vector<8x32xbf16>
    %cst_252 = arith.constant dense<0.000000e+00> : vector<8x8xf32>
    %675 = tpu.matmul %674, %674, %cst_252 {dimension_numbers = #tpu.dot_dimension_numbers<[1], [1], [0], [0], [0, 0, 1, 0], [], []>} : vector<8x32xbf16>, vector<8x32xbf16>, vector<8x8xf32> -> vector<8x8xf32>
    %cst_253 = arith.constant 0.000000e+00 : f32
    %676 = vector.broadcast %cst_253 : f32 to vector<8x8xf32>
    %677 = arith.cmpf oge, %675, %676 : vector<8x8xf32>
    %cst_254 = arith.constant 0.00999999977 : f32
    %678 = vector.broadcast %cst_254 : f32 to vector<8x8xf32>
    %679 = arith.mulf %678, %675 : vector<8x8xf32>
    %680 = arith.select %677, %675, %679 : vector<8x8xi1>, vector<8x8xf32>
    %681 = arith.addf %680, %30 : vector<8x8xf32>
    %cst_255 = arith.constant dense<0xFF800000> : vector<8xf32>
    %682 = vector.multi_reduction <maximumf>, %681, %cst_255 [1] : vector<8x8xf32> to vector<8xf32>
    %683 = vector.shape_cast %682 : vector<8xf32> to vector<8x1xf32>
    %684 = vector.broadcast %683 : vector<8x1xf32> to vector<8x8xf32>
    %685 = arith.subf %681, %684 : vector<8x8xf32>
    %686 = math.exp %685 : vector<8x8xf32>
    %cst_256 = arith.constant dense<0.000000e+00> : vector<8xf32>
    %687 = vector.multi_reduction <add>, %686, %cst_256 [1] : vector<8x8xf32> to vector<8xf32>
    %688 = vector.shape_cast %687 : vector<8xf32> to vector<8x1xf32>
    %689 = tpu.reciprocal %688 {approx = true} : vector<8x1xf32> -> vector<8x1xf32>
    %690 = vector.broadcast %689 : vector<8x1xf32> to vector<8x8xf32>
    %691 = arith.mulf %686, %690 : vector<8x8xf32>
    %692 = arith.mulf %691, %31 : vector<8x8xf32>
    %693 = arith.truncf %692 : vector<8x8xf32> to vector<8x8xbf16>
    %cst_257 = arith.constant dense<0.000000e+00> : vector<8x32xf32>
    %694 = tpu.matmul %693, %674, %cst_257 {dimension_numbers = #tpu.dot_dimension_numbers<[1], [0], [0], [1], [0, 0, 1, 1], [], []>} : vector<8x8xbf16>, vector<8x32xbf16>, vector<8x32xf32> -> vector<8x32xf32>
    %695 = arith.addf %694, %673 : vector<8x32xf32>
    %696 = arith.truncf %695 : vector<8x32xf32> to vector<8x32xbf16>
    %cst_258 = arith.constant dense<0.000000e+00> : vector<8x16xf32>
    %697 = tpu.matmul %696, %28, %cst_258 {dimension_numbers = #tpu.dot_dimension_numbers<[1], [0], [0], [1], [0, 0, 1, 1], [], []>} : vector<8x32xbf16>, vector<32x16xbf16>, vector<8x16xf32> -> vector<8x16xf32>
    %698 = vector.broadcast %29 : vector<1x16xf32> to vector<8x16xf32>
    %699 = arith.addf %697, %698 : vector<8x16xf32>
    %cst_259 = arith.constant 0.000000e+00 : f32
    %700 = vector.broadcast %cst_259 : f32 to vector<8x16xf32>
    %701 = arith.maximumf %699, %700 : vector<8x16xf32>
    %702 = arith.truncf %701 : vector<8x16xf32> to vector<8x16xbf16>
    %cst_260 = arith.constant dense<0.000000e+00> : vector<4x16xf32>
    %703 = tpu.matmul %32, %702, %cst_260 {dimension_numbers = #tpu.dot_dimension_numbers<[1], [0], [0], [1], [0, 0, 1, 1], [], []>} : vector<4x8xbf16>, vector<8x16xbf16>, vector<4x16xf32> -> vector<4x16xf32>
    %c40_261 = arith.constant 40 : index
    %c0_262 = arith.constant 0 : index
    %704 = vector.load %arg26[%c40_261, %c0_262] : memref<64x32xf32, #tpu.memory_space<vmem>>, vector<8x32xf32>
    %705 = arith.truncf %704 : vector<8x32xf32> to vector<8x32xbf16>
    %cst_263 = arith.constant dense<0.000000e+00> : vector<8x8xf32>
    %706 = tpu.matmul %705, %705, %cst_263 {dimension_numbers = #tpu.dot_dimension_numbers<[1], [1], [0], [0], [0, 0, 1, 0], [], []>} : vector<8x32xbf16>, vector<8x32xbf16>, vector<8x8xf32> -> vector<8x8xf32>
    %cst_264 = arith.constant 0.000000e+00 : f32
    %707 = vector.broadcast %cst_264 : f32 to vector<8x8xf32>
    %708 = arith.cmpf oge, %706, %707 : vector<8x8xf32>
    %cst_265 = arith.constant 0.00999999977 : f32
    %709 = vector.broadcast %cst_265 : f32 to vector<8x8xf32>
    %710 = arith.mulf %709, %706 : vector<8x8xf32>
    %711 = arith.select %708, %706, %710 : vector<8x8xi1>, vector<8x8xf32>
    %712 = arith.addf %711, %30 : vector<8x8xf32>
    %cst_266 = arith.constant dense<0xFF800000> : vector<8xf32>
    %713 = vector.multi_reduction <maximumf>, %712, %cst_266 [1] : vector<8x8xf32> to vector<8xf32>
    %714 = vector.shape_cast %713 : vector<8xf32> to vector<8x1xf32>
    %715 = vector.broadcast %714 : vector<8x1xf32> to vector<8x8xf32>
    %716 = arith.subf %712, %715 : vector<8x8xf32>
    %717 = math.exp %716 : vector<8x8xf32>
    %cst_267 = arith.constant dense<0.000000e+00> : vector<8xf32>
    %718 = vector.multi_reduction <add>, %717, %cst_267 [1] : vector<8x8xf32> to vector<8xf32>
    %719 = vector.shape_cast %718 : vector<8xf32> to vector<8x1xf32>
    %720 = tpu.reciprocal %719 {approx = true} : vector<8x1xf32> -> vector<8x1xf32>
    %721 = vector.broadcast %720 : vector<8x1xf32> to vector<8x8xf32>
    %722 = arith.mulf %717, %721 : vector<8x8xf32>
    %723 = arith.mulf %722, %31 : vector<8x8xf32>
    %724 = arith.truncf %723 : vector<8x8xf32> to vector<8x8xbf16>
    %cst_268 = arith.constant dense<0.000000e+00> : vector<8x32xf32>
    %725 = tpu.matmul %724, %705, %cst_268 {dimension_numbers = #tpu.dot_dimension_numbers<[1], [0], [0], [1], [0, 0, 1, 1], [], []>} : vector<8x8xbf16>, vector<8x32xbf16>, vector<8x32xf32> -> vector<8x32xf32>
    %726 = arith.addf %725, %704 : vector<8x32xf32>
    %727 = arith.truncf %726 : vector<8x32xf32> to vector<8x32xbf16>
    %cst_269 = arith.constant dense<0.000000e+00> : vector<8x16xf32>
    %728 = tpu.matmul %727, %28, %cst_269 {dimension_numbers = #tpu.dot_dimension_numbers<[1], [0], [0], [1], [0, 0, 1, 1], [], []>} : vector<8x32xbf16>, vector<32x16xbf16>, vector<8x16xf32> -> vector<8x16xf32>
    %729 = vector.broadcast %29 : vector<1x16xf32> to vector<8x16xf32>
    %730 = arith.addf %728, %729 : vector<8x16xf32>
    %cst_270 = arith.constant 0.000000e+00 : f32
    %731 = vector.broadcast %cst_270 : f32 to vector<8x16xf32>
    %732 = arith.maximumf %730, %731 : vector<8x16xf32>
    %733 = arith.truncf %732 : vector<8x16xf32> to vector<8x16xbf16>
    %cst_271 = arith.constant dense<0.000000e+00> : vector<4x16xf32>
    %734 = tpu.matmul %32, %733, %cst_271 {dimension_numbers = #tpu.dot_dimension_numbers<[1], [0], [0], [1], [0, 0, 1, 1], [], []>} : vector<4x8xbf16>, vector<8x16xbf16>, vector<4x16xf32> -> vector<4x16xf32>
    %735 = arith.addf %703, %734 : vector<4x16xf32>
    %c48_272 = arith.constant 48 : index
    %c0_273 = arith.constant 0 : index
    %736 = vector.load %arg26[%c48_272, %c0_273] : memref<64x32xf32, #tpu.memory_space<vmem>>, vector<8x32xf32>
    %737 = arith.truncf %736 : vector<8x32xf32> to vector<8x32xbf16>
    %cst_274 = arith.constant dense<0.000000e+00> : vector<8x8xf32>
    %738 = tpu.matmul %737, %737, %cst_274 {dimension_numbers = #tpu.dot_dimension_numbers<[1], [1], [0], [0], [0, 0, 1, 0], [], []>} : vector<8x32xbf16>, vector<8x32xbf16>, vector<8x8xf32> -> vector<8x8xf32>
    %cst_275 = arith.constant 0.000000e+00 : f32
    %739 = vector.broadcast %cst_275 : f32 to vector<8x8xf32>
    %740 = arith.cmpf oge, %738, %739 : vector<8x8xf32>
    %cst_276 = arith.constant 0.00999999977 : f32
    %741 = vector.broadcast %cst_276 : f32 to vector<8x8xf32>
    %742 = arith.mulf %741, %738 : vector<8x8xf32>
    %743 = arith.select %740, %738, %742 : vector<8x8xi1>, vector<8x8xf32>
    %744 = arith.addf %743, %30 : vector<8x8xf32>
    %cst_277 = arith.constant dense<0xFF800000> : vector<8xf32>
    %745 = vector.multi_reduction <maximumf>, %744, %cst_277 [1] : vector<8x8xf32> to vector<8xf32>
    %746 = vector.shape_cast %745 : vector<8xf32> to vector<8x1xf32>
    %747 = vector.broadcast %746 : vector<8x1xf32> to vector<8x8xf32>
    %748 = arith.subf %744, %747 : vector<8x8xf32>
    %749 = math.exp %748 : vector<8x8xf32>
    %cst_278 = arith.constant dense<0.000000e+00> : vector<8xf32>
    %750 = vector.multi_reduction <add>, %749, %cst_278 [1] : vector<8x8xf32> to vector<8xf32>
    %751 = vector.shape_cast %750 : vector<8xf32> to vector<8x1xf32>
    %752 = tpu.reciprocal %751 {approx = true} : vector<8x1xf32> -> vector<8x1xf32>
    %753 = vector.broadcast %752 : vector<8x1xf32> to vector<8x8xf32>
    %754 = arith.mulf %749, %753 : vector<8x8xf32>
    %755 = arith.mulf %754, %31 : vector<8x8xf32>
    %756 = arith.truncf %755 : vector<8x8xf32> to vector<8x8xbf16>
    %cst_279 = arith.constant dense<0.000000e+00> : vector<8x32xf32>
    %757 = tpu.matmul %756, %737, %cst_279 {dimension_numbers = #tpu.dot_dimension_numbers<[1], [0], [0], [1], [0, 0, 1, 1], [], []>} : vector<8x8xbf16>, vector<8x32xbf16>, vector<8x32xf32> -> vector<8x32xf32>
    %758 = arith.addf %757, %736 : vector<8x32xf32>
    %759 = arith.truncf %758 : vector<8x32xf32> to vector<8x32xbf16>
    %cst_280 = arith.constant dense<0.000000e+00> : vector<8x16xf32>
    %760 = tpu.matmul %759, %28, %cst_280 {dimension_numbers = #tpu.dot_dimension_numbers<[1], [0], [0], [1], [0, 0, 1, 1], [], []>} : vector<8x32xbf16>, vector<32x16xbf16>, vector<8x16xf32> -> vector<8x16xf32>
    %761 = vector.broadcast %29 : vector<1x16xf32> to vector<8x16xf32>
    %762 = arith.addf %760, %761 : vector<8x16xf32>
    %cst_281 = arith.constant 0.000000e+00 : f32
    %763 = vector.broadcast %cst_281 : f32 to vector<8x16xf32>
    %764 = arith.maximumf %762, %763 : vector<8x16xf32>
    %765 = arith.truncf %764 : vector<8x16xf32> to vector<8x16xbf16>
    %cst_282 = arith.constant dense<0.000000e+00> : vector<4x16xf32>
    %766 = tpu.matmul %32, %765, %cst_282 {dimension_numbers = #tpu.dot_dimension_numbers<[1], [0], [0], [1], [0, 0, 1, 1], [], []>} : vector<4x8xbf16>, vector<8x16xbf16>, vector<4x16xf32> -> vector<4x16xf32>
    %767 = arith.addf %735, %766 : vector<4x16xf32>
    %c56_283 = arith.constant 56 : index
    %c0_284 = arith.constant 0 : index
    %768 = vector.load %arg26[%c56_283, %c0_284] : memref<64x32xf32, #tpu.memory_space<vmem>>, vector<8x32xf32>
    %769 = arith.truncf %768 : vector<8x32xf32> to vector<8x32xbf16>
    %cst_285 = arith.constant dense<0.000000e+00> : vector<8x8xf32>
    %770 = tpu.matmul %769, %769, %cst_285 {dimension_numbers = #tpu.dot_dimension_numbers<[1], [1], [0], [0], [0, 0, 1, 0], [], []>} : vector<8x32xbf16>, vector<8x32xbf16>, vector<8x8xf32> -> vector<8x8xf32>
    %cst_286 = arith.constant 0.000000e+00 : f32
    %771 = vector.broadcast %cst_286 : f32 to vector<8x8xf32>
    %772 = arith.cmpf oge, %770, %771 : vector<8x8xf32>
    %cst_287 = arith.constant 0.00999999977 : f32
    %773 = vector.broadcast %cst_287 : f32 to vector<8x8xf32>
    %774 = arith.mulf %773, %770 : vector<8x8xf32>
    %775 = arith.select %772, %770, %774 : vector<8x8xi1>, vector<8x8xf32>
    %776 = arith.addf %775, %30 : vector<8x8xf32>
    %cst_288 = arith.constant dense<0xFF800000> : vector<8xf32>
    %777 = vector.multi_reduction <maximumf>, %776, %cst_288 [1] : vector<8x8xf32> to vector<8xf32>
    %778 = vector.shape_cast %777 : vector<8xf32> to vector<8x1xf32>
    %779 = vector.broadcast %778 : vector<8x1xf32> to vector<8x8xf32>
    %780 = arith.subf %776, %779 : vector<8x8xf32>
    %781 = math.exp %780 : vector<8x8xf32>
    %cst_289 = arith.constant dense<0.000000e+00> : vector<8xf32>
    %782 = vector.multi_reduction <add>, %781, %cst_289 [1] : vector<8x8xf32> to vector<8xf32>
    %783 = vector.shape_cast %782 : vector<8xf32> to vector<8x1xf32>
    %784 = tpu.reciprocal %783 {approx = true} : vector<8x1xf32> -> vector<8x1xf32>
    %785 = vector.broadcast %784 : vector<8x1xf32> to vector<8x8xf32>
    %786 = arith.mulf %781, %785 : vector<8x8xf32>
    %787 = arith.mulf %786, %31 : vector<8x8xf32>
    %788 = arith.truncf %787 : vector<8x8xf32> to vector<8x8xbf16>
    %cst_290 = arith.constant dense<0.000000e+00> : vector<8x32xf32>
    %789 = tpu.matmul %788, %769, %cst_290 {dimension_numbers = #tpu.dot_dimension_numbers<[1], [0], [0], [1], [0, 0, 1, 1], [], []>} : vector<8x8xbf16>, vector<8x32xbf16>, vector<8x32xf32> -> vector<8x32xf32>
    %790 = arith.addf %789, %768 : vector<8x32xf32>
    %791 = arith.truncf %790 : vector<8x32xf32> to vector<8x32xbf16>
    %cst_291 = arith.constant dense<0.000000e+00> : vector<8x16xf32>
    %792 = tpu.matmul %791, %28, %cst_291 {dimension_numbers = #tpu.dot_dimension_numbers<[1], [0], [0], [1], [0, 0, 1, 1], [], []>} : vector<8x32xbf16>, vector<32x16xbf16>, vector<8x16xf32> -> vector<8x16xf32>
    %793 = vector.broadcast %29 : vector<1x16xf32> to vector<8x16xf32>
    %794 = arith.addf %792, %793 : vector<8x16xf32>
    %cst_292 = arith.constant 0.000000e+00 : f32
    %795 = vector.broadcast %cst_292 : f32 to vector<8x16xf32>
    %796 = arith.maximumf %794, %795 : vector<8x16xf32>
    %797 = arith.truncf %796 : vector<8x16xf32> to vector<8x16xbf16>
    %cst_293 = arith.constant dense<0.000000e+00> : vector<4x16xf32>
    %798 = tpu.matmul %32, %797, %cst_293 {dimension_numbers = #tpu.dot_dimension_numbers<[1], [0], [0], [1], [0, 0, 1, 1], [], []>} : vector<4x8xbf16>, vector<8x16xbf16>, vector<4x16xf32> -> vector<4x16xf32>
    %799 = arith.addf %767, %798 : vector<4x16xf32>
    %c4_294 = arith.constant 4 : index
    %c0_295 = arith.constant 0 : index
    %800 = vector.load %arg28[%c4_294, %c0_295] : memref<8x16xf32, #tpu.memory_space<vmem>>, vector<4x16xf32>
    tpu.vector_store %arg28[%c4_294, %c0_295], %799 {strides = array<i32>} : memref<8x16xf32, #tpu.memory_space<vmem>>, vector<4x16xf32>,
    %c0_296 = arith.constant 0 : index
    %c0_297 = arith.constant 0 : index
    %801 = vector.load %arg27[%c0_296, %c0_297] : memref<8x16xf32, #tpu.memory_space<vmem>>, vector<8x16xf32>
    %802 = arith.truncf %801 : vector<8x16xf32> to vector<8x16xbf16>
    %c0_298 = arith.constant 0 : index
    %c0_299 = arith.constant 0 : index
    %803 = vector.load %arg18[%c0_298, %c0_299] : memref<16x32xbf16, #tpu.memory_space<vmem>>, vector<16x32xbf16>
    %cst_300 = arith.constant dense<0.000000e+00> : vector<8x32xf32>
    %804 = tpu.matmul %802, %803, %cst_300 {dimension_numbers = #tpu.dot_dimension_numbers<[1], [0], [0], [1], [0, 0, 1, 1], [], []>} : vector<8x16xbf16>, vector<16x32xbf16>, vector<8x32xf32> -> vector<8x32xf32>
    %c0_301 = arith.constant 0 : index
    %c0_302 = arith.constant 0 : index
    %805 = vector.load %arg28[%c0_301, %c0_302] : memref<8x16xf32, #tpu.memory_space<vmem>>, vector<8x16xf32>
    %806 = arith.truncf %805 : vector<8x16xf32> to vector<8x16xbf16>
    %c0_303 = arith.constant 0 : index
    %c0_304 = arith.constant 0 : index
    %807 = vector.load %arg19[%c0_303, %c0_304] : memref<16x32xbf16, #tpu.memory_space<vmem>>, vector<16x32xbf16>
    %cst_305 = arith.constant dense<0.000000e+00> : vector<8x32xf32>
    %808 = tpu.matmul %806, %807, %cst_305 {dimension_numbers = #tpu.dot_dimension_numbers<[1], [0], [0], [1], [0, 0, 1, 1], [], []>} : vector<8x16xbf16>, vector<16x32xbf16>, vector<8x32xf32> -> vector<8x32xf32>
    %809 = arith.addf %804, %808 : vector<8x32xf32>
    %c0_306 = arith.constant 0 : index
    %c0_307 = arith.constant 0 : index
    %810 = vector.load %arg20[%c0_306, %c0_307] : memref<1x32xf32, #tpu.memory_space<vmem>>, vector<1x32xf32>
    %811 = vector.broadcast %810 : vector<1x32xf32> to vector<8x32xf32>
    %812 = arith.addf %809, %811 : vector<8x32xf32>
    %cst_308 = arith.constant 0.000000e+00 : f32
    %813 = vector.broadcast %cst_308 : f32 to vector<8x32xf32>
    %814 = arith.maximumf %812, %813 : vector<8x32xf32>
    %815 = arith.truncf %814 : vector<8x32xf32> to vector<8x32xbf16>
    %c0_309 = arith.constant 0 : index
    %c0_310 = arith.constant 0 : index
    %816 = vector.load %arg21[%c0_309, %c0_310] : memref<32x32xbf16, #tpu.memory_space<vmem>>, vector<32x32xbf16>
    %cst_311 = arith.constant dense<0.000000e+00> : vector<8x32xf32>
    %817 = tpu.matmul %815, %816, %cst_311 {dimension_numbers = #tpu.dot_dimension_numbers<[1], [0], [0], [1], [0, 0, 1, 1], [], []>} : vector<8x32xbf16>, vector<32x32xbf16>, vector<8x32xf32> -> vector<8x32xf32>
    %c0_312 = arith.constant 0 : index
    %c0_313 = arith.constant 0 : index
    %818 = vector.load %arg22[%c0_312, %c0_313] : memref<1x32xf32, #tpu.memory_space<vmem>>, vector<1x32xf32>
    %819 = vector.broadcast %818 : vector<1x32xf32> to vector<8x32xf32>
    %820 = arith.addf %817, %819 : vector<8x32xf32>
    %cst_314 = arith.constant 0.000000e+00 : f32
    %821 = vector.broadcast %cst_314 : f32 to vector<8x32xf32>
    %822 = arith.maximumf %820, %821 : vector<8x32xf32>
    %823 = arith.truncf %822 : vector<8x32xf32> to vector<8x32xbf16>
    %c0_315 = arith.constant 0 : index
    %c0_316 = arith.constant 0 : index
    %824 = vector.load %arg23[%c0_315, %c0_316] : memref<32x16xbf16, #tpu.memory_space<vmem>>, vector<32x16xbf16>
    %cst_317 = arith.constant dense<0.000000e+00> : vector<8x16xf32>
    %825 = tpu.matmul %823, %824, %cst_317 {dimension_numbers = #tpu.dot_dimension_numbers<[1], [0], [0], [1], [0, 0, 1, 1], [], []>} : vector<8x32xbf16>, vector<32x16xbf16>, vector<8x16xf32> -> vector<8x16xf32>
    %c0_318 = arith.constant 0 : index
    %c0_319 = arith.constant 0 : index
    %826 = vector.load %arg24[%c0_318, %c0_319] : memref<1x16xf32, #tpu.memory_space<vmem>>, vector<1x16xf32>
    %827 = vector.broadcast %826 : vector<1x16xf32> to vector<8x16xf32>
    %828 = arith.addf %825, %827 : vector<8x16xf32>
    %c0_320 = arith.constant 0 : index
    %c0_321 = arith.constant 0 : index
    %829 = vector.load %arg25[%c0_320, %c0_321] : memref<8x16xf32, #tpu.memory_space<vmem>>, vector<8x16xf32>
    tpu.vector_store %arg25[%c0_320, %c0_321], %828 {strides = array<i32>} : memref<8x16xf32, #tpu.memory_space<vmem>>, vector<8x16xf32>,
    return
  }
  func.func @transform_0(%arg0: i32) -> (i32, i32) {
    %c0_i32 = arith.constant 0 : i32
    %c0_i32_0 = arith.constant 0 : i32
    %c0_i32_1 = arith.constant 0 : i32
    return %c0_i32, %c0_i32_0 : i32, i32
  }
  func.func @transform_1(%arg0: i32) -> (i32, i32) {
    %c0_i32 = arith.constant 0 : i32
    %c0_i32_0 = arith.constant 0 : i32
    %c0_i32_1 = arith.constant 0 : i32
    return %c0_i32, %c0_i32_0 : i32, i32
  }
  func.func @transform_2(%arg0: i32) -> (i32, i32) {
    %c0_i32 = arith.constant 0 : i32
    %c0_i32_0 = arith.constant 0 : i32
    %c0_i32_1 = arith.constant 0 : i32
    return %c0_i32, %c0_i32_0 : i32, i32
  }
  func.func @transform_3(%arg0: i32) -> (i32, i32) {
    %c0_i32 = arith.constant 0 : i32
    %c0_i32_0 = arith.constant 0 : i32
    %c0_i32_1 = arith.constant 0 : i32
    return %c0_i32, %c0_i32_0 : i32, i32
  }
  func.func @transform_4(%arg0: i32) -> (i32, i32) {
    %c0_i32 = arith.constant 0 : i32
    %c0_i32_0 = arith.constant 0 : i32
    %c0_i32_1 = arith.constant 0 : i32
    return %c0_i32, %c0_i32_0 : i32, i32
  }
  func.func @transform_5(%arg0: i32) -> (i32, i32) {
    %c0_i32 = arith.constant 0 : i32
    %c0_i32_0 = arith.constant 0 : i32
    %c0_i32_1 = arith.constant 0 : i32
    return %c0_i32, %c0_i32_0 : i32, i32
  }
  func.func @transform_6(%arg0: i32) -> (i32, i32) {
    %c0_i32 = arith.constant 0 : i32
    %c0_i32_0 = arith.constant 0 : i32
    %c0_i32_1 = arith.constant 0 : i32
    return %c0_i32, %c0_i32_0 : i32, i32
  }
  func.func @transform_7(%arg0: i32) -> (i32, i32) {
    %c0_i32 = arith.constant 0 : i32
    %c0_i32_0 = arith.constant 0 : i32
    %c0_i32_1 = arith.constant 0 : i32
    return %c0_i32, %c0_i32_0 : i32, i32
  }
  func.func @transform_8(%arg0: i32) -> (i32, i32) {
    %c0_i32 = arith.constant 0 : i32
    %c0_i32_0 = arith.constant 0 : i32
    %c0_i32_1 = arith.constant 0 : i32
    return %c0_i32, %c0_i32_0 : i32, i32
  }
  func.func @transform_9(%arg0: i32) -> (i32, i32) {
    %c0_i32 = arith.constant 0 : i32
    %c0_i32_0 = arith.constant 0 : i32
    %c0_i32_1 = arith.constant 0 : i32
    return %c0_i32, %c0_i32_0 : i32, i32
  }
  func.func @transform_10(%arg0: i32) -> (i32, i32) {
    %c0_i32 = arith.constant 0 : i32
    %c0_i32_0 = arith.constant 0 : i32
    %c0_i32_1 = arith.constant 0 : i32
    return %c0_i32, %c0_i32_0 : i32, i32
  }
  func.func @transform_11(%arg0: i32) -> (i32, i32) {
    %c0_i32 = arith.constant 0 : i32
    %c0_i32_0 = arith.constant 0 : i32
    %c0_i32_1 = arith.constant 0 : i32
    return %c0_i32, %c0_i32_0 : i32, i32
  }
  func.func @transform_12(%arg0: i32) -> (i32, i32) {
    %c0_i32 = arith.constant 0 : i32
    %c0_i32_0 = arith.constant 0 : i32
    %c0_i32_1 = arith.constant 0 : i32
    return %c0_i32, %c0_i32_0 : i32, i32
  }
  func.func @transform_13(%arg0: i32) -> (i32, i32) {
    %c0_i32 = arith.constant 0 : i32
    %c0_i32_0 = arith.constant 0 : i32
    %c0_i32_1 = arith.constant 0 : i32
    return %c0_i32, %c0_i32_0 : i32, i32
  }
  func.func @transform_14(%arg0: i32) -> (i32, i32) {
    %c0_i32 = arith.constant 0 : i32
    %c0_i32_0 = arith.constant 0 : i32
    %c0_i32_1 = arith.constant 0 : i32
    return %c0_i32, %c0_i32_0 : i32, i32
  }
  func.func @transform_15(%arg0: i32) -> (i32, i32) {
    %c0_i32 = arith.constant 0 : i32
    %c0_i32_0 = arith.constant 0 : i32
    %c0_i32_1 = arith.constant 0 : i32
    return %c0_i32, %c0_i32_0 : i32, i32
  }
  func.func @transform_16(%arg0: i32) -> (i32, i32) {
    %c0_i32 = arith.constant 0 : i32
    %c0_i32_0 = arith.constant 0 : i32
    %c0_i32_1 = arith.constant 0 : i32
    return %c0_i32, %c0_i32_0 : i32, i32
  }
  func.func @transform_17(%arg0: i32) -> (i32, i32) {
    %c0_i32 = arith.constant 0 : i32
    %c0_i32_0 = arith.constant 0 : i32
    %c0_i32_1 = arith.constant 0 : i32
    return %c0_i32, %c0_i32_0 : i32, i32
  }
  func.func @transform_18(%arg0: i32) -> (i32, i32) {
    %c0_i32 = arith.constant 0 : i32
    %c0_i32_0 = arith.constant 0 : i32
    %c0_i32_1 = arith.constant 0 : i32
    return %c0_i32, %c0_i32_0 : i32, i32
  }
  func.func @transform_19(%arg0: i32) -> (i32, i32) {
    %c0_i32 = arith.constant 0 : i32
    %c0_i32_0 = arith.constant 0 : i32
    %c0_i32_1 = arith.constant 0 : i32
    return %c0_i32, %c0_i32_0 : i32, i32
  }
  func.func @transform_20(%arg0: i32) -> (i32, i32) {
    %c0_i32 = arith.constant 0 : i32
    %c0_i32_0 = arith.constant 0 : i32
    %c0_i32_1 = arith.constant 0 : i32
    return %c0_i32, %c0_i32_0 : i32, i32
  }
  func.func @transform_21(%arg0: i32) -> (i32, i32) {
    %c0_i32 = arith.constant 0 : i32
    %c0_i32_0 = arith.constant 0 : i32
    %c0_i32_1 = arith.constant 0 : i32
    return %c0_i32, %c0_i32_0 : i32, i32
  }
  func.func @transform_22(%arg0: i32) -> (i32, i32) {
    %c0_i32 = arith.constant 0 : i32
    %c0_i32_0 = arith.constant 0 : i32
    %c0_i32_1 = arith.constant 0 : i32
    return %c0_i32, %c0_i32_0 : i32, i32
  }
  func.func @transform_23(%arg0: i32) -> (i32, i32) {
    %c0_i32 = arith.constant 0 : i32
    %c0_i32_0 = arith.constant 0 : i32
    %c0_i32_1 = arith.constant 0 : i32
    return %c0_i32, %c0_i32_0 : i32, i32
  }
  func.func @transform_24(%arg0: i32) -> (i32, i32) {
    %c0_i32 = arith.constant 0 : i32
    %c0_i32_0 = arith.constant 0 : i32
    %c0_i32_1 = arith.constant 0 : i32
    return %c0_i32, %c0_i32_0 : i32, i32
  }
}

</mosaic_0001>

<bundles_post_ra>
// kernel: tpu_custom_call.1
= control target key start
LH: loop header
LB: loop body
LE: loop exit
PB: predicated region body
PF: predicated region fallthrough
CT: control target
= control target key end

     0   :  { %s8060_s0 = inlined_call_operand.vmem [shape: f32[64,2], index: 0, kind: input, shape index: {}]   ;;  %s8061_s1 = inlined_call_operand.vmem [shape: bf16[2,128], index: 1, kind: input, shape index: {}]   ;;  %s8062_s2 = inlined_call_operand.vmem [shape: f32[1,128], index: 2, kind: input, shape index: {}]   ;;  %s8063_s3 = inlined_call_operand.vmem [shape: bf16[128,128], index: 3, kind: input, shape index: {}]   ;;  %s8064_s4 = inlined_call_operand.vmem [shape: f32[1,128], index: 4, kind: input, shape index: {}]   ;;  %s8065_s5 = inlined_call_operand.vmem [shape: bf16[128,32], index: 5, kind: input, shape index: {}]   ;;  %s8066_s6 = inlined_call_operand.vmem [shape: f32[64,32], index: 6, kind: input, shape index: {}]   ;;  %s8067_s7 = inlined_call_operand.vmem [shape: bf16[32,16], index: 7, kind: input, shape index: {}]   ;;  %s8068_s8 = inlined_call_operand.vmem [shape: f32[1,16], index: 8, kind: input, shape index: {}]   ;;  %s8069_s9 = inlined_call_operand.vmem [shape: f32[4,4], index: 9, kind: input, shape index: {}]   ;;  %s8070_s10 = inlined_call_operand.vmem [shape: f32[4,4], index: 10, kind: input, shape index: {}]   ;;  %s8071_s11 = inlined_call_operand.vmem [shape: bf16[4,4], index: 11, kind: input, shape index: {}]   ;;  %s8072_s12 = inlined_call_operand.vmem [shape: bf16[32,16], index: 12, kind: input, shape index: {}]   ;;  %s8073_s13 = inlined_call_operand.vmem [shape: f32[1,16], index: 13, kind: input, shape index: {}]   ;;  %s8074_s14 = inlined_call_operand.vmem [shape: f32[8,8], index: 14, kind: input, shape index: {}]   ;;  %s8075_s15 = inlined_call_operand.vmem [shape: f32[8,8], index: 15, kind: input, shape index: {}]   ;;  %s8076_s16 = inlined_call_operand.vmem [shape: bf16[4,8], index: 16, kind: input, shape index: {}]   ;;  %s8077_s17 = inlined_call_operand.vmem [shape: bf16[16,32], index: 17, kind: input, shape index: {}]   ;;  %s8078_s18 = inlined_call_operand.vmem [shape: bf16[16,32], index: 18, kind: input, shape index: {}]   ;;  %s8079_s19 = inlined_call_operand.vmem [shape: f32[1,32], index: 19, kind: input, shape index: {}]   ;;  %s8080_s20 = inlined_call_operand.vmem [shape: bf16[32,32], index: 20, kind: input, shape index: {}]   ;;  %s8081_s21 = inlined_call_operand.vmem [shape: f32[1,32], index: 21, kind: input, shape index: {}]   ;;  %s8082_s22 = inlined_call_operand.vmem [shape: bf16[32,16], index: 22, kind: input, shape index: {}]   ;;  %s8083_s23 = inlined_call_operand.vmem [shape: f32[1,16], index: 23, kind: input, shape index: {}]   ;;  %s8084_s24 = inlined_call_operand.hbm [shape: f32[8,16], index: 24, kind: output, shape index: {}]  }
   0x1   :  { %8091 = sst [smem:[#allocation8_spill]] %s8060_s0 }
   0x2   :  { %8092 = sst [smem:[#allocation9_spill]] %s8061_s1 }
   0x3   :  { %8093 = sst [smem:[#allocation10_spill]] %s8062_s2 }
   0x4   :  { %8094 = sst [smem:[#allocation11_spill]] %s8063_s3 }
   0x5   :  { %8095 = sst [smem:[#allocation12_spill]] %s8064_s4 }
   0x6   :  { %8096 = sst [smem:[#allocation13_spill]] %s8065_s5 }
   0x7   :  { %8097 = sst [smem:[#allocation14_spill]] %s8066_s6 }
   0x8   :  { %8098 = sst [smem:[#allocation15_spill]] %s8067_s7 }
   0x9   :  { %8099 = sst [smem:[#allocation16_spill]] %s8068_s8 }
   0xa   :  { %s8100_s27 = sld [smem:[#allocation9_spill]]  ;;  %vm112_vm0 = vcmask 1040384   ;;  %vm99_vm1 = vcmask 15360  }
   0xb   :  { %s8101_s2 = sld [smem:[#allocation8_spill]] }
   0xc   :  { %s8102_s1 = sld [smem:[#allocation11_spill]] }
  0x10   :  { %v91_v0 = vld [vmem:[%s8100_s27] sm:$0x1] }
  0x11   :  { %v79_v1 = vld [vmem:[%s8101_s2] sm:$0xff]  ;;  %v80_v2 = vld [vmem:[%s8101_s2 + $0x8] sm:$0xff]  ;;  %6643 = vmatprep.subr.msk.bf16.mxu0 %vm112_vm0, %v91_v0  ;;  %v114_v3 = vsel %vm112_vm0, %v91_v0, 0  ;;  %v81_v5 = vld [vmem:[%s8101_s2 + $0x10] sm:$0xff] }
  0x12   :  { %v87_v4 = vpack.c.bf16 %v80_v2, %v79_v1  ;;  %v82_v6 = vld [vmem:[%s8101_s2 + $0x18] sm:$0xff]  ;;  %5934 = vmatpush3.bf16.msra.mxu0 %v114_v3  ;;  %v6648_v9 = vld [vmem:[%s8102_s1 + $0x30] sm:$0xff]   ;;  %v6649_v10 = vld [vmem:[%s8102_s1 + $0x28] sm:$0xff]  }
  0x13   :  { %v88_v7 = vpack.c.bf16 %v82_v6, %v81_v5  ;;  %v6647_v8 = vld [vmem:[%s8102_s1 + $0x38] sm:$0xff]   ;;  %v6650_v11 = vld [vmem:[%s8102_s1 + $0x20] sm:$0xff]  }
  0x14   :  { %5935 = vmatprep.mubr.msk.bf16.mxu0 %vm99_vm1, %v87_v4  ;;  %5943 = vmatprep.subr.bf16.mxu1 %v6647_v8  ;;  %v6651_v12 = vld [vmem:[%s8102_s1 + $0x18] sm:$0xff]  }
  0x15   :  { %5936 = vmatmul.mubr.msk.bf16.vlgmr.msra.gmra.mxu0 %vm99_vm1, %v88_v7  ;;  %5944 = vmatpush3.bf16.msra.mxu1 %v6647_v8 }
  0x16   :  { %5945 = vmatprep.subr.bf16.mxu1 %v6648_v9 }
  0x19   :  { %5946 = vmatpush3.bf16.msra.mxu1 %v6648_v9 }
  0x1a   :  { %5947 = vmatprep.subr.bf16.mxu1 %v6649_v10 }
  0x1d   :  { %5948 = vmatpush3.bf16.msra.mxu1 %v6649_v10 }
  0x1e   :  { %5949 = vmatprep.subr.bf16.mxu1 %v6650_v11 }
  0x21   :  { %5950 = vmatpush3.bf16.msra.mxu1 %v6650_v11 }
  0x22   :  { %5951 = vmatprep.subr.bf16.mxu1 %v6651_v12 }
  0x23   :  { %29 = vsyncpa [#allocation6], 0  ;;  %v6652_v13 = vld [vmem:[%s8102_s1 + $0x10] sm:$0xff]   ;;  %v6653_v14 = vld [vmem:[%s8102_s1 + $0x8] sm:$0xff]   ;;  %s8103_s28 = sld [smem:[#allocation13_spill]]  ;;  %v6803_v10 = vmov 0.0  }
  0x24   :  { %v6654_v15 = vld [vmem:[%s8102_s1] sm:$0xff]   ;;  %v84_v18 = vld [vmem:[%s8101_s2 + $0x28] sm:$0xff]  ;;  %v85_v20 = vld [vmem:[%s8101_s2 + $0x30] sm:$0xff]  ;;  %s8104_s30 = sld [smem:[#allocation10_spill]]  ;;  %vm6804_vm2 = vmmov 0   ;;  %vm478_vm3 = vcmask 261120  }
  0x25   :  { %5952 = vmatpush3.bf16.msra.mxu1 %v6651_v12  ;;  %v83_v17 = vld [vmem:[%s8101_s2 + $0x20] sm:$0xff]  ;;  %v86_v21 = vld [vmem:[%s8101_s2 + $0x38] sm:$0xff]  ;;  %s8105_s27 = sld [smem:[#allocation12_spill]]  ;;  %vm570_vm4 = vcmask 1041408   ;;  %vm552_vm6 = vcmask 27648   ;;  %vm566_vm7 = vcmask 31744  }
  0x26   :  { %5953 = vmatprep.subr.bf16.mxu1 %v6652_v13  ;;  %v89_v19 = vpack.c.bf16 %v84_v18, %v83_v17  ;;  %v90_v23 = vpack.c.bf16 %v86_v21, %v85_v20  ;;  %s8106_s29 = sld [smem:[#allocation14_spill]]  ;;  %vm2169_vm0 = vcmask 1043456  }
  0x27   :  { %s8108_s26 = sld [smem:[#allocation16_spill]] }
  0x28   :  { %5939 = vmatprep.mubr.msk.bf16.mxu0 %vm99_vm1, %v89_v19 }
  0x29   :  { %5954 = vmatpush3.bf16.msra.mxu1 %v6652_v13  ;;  %v6655_v16 = vld [vmem:[%s8103_s28 + $0x38] sm:$0xff]   ;;  %v6656_v22 = vld [vmem:[%s8103_s28 + $0x30] sm:$0xff]   ;;  %5940 = vmatmul.mubr.msk.bf16.gmra.mxu0 %vm99_vm1, %v90_v23  ;;  %v6657_v24 = vld [vmem:[%s8103_s28 + $0x28] sm:$0xff]   ;;  %vm2152_vm1 = vcmask 64512  }
  0x2a   :  { %5955 = vmatprep.subr.bf16.mxu1 %v6653_v14  ;;  %5967 = vmatprep.subr.bf16.mxu0 %v6655_v16  ;;  %v6658_v25 = vld [vmem:[%s8103_s28 + $0x20] sm:$0xff]   ;;  %v6659_v26 = vld [vmem:[%s8103_s28 + $0x18] sm:$0xff]   ;;  %v6660_v42 = vld [vmem:[%s8103_s28 + $0x10] sm:$0xff]  }
  0x2b   :  { %5968 = vmatpush3.bf16.msra.mxu0 %v6655_v16  ;;  %v5541_v29 = vld [vmem:[%s8104_s30] ss:$0 sm:$0xff]  ;;  %v6661_v43 = vld [vmem:[%s8103_s28 + $0x8] sm:$0xff]  }
  0x2c   :  { %5969 = vmatprep.subr.bf16.mxu0 %v6656_v22  ;;  %v6662_v44 = vld [vmem:[%s8103_s28] sm:$0xff]  }
  0x2d   :  { %5956 = vmatpush3.bf16.msra.mxu1 %v6653_v14  ;;  %v5546_v61 = vld [vmem:[%s8105_s27] ss:$0 sm:$0xff] }
  0x2e   :  { %5957 = vmatprep.subr.bf16.mxu1 %v6654_v15 }
  0x2f   :  { %5970 = vmatpush3.bf16.msra.mxu0 %v6656_v22 }
  0x30   :  { %5971 = vmatprep.subr.bf16.mxu0 %v6657_v24 }
  0x31   :  { %5958 = vmatpush3.bf16.msra.mxu1 %v6654_v15 }
  0x32   :  { %5991 = vmatprep.subr.bf16.mxu1 %v6803_v10 }
  0x33   :  { %5972 = vmatpush3.bf16.msra.mxu0 %v6657_v24 }
  0x34   :  { %5973 = vmatprep.subr.bf16.mxu0 %v6658_v25 }
  0x37   :  { %5974 = vmatpush3.bf16.msra.mxu0 %v6658_v25  ;;  %v359_v25 = vld [vmem:[%s8106_s29 + $0x10] sm:$0xff] }
  0x38   :  { %5975 = vmatprep.subr.bf16.mxu0 %v6659_v26 }
  0x3b   :  { %5976 = vmatpush3.bf16.msra.mxu0 %v6659_v26 }
  0x3c   :  { %5977 = vmatprep.subr.bf16.mxu0 %v6660_v42 }
  0x3f   :  { %5978 = vmatpush3.bf16.msra.mxu0 %v6660_v42 }
  0x40   :  { %5979 = vmatprep.subr.bf16.mxu0 %v6661_v43 }
  0x43   :  { %5980 = vmatpush3.bf16.msra.mxu0 %v6661_v43  ;;  %v7052_v43 = vld [vmem:[%s8069_s9] sm:$0xf] }
  0x44   :  { %5981 = vmatprep.subr.bf16.mxu0 %v6662_v44 }
  0x47   :  { %5982 = vmatpush3.bf16.msra.mxu0 %v6662_v44 }
  0x48   :  { %5997 = vmatprep.subr.bf16.mxu0 %v6803_v10 }
  0xd5   :  { %v5937_v27 = vpop.f32.mrf.mxu0 }
  0xd6   :  { %v159_v33 = vadd.f32 %v5937_v27, %v5541_v29  ;;  %v357_v27 = vld [vmem:[%s8106_s29] sm:$0xff] }
  0xd7   :  { %v150_v28 = vpop.f32.mrf.mxu0 }
  0xd8   :  { %v151_v31 = vadd.f32 %v5541_v29, %v150_v28  ;;  %v183_v39 = vmax.f32 %v159_v33, 0.0  ;;  %v358_v33 = vld [vmem:[%s8106_s29 + $0x8] sm:$0xff] }
  0xd9   :  { %v5938_v30 = vpop.f32.mrf.mxu0 }
  0xda   :  { %v162_v32 = vadd.f32 %v5938_v30, %v5541_v29  ;;  %v181_v37 = vmax.f32 %v151_v31, 0.0  ;;  %v360_v30 = vld [vmem:[%s8106_s29 + $0x18] sm:$0xff] }
  0xdb   :  { %v153_v34 = vpop.f32.mrf.mxu0 }
  0xdc   :  { %v154_v35 = vadd.f32 %v5541_v29, %v153_v34  ;;  %v184_v36 = vmax.f32 %v162_v32, 0.0 }
  0xde   :  { %v182_v38 = vmax.f32 %v154_v35, 0.0  ;;  %v190_v41 = vpack.c.bf16 %v184_v36, %v183_v39 }
  0xe0   :  { %v189_v40 = vpack.c.bf16 %v182_v38, %v181_v37 }
  0xe2   :  { %5959 = vmatprep.mubr.bf16.mxu1 %v189_v40 }
  0xe3   :  { %5960 = vmatmul.mubr.bf16.vlgmr.msra.gmra.mxu1 %v190_v41 }
  0xe9   :  { %v5941_v45 = vpop.f32.mrf.mxu0 }
  0xea   :  { %v175_v46 = vadd.f32 %v5941_v45, %v5541_v29 }
  0xeb   :  { %v166_v47 = vpop.f32.mrf.mxu0 }
  0xec   :  { %v167_v48 = vadd.f32 %v5541_v29, %v166_v47  ;;  %v187_v51 = vmax.f32 %v175_v46, 0.0 }
  0xed   :  { %v5942_v49 = vpop.f32.mrf.mxu0 }
  0xee   :  { %v178_v50 = vadd.f32 %v5942_v49, %v5541_v29  ;;  %v185_v53 = vmax.f32 %v167_v48, 0.0 }
  0xef   :  { %v169_v52 = vpop.f32.mrf.mxu0 }
  0xf0   :  { %v188_v54 = vmax.f32 %v178_v50, 0.0  ;;  %v170_v55 = vadd.f32 %v5541_v29, %v169_v52  ;;  %v363_v50 = vld [vmem:[%s8106_s29 + $0x30] sm:$0xff]  ;;  %v361_v52 = vld [vmem:[%s8106_s29 + $0x20] sm:$0xff] }
  0xf2   :  { %v186_v56 = vmax.f32 %v170_v55, 0.0  ;;  %v192_v57 = vpack.c.bf16 %v188_v54, %v187_v51  ;;  %v364_v55 = vld [vmem:[%s8106_s29 + $0x38] sm:$0xff] }
  0xf4   :  { %v191_v58 = vpack.c.bf16 %v186_v56, %v185_v53 }
  0xf6   :  { %5963 = vmatprep.mubr.bf16.mxu1 %v191_v58  ;;  %v362_v58 = vld [vmem:[%s8106_s29 + $0x28] sm:$0xff]  ;;  %s8107_s29 = sld [smem:[#allocation15_spill]] }
  0xf7   :  { %5964 = vmatmul.mubr.bf16.gmra.mxu1 %v192_v57 }
  0xf8   :  { %5993 = vmatprep.mubr.msk.bf16.mxu1 %vm6804_vm2, %v6803_v10 }
 0x1a3   :  { %v5961_v59 = vpop.f32.mrf.mxu1 }
 0x1a4   :  { %v307_v1 = vadd.f32 %v5961_v59, %v5546_v61 }
 0x1a5   :  { %v298_v60 = vpop.f32.mrf.mxu1 }
 0x1a6   :  { %v299_v63 = vadd.f32 %v5546_v61, %v298_v60  ;;  %v331_v7 = vmax.f32 %v307_v1, 0.0 }
 0x1a7   :  { %v5962_v62 = vpop.f32.mrf.mxu1 }
 0x1a8   :  { %v310_v0 = vadd.f32 %v5962_v62, %v5546_v61  ;;  %v329_v5 = vmax.f32 %v299_v63, 0.0 }
 0x1a9   :  { %v301_v2 = vpop.f32.mrf.mxu1 }
 0x1aa   :  { %v302_v3 = vadd.f32 %v5546_v61, %v301_v2  ;;  %v332_v4 = vmax.f32 %v310_v0, 0.0 }
 0x1ac   :  { %v330_v6 = vmax.f32 %v302_v3, 0.0  ;;  %v338_v9 = vpack.c.bf16 %v332_v4, %v331_v7  ;;  %v7076_v3 = vld [vmem:[%s8107_s29 + $0x8] sm:$0xff]  }
 0x1ae   :  { %v337_v8 = vpack.c.bf16 %v330_v6, %v329_v5  ;;  %v7083_v6 = vld [vmem:[%s8070_s10] sm:$0xf] }
 0x1b0   :  { %5983 = vmatprep.mubr.bf16.mxu0 %v337_v8 }
 0x1b1   :  { %5984 = vmatmul.mubr.bf16.vlgmr.msra.gmra.mxu0 %v338_v9 }
 0x1b7   :  { %v5965_v11 = vpop.f32.mrf.mxu1 }
 0x1b8   :  { %v323_v12 = vadd.f32 %v5965_v11, %v5546_v61 }
 0x1b9   :  { %v314_v13 = vpop.f32.mrf.mxu1 }
 0x1ba   :  { %v315_v14 = vadd.f32 %v5546_v61, %v314_v13  ;;  %v335_v17 = vmax.f32 %v323_v12, 0.0 }
 0x1bb   :  { %v5966_v15 = vpop.f32.mrf.mxu1 }
 0x1bc   :  { %v326_v16 = vadd.f32 %v5966_v15, %v5546_v61  ;;  %v333_v19 = vmax.f32 %v315_v14, 0.0  ;;  %v7103_v14 = vld [vmem:[%s8107_s29] sm:$0xff]  }
 0x1bd   :  { %v317_v18 = vpop.f32.mrf.mxu1 }
 0x1be   :  { %v336_v20 = vmax.f32 %v326_v16, 0.0  ;;  %v318_v21 = vadd.f32 %v5546_v61, %v317_v18 }
 0x1c0   :  { %v334_v22 = vmax.f32 %v318_v21, 0.0  ;;  %v340_v23 = vpack.c.bf16 %v336_v20, %v335_v17 }
 0x1c2   :  { %v339_v24 = vpack.c.bf16 %v334_v22, %v333_v19 }
 0x1c4   :  { %5987 = vmatprep.mubr.bf16.mxu0 %v339_v24 }
 0x1c5   :  { %5988 = vmatmul.mubr.bf16.gmra.mxu0 %v340_v23 }
 0x1c6   :  { %5999 = vmatprep.mubr.msk.bf16.mxu0 %vm6804_vm2, %v6803_v10 }
 0x271   :  { %v5985_v26 = vpop.f32.mrf.mxu0 }
 0x272   :  { %v456_v28 = vadd.f32 %v5985_v26, %v359_v25 }
 0x273   :  { %v447_v29 = vpop.f32.mrf.mxu0 }
 0x274   :  { %481 = vst.msk [vmem:[#allocation2 + $0x10] sm:$0xff] %vm478_vm3, %v456_v28  ;;  %v448_v31 = vadd.f32 %v447_v29, %v357_v27 }
 0x275   :  { %v5986_v32 = vpop.f32.mrf.mxu0 }
 0x276   :  { %479 = vst.msk [vmem:[#allocation2] sm:$0xff] %vm478_vm3, %v448_v31  ;;  %v459_v34 = vadd.f32 %v5986_v32, %v360_v30 }
 0x277   :  { %v450_v35 = vpop.f32.mrf.mxu0 }
 0x278   :  { %482 = vst.msk [vmem:[#allocation2 + $0x18] sm:$0xff] %vm478_vm3, %v459_v34  ;;  %v451_v36 = vadd.f32 %v450_v35, %v358_v33 }
 0x27a   :  { %480 = vst.msk [vmem:[#allocation2 + $0x8] sm:$0xff] %vm478_vm3, %v451_v36 }
 0x27d   :  { %v7038_v37 = vld [vmem:[#allocation2] sm:$0xf]  ;;  %v7085_v7 = vld [vmem:[#allocation2 + $0x4] sm:$0xf] }
 0x27e   :  { %v504_v38 = vpack.c.bf16 %v7038_v37, %v7038_v37  ;;  %v678_v11 = vpack.c.bf16 %v7085_v7, %v7085_v7 }
 0x280   :  { %v506_v39 = vsel %vm478_vm3, %v504_v38, 0  ;;  %v571_v40 = vsel %vm570_vm4, %v504_v38, 0  ;;  %v680_v13 = vsel %vm478_vm3, %v678_v11, 0  ;;  %v742_v20 = vsel %vm570_vm4, %v678_v11, 0 }
 0x281   :  { %5992 = vmatpush3.bf16.xpose.msra.mxu1 %v506_v39  ;;  %5998 = vmatpush3.bf16.msra.mxu0 %v571_v40 }
 0x282   :  { %6011 = vmatprep.subr.bf16.mxu0 %v6803_v10  ;;  %6003 = vmatprep.subr.bf16.mxu1 %v6803_v10 }
 0x285   :  { %v5989_v51 = vpop.f32.mrf.mxu0 }
 0x286   :  { %v472_v53 = vadd.f32 %v5989_v51, %v363_v50 }
 0x287   :  { %v463_v54 = vpop.f32.mrf.mxu0 }
 0x288   :  { %5994 = vmatmul.mubr.msk.bf16.vlgmr.msra.gmra.mxu1 %vm478_vm3, %v504_v38  ;;  %485 = vst.msk [vmem:[#allocation2 + $0x30] sm:$0xff] %vm478_vm3, %v472_v53  ;;  %v464_v56 = vadd.f32 %v463_v54, %v361_v52 }
 0x289   :  { %6007 = vmatprep.mubr.msk.bf16.mxu1 %vm6804_vm2, %v6803_v10  ;;  %v5990_v57 = vpop.f32.mrf.mxu0  ;;  %6004 = vmatpush3.bf16.msra.mxu1 %v7076_v3 }
 0x28a   :  { %483 = vst.msk [vmem:[#allocation2 + $0x20] sm:$0xff] %vm478_vm3, %v464_v56  ;;  %v475_v59 = vadd.f32 %v5990_v57, %v364_v55  ;;  %6005 = vmatprep.subr.bf16.mxu1 %v6803_v10  ;;  %v7133_v56 = vld [vmem:[#allocation2 + $0x8] sm:$0xf] }
 0x28b   :  { %v466_v60 = vpop.f32.mrf.mxu0  ;;  %v920_v57 = vpack.c.bf16 %v7133_v56, %v7133_v56 }
 0x28c   :  { %486 = vst.msk [vmem:[#allocation2 + $0x38] sm:$0xff] %vm478_vm3, %v475_v59  ;;  %v467_v61 = vadd.f32 %v466_v60, %v362_v58  ;;  %v7141_v58 = vld [vmem:[%s8071_s11] sm:$0x3] }
 0x28d   :  { %6006 = vmatpush3.bf16.msra.mxu1 %v7103_v14  ;;  %v984_v59 = vsel %vm570_vm4, %v920_v57, 0 }
 0x28e   :  { %484 = vst.msk [vmem:[#allocation2 + $0x28] sm:$0xff] %vm478_vm3, %v467_v61  ;;  %6017 = vmatprep.subr.bf16.mxu1 %v6803_v10 }
 0x348   :  { %v542_v41 = vpop.f32.mrf.mxu1 }
 0x349   :  { %vm548_vm5 = vcmp.ge.f32.partialorder %v542_v41, 0.0  ;;  %v549_v42 = vmul.f32 0.01, %v542_v41 }
 0x34a   :  { %v5995_v44 = vpop.f32.mrf.mxu1 }
 0x34b   :  { %v550_v45 = vsel %vm548_vm5, %v542_v41, %v549_v42  ;;  %vm2101_vm5 = vcmask 125952  }
 0x34c   :  { %v545_v46 = vpop.f32.mrf.mxu1  ;;  %v551_v47 = vadd.f32 %v550_v45, %v7052_v43  ;;  %v7125_v45 = vld [vmem:[%s8108_s26] ss:$0 sm:$0xff] }
 0x34e   :  { %v5996_v48 = vpop.f32.mrf.mxu1  ;;  %v553_v49 = vsel %vm552_vm6, %v551_v47, -inf }
 0x34f   :  { %554 = vmax.xlane.f32.xlu0 %v553_v49 }
 0x3d8   :  { %v555_v62 = vpop.xlane.xlu0 %554 }
 0x3d9   :  { %v556_v63 = vsub.f32 %v551_v47, %v555_v62 }
 0x3db   :  { %v557_v0 = vmul.f32 1.442695, %v556_v63 }
 0x3dd   :  { %6673 = vpow2.f32 %v557_v0 }
 0x3ea   :  { %v6674_v1 = vpop.eup %6673 }
 0x3eb   :  { %v559_v2 = vsel %vm552_vm6, %v6674_v1, 0.0 }
 0x3ec   :  { %560 = vadd.xlane.f32.xlu0 %v559_v2 }
 0x475   :  { %v561_v4 = vpop.xlane.xlu0 %560 }
 0x476   :  { %6675 = vrcp.f32 %v561_v4 }
 0x483   :  { %v6676_v5 = vpop.eup %6675 }
 0x484   :  { %v563_v8 = vmul.f32 %v6676_v5, %v6674_v1  ;;  %v922_v5 = vsel %vm478_vm3, %v920_v57, 0 }
 0x486   :  { %v564_v9 = vmul.f32 %v563_v8, %v7083_v6 }
 0x488   :  { %v565_v12 = vpack.c.bf16 %v564_v9, %v564_v9 }
 0x48a   :  { %6000 = vmatmul.mubr.msk.bf16.vlgmr.msra.gmra.mxu0 %vm566_vm7, %v565_v12 }
 0x48b   :  { %6012 = vmatpush3.bf16.xpose.msra.mxu0 %v680_v13  ;;  %6013 = vmatprep.mubr.msk.bf16.mxu0 %vm6804_vm2, %v6803_v10 }
 0x48c   :  { %6023 = vmatprep.subr.bf16.mxu0 %v6803_v10 }
 0x492   :  { %6014 = vmatmul.mubr.msk.bf16.vlgmr.msra.gmra.mxu0 %vm478_vm3, %v678_v11 }
 0x493   :  { %6024 = vmatpush3.bf16.msra.mxu0 %v7076_v3  ;;  %6027 = vmatprep.mubr.msk.bf16.mxu0 %vm6804_vm2, %v6803_v10 }
 0x494   :  { %6025 = vmatprep.subr.bf16.mxu0 %v6803_v10 }
 0x497   :  { %6026 = vmatpush3.bf16.msra.mxu0 %v7103_v14 }
 0x498   :  { %6037 = vmatprep.subr.bf16.mxu0 %v6803_v10 }
 0x54a   :  { %v607_v15 = vpop.f32.mrf.mxu0 }
 0x54b   :  { %v608_v16 = vadd.f32 %v607_v15, %v7038_v37 }
 0x54c   :  { %v6001_v17 = vpop.f32.mrf.mxu0 }
 0x54d   :  { %v613_v18 = vpack.c.bf16 %v608_v16, %v608_v16 }
 0x54e   :  { %v610_v19 = vpop.f32.mrf.mxu0 }
 0x54f   :  { %6008 = vmatmul.mubr.msk.bf16.vlgmr.msra.gmra.mxu1 %vm478_vm3, %v613_v18 }
 0x550   :  { %6018 = vmatpush3.bf16.msra.mxu1 %v742_v20  ;;  %v6002_v21 = vpop.f32.mrf.mxu0  ;;  %6019 = vmatprep.mubr.msk.bf16.mxu1 %vm6804_vm2, %v6803_v10 }
 0x551   :  { %6031 = vmatprep.subr.bf16.mxu1 %v6803_v10 }
 0x552   :  { %v716_v22 = vpop.f32.mrf.mxu0 }
 0x553   :  { %vm722_vm8 = vcmp.ge.f32.partialorder %v716_v22, 0.0  ;;  %v723_v23 = vmul.f32 0.01, %v716_v22 }
 0x554   :  { %v6015_v24 = vpop.f32.mrf.mxu0 }
 0x555   :  { %v724_v25 = vsel %vm722_vm8, %v716_v22, %v723_v23 }
 0x556   :  { %v719_v26 = vpop.f32.mrf.mxu0  ;;  %v725_v27 = vadd.f32 %v724_v25, %v7052_v43 }
 0x558   :  { %v6016_v28 = vpop.f32.mrf.mxu0  ;;  %v726_v29 = vsel %vm552_vm6, %v725_v27, -inf }
 0x559   :  { %727 = vmax.xlane.f32.xlu1 %v726_v29 }
 0x5e2   :  { %v728_v30 = vpop.xlane.xlu1 %727 }
 0x5e3   :  { %v729_v31 = vsub.f32 %v725_v27, %v728_v30 }
 0x5e5   :  { %v730_v32 = vmul.f32 1.442695, %v729_v31 }
 0x5e7   :  { %6677 = vpow2.f32 %v730_v32 }
 0x5f4   :  { %v6678_v33 = vpop.eup %6677 }
 0x5f5   :  { %v732_v34 = vsel %vm552_vm6, %v6678_v33, 0.0 }
 0x5f6   :  { %733 = vadd.xlane.f32.xlu1 %v732_v34 }
 0x60f   :  { %v669_v35 = vpop.f32.mrf.mxu1 }
 0x610   :  { %v670_v46 = vadd.f32 %v7125_v45, %v669_v35  ;;  %v7176_v35 = vld [vmem:[#allocation2 + $0xc] sm:$0xf] }
 0x611   :  { %v6009_v36 = vpop.f32.mrf.mxu1 }
 0x612   :  { %v675_v47 = vmax.f32 %v670_v46, 0.0 }
 0x613   :  { %v672_v37 = vpop.f32.mrf.mxu1 }
 0x614   :  { %v676_v49 = vpack.c.bf16 %v675_v47, %v675_v47 }
 0x615   :  { %v6010_v38 = vpop.f32.mrf.mxu1 }
 0x616   :  { %v877_v54 = vsel %vm570_vm4, %v676_v49, 0  ;;  %v1117_v38 = vpack.c.bf16 %v7176_v35, %v7176_v35 }
 0x67f   :  { %v734_v39 = vpop.xlane.xlu1 %733 }
 0x680   :  { %6679 = vrcp.f32 %v734_v39 }
 0x68d   :  { %v6680_v40 = vpop.eup %6679 }
 0x68e   :  { %v736_v41 = vmul.f32 %v6680_v40, %v6678_v33 }
 0x690   :  { %v737_v42 = vmul.f32 %v736_v41, %v7083_v6 }
 0x692   :  { %v738_v44 = vpack.c.bf16 %v737_v42, %v737_v42  ;;  %v1119_v42 = vsel %vm478_vm3, %v1117_v38, 0 }
 0x694   :  { %6020 = vmatmul.mubr.msk.bf16.vlgmr.msra.gmra.mxu1 %vm566_vm7, %v738_v44 }
 0x695   :  { %6033 = vmatprep.mubr.msk.bf16.mxu1 %vm6804_vm2, %v6803_v10 }
 0x754   :  { %v778_v48 = vpop.f32.mrf.mxu1 }
 0x755   :  { %v779_v50 = vadd.f32 %v778_v48, %v7085_v7 }
 0x756   :  { %v6021_v51 = vpop.f32.mrf.mxu1 }
 0x757   :  { %v784_v52 = vpack.c.bf16 %v779_v50, %v779_v50 }
 0x758   :  { %v781_v53 = vpop.f32.mrf.mxu1 }
 0x759   :  { %6028 = vmatmul.mubr.msk.bf16.vlgmr.msra.gmra.mxu0 %vm478_vm3, %v784_v52 }
 0x75a   :  { %6038 = vmatpush3.bf16.msra.mxu0 %v877_v54  ;;  %v6022_v55 = vpop.f32.mrf.mxu1  ;;  %6039 = vmatprep.mubr.msk.bf16.mxu0 %vm6804_vm2, %v6803_v10 }
 0x75b   :  { %6049 = vmatprep.subr.bf16.mxu0 %v6803_v10 }
 0x761   :  { %6040 = vmatmul.mubr.msk.bf16.vlgmr.msra.gmra.mxu0 %vm566_vm7, %v7141_v58 }
 0x762   :  { %6050 = vmatpush3.bf16.msra.mxu0 %v984_v59  ;;  %6051 = vmatprep.mubr.msk.bf16.mxu0 %vm6804_vm2, %v6803_v10 }
 0x763   :  { %6063 = vmatprep.subr.bf16.mxu0 %v6803_v10 }
 0x819   :  { %v822_v60 = vpop.f32.mrf.mxu0 }
 0x81a   :  { %v823_v61 = vadd.f32 %v7125_v45, %v822_v60 }
 0x81b   :  { %v6029_v62 = vpop.f32.mrf.mxu0 }
 0x81c   :  { %v828_v63 = vmax.f32 %v823_v61, 0.0 }
 0x81d   :  { %v825_v0 = vpop.f32.mrf.mxu0 }
 0x81e   :  { %v829_v1 = vpack.c.bf16 %v828_v63, %v828_v63 }
 0x81f   :  { %v6030_v2 = vpop.f32.mrf.mxu0 }
 0x820   :  { %v834_v4 = vsel %vm570_vm4, %v829_v1, 0 }
 0x821   :  { %6032 = vmatpush3.bf16.msra.mxu1 %v834_v4  ;;  %v7165_v7 = vpop.f32.mrf.mxu0 }
 0x822   :  { %6043 = vmatprep.subr.bf16.mxu1 %v6803_v10 }
 0x823   :  { %v6041_v8 = vpop.f32.mrf.mxu0 }
 0x824   :  { %6034 = vmatmul.mubr.msk.bf16.vlgmr.msra.gmra.mxu1 %vm566_vm7, %v7141_v58 }
 0x825   :  { %6044 = vmatpush3.bf16.xpose.msra.mxu1 %v922_v5  ;;  %6045 = vmatprep.mubr.msk.bf16.mxu1 %vm6804_vm2, %v6803_v10  ;;  %v916_v9 = vpop.f32.mrf.mxu0 }
 0x826   :  { %6055 = vmatprep.subr.bf16.mxu1 %v6803_v10 }
 0x827   :  { %v6042_v11 = vpop.f32.mrf.mxu0 }
 0x82c   :  { %6046 = vmatmul.mubr.msk.bf16.vlgmr.msra.gmra.mxu1 %vm478_vm3, %v920_v57  ;;  %v1181_v57 = vsel %vm570_vm4, %v1117_v38, 0 }
 0x82d   :  { %6056 = vmatpush3.bf16.msra.mxu1 %v7076_v3  ;;  %6059 = vmatprep.mubr.msk.bf16.mxu1 %vm6804_vm2, %v6803_v10 }
 0x82e   :  { %6057 = vmatprep.subr.bf16.mxu1 %v6803_v10 }
 0x831   :  { %6058 = vmatpush3.bf16.msra.mxu1 %v7103_v14 }
 0x832   :  { %6069 = vmatprep.subr.bf16.mxu1 %v6803_v10 }
 0x8e4   :  { %v7167_v12 = vpop.f32.mrf.mxu1 }
 0x8e5   :  { %v914_v8 = vadd.f32 %v7165_v7, %v7167_v12 }
 0x8e6   :  { %v6035_v13 = vpop.f32.mrf.mxu1 }
 0x8e8   :  { %v873_v15 = vpop.f32.mrf.mxu1 }
 0x8ea   :  { %v6036_v16 = vpop.f32.mrf.mxu1 }
 0x8ec   :  { %v958_v17 = vpop.f32.mrf.mxu1 }
 0x8ed   :  { %vm964_vm9 = vcmp.ge.f32.partialorder %v958_v17, 0.0  ;;  %v965_v18 = vmul.f32 0.01, %v958_v17 }
 0x8ee   :  { %v6047_v19 = vpop.f32.mrf.mxu1 }
 0x8ef   :  { %v966_v20 = vsel %vm964_vm9, %v958_v17, %v965_v18 }
 0x8f0   :  { %v961_v21 = vpop.f32.mrf.mxu1  ;;  %v967_v22 = vadd.f32 %v966_v20, %v7052_v43 }
 0x8f2   :  { %v6048_v23 = vpop.f32.mrf.mxu1  ;;  %v968_v24 = vsel %vm552_vm6, %v967_v22, -inf }
 0x8f3   :  { %969 = vmax.xlane.f32.xlu0 %v968_v24 }
 0x97c   :  { %v970_v25 = vpop.xlane.xlu0 %969 }
 0x97d   :  { %v971_v26 = vsub.f32 %v967_v22, %v970_v25  ;;  %v7213_v22 = vld [vmem:[#allocation2 + $0x10] sm:$0xf] }
 0x97e   :  { %v1314_v23 = vpack.c.bf16 %v7213_v22, %v7213_v22 }
 0x97f   :  { %v972_v27 = vmul.f32 1.442695, %v971_v26 }
 0x981   :  { %6681 = vpow2.f32 %v972_v27  ;;  %v1316_v27 = vsel %vm478_vm3, %v1314_v23, 0 }
 0x98e   :  { %v6682_v28 = vpop.eup %6681 }
 0x98f   :  { %v974_v29 = vsel %vm552_vm6, %v6682_v28, 0.0 }
 0x990   :  { %975 = vadd.xlane.f32.xlu1 %v974_v29 }
 0xa19   :  { %v976_v30 = vpop.xlane.xlu1 %975 }
 0xa1a   :  { %6683 = vrcp.f32 %v976_v30 }
 0xa27   :  { %v6684_v31 = vpop.eup %6683 }
 0xa28   :  { %v978_v32 = vmul.f32 %v6684_v31, %v6682_v28 }
 0xa2a   :  { %v979_v33 = vmul.f32 %v978_v32, %v7083_v6 }
 0xa2c   :  { %v980_v34 = vpack.c.bf16 %v979_v33, %v979_v33 }
 0xa2e   :  { %6052 = vmatmul.mubr.msk.bf16.vlgmr.msra.gmra.mxu0 %vm566_vm7, %v980_v34 }
 0xa2f   :  { %6065 = vmatprep.mubr.msk.bf16.mxu0 %vm6804_vm2, %v6803_v10 }
 0xaee   :  { %v1020_v36 = vpop.f32.mrf.mxu0 }
 0xaef   :  { %v1021_v37 = vadd.f32 %v1020_v36, %v7133_v56 }
 0xaf0   :  { %v6053_v39 = vpop.f32.mrf.mxu0 }
 0xaf1   :  { %v1026_v40 = vpack.c.bf16 %v1021_v37, %v1021_v37 }
 0xaf2   :  { %v1023_v41 = vpop.f32.mrf.mxu0 }
 0xaf3   :  { %6060 = vmatmul.mubr.msk.bf16.vlgmr.msra.gmra.mxu1 %vm478_vm3, %v1026_v40  ;;  %v1378_v40 = vsel %vm570_vm4, %v1314_v23, 0 }
 0xaf4   :  { %6070 = vmatpush3.bf16.xpose.msra.mxu1 %v1119_v42  ;;  %v6054_v44 = vpop.f32.mrf.mxu0  ;;  %6071 = vmatprep.mubr.msk.bf16.mxu1 %vm6804_vm2, %v6803_v10 }
 0xaf5   :  { %6081 = vmatprep.subr.bf16.mxu1 %v6803_v10 }
 0xafb   :  { %6072 = vmatmul.mubr.msk.bf16.vlgmr.msra.gmra.mxu1 %vm478_vm3, %v1117_v38 }
 0xafc   :  { %6082 = vmatpush3.bf16.msra.mxu1 %v7076_v3  ;;  %6085 = vmatprep.mubr.msk.bf16.mxu1 %vm6804_vm2, %v6803_v10 }
 0xafd   :  { %6083 = vmatprep.subr.bf16.mxu1 %v6803_v10 }
 0xb00   :  { %6084 = vmatpush3.bf16.msra.mxu1 %v7103_v14 }
 0xb01   :  { %6095 = vmatprep.subr.bf16.mxu1 %v6803_v10 }
 0xbb3   :  { %v1064_v46 = vpop.f32.mrf.mxu1 }
 0xbb4   :  { %v1065_v47 = vadd.f32 %v7125_v45, %v1064_v46 }
 0xbb5   :  { %v6061_v48 = vpop.f32.mrf.mxu1 }
 0xbb6   :  { %v1070_v49 = vmax.f32 %v1065_v47, 0.0 }
 0xbb7   :  { %v1067_v50 = vpop.f32.mrf.mxu1 }
 0xbb8   :  { %v1071_v51 = vpack.c.bf16 %v1070_v49, %v1070_v49 }
 0xbb9   :  { %v6062_v52 = vpop.f32.mrf.mxu1 }
 0xbba   :  { %v1073_v53 = vsel %vm570_vm4, %v1071_v51, 0 }
 0xbbb   :  { %6064 = vmatpush3.bf16.msra.mxu0 %v1073_v53  ;;  %v1155_v54 = vpop.f32.mrf.mxu1 }
 0xbbc   :  { %vm1161_vm10 = vcmp.ge.f32.partialorder %v1155_v54, 0.0  ;;  %v1162_v55 = vmul.f32 0.01, %v1155_v54  ;;  %6075 = vmatprep.subr.bf16.mxu0 %v6803_v10 }
 0xbbd   :  { %v6073_v56 = vpop.f32.mrf.mxu1 }
 0xbbe   :  { %6066 = vmatmul.mubr.msk.bf16.vlgmr.msra.gmra.mxu0 %vm566_vm7, %v7141_v58  ;;  %v1163_v59 = vsel %vm1161_vm10, %v1155_v54, %v1162_v55 }
 0xbbf   :  { %v1158_v60 = vpop.f32.mrf.mxu1  ;;  %6076 = vmatpush3.bf16.msra.mxu0 %v1181_v57  ;;  %v1164_v61 = vadd.f32 %v1163_v59, %v7052_v43  ;;  %6077 = vmatprep.mubr.msk.bf16.mxu0 %vm6804_vm2, %v6803_v10 }
 0xbc0   :  { %6089 = vmatprep.subr.bf16.mxu0 %v6803_v10 }
 0xbc1   :  { %v6074_v62 = vpop.f32.mrf.mxu1  ;;  %v1165_v63 = vsel %vm552_vm6, %v1164_v61, -inf }
 0xbc2   :  { %1166 = vmax.xlane.f32.xlu0 %v1165_v63 }
 0xc4b   :  { %v1167_v0 = vpop.xlane.xlu0 %1166 }
 0xc4c   :  { %v1168_v1 = vsub.f32 %v1164_v61, %v1167_v0  ;;  %v7249_v0 = vld [vmem:[#allocation2 + $0x14] sm:$0xf] }
 0xc4e   :  { %v1169_v2 = vmul.f32 1.442695, %v1168_v1 }
 0xc50   :  { %6685 = vpow2.f32 %v1169_v2 }
 0xc5d   :  { %v6686_v4 = vpop.eup %6685 }
 0xc5e   :  { %v1171_v5 = vsel %vm552_vm6, %v6686_v4, 0.0 }
 0xc5f   :  { %1172 = vadd.xlane.f32.xlu1 %v1171_v5 }
 0xc7e   :  { %v1109_v9 = vpop.f32.mrf.mxu0 }
 0xc7f   :  { %v7207_v11 = vadd.f32 %v1109_v9, %v914_v8 }
 0xc80   :  { %v6067_v13 = vpop.f32.mrf.mxu0 }
 0xc82   :  { %v1112_v15 = vpop.f32.mrf.mxu0 }
 0xc84   :  { %v6068_v16 = vpop.f32.mrf.mxu0 }
 0xce8   :  { %v1173_v17 = vpop.xlane.xlu1 %1172 }
 0xce9   :  { %6687 = vrcp.f32 %v1173_v17 }
 0xcf6   :  { %v6688_v18 = vpop.eup %6687 }
 0xcf7   :  { %v1175_v19 = vmul.f32 %v6688_v18, %v6686_v4  ;;  %v1511_v4 = vpack.c.bf16 %v7249_v0, %v7249_v0 }
 0xcf9   :  { %v1176_v20 = vmul.f32 %v1175_v19, %v7083_v6 }
 0xcfb   :  { %v1177_v21 = vpack.c.bf16 %v1176_v20, %v1176_v20 }
 0xcfd   :  { %6078 = vmatmul.mubr.msk.bf16.vlgmr.msra.gmra.mxu0 %vm566_vm7, %v1177_v21 }
 0xcfe   :  { %6091 = vmatprep.mubr.msk.bf16.mxu0 %vm6804_vm2, %v6803_v10 }
 0xdbd   :  { %v1217_v7 = vpop.f32.mrf.mxu0 }
 0xdbe   :  { %v1218_v12 = vadd.f32 %v1217_v7, %v7176_v35 }
 0xdbf   :  { %v6079_v24 = vpop.f32.mrf.mxu0 }
 0xdc0   :  { %v1223_v25 = vpack.c.bf16 %v1218_v12, %v1218_v12  ;;  %v1575_v24 = vsel %vm570_vm4, %v1511_v4, 0 }
 0xdc1   :  { %v1220_v26 = vpop.f32.mrf.mxu0 }
 0xdc2   :  { %6086 = vmatmul.mubr.msk.bf16.vlgmr.msra.gmra.mxu1 %vm478_vm3, %v1223_v25 }
 0xdc3   :  { %6096 = vmatpush3.bf16.xpose.msra.mxu1 %v1316_v27  ;;  %v6080_v28 = vpop.f32.mrf.mxu0  ;;  %6097 = vmatprep.mubr.msk.bf16.mxu1 %vm6804_vm2, %v6803_v10 }
 0xdc4   :  { %6107 = vmatprep.subr.bf16.mxu1 %v6803_v10 }
 0xdca   :  { %6098 = vmatmul.mubr.msk.bf16.vlgmr.msra.gmra.mxu1 %vm478_vm3, %v1314_v23 }
 0xdcb   :  { %6108 = vmatpush3.bf16.msra.mxu1 %v7076_v3  ;;  %6111 = vmatprep.mubr.msk.bf16.mxu1 %vm6804_vm2, %v6803_v10 }
 0xdcc   :  { %6109 = vmatprep.subr.bf16.mxu1 %v6803_v10 }
 0xdcf   :  { %6110 = vmatpush3.bf16.msra.mxu1 %v7103_v14 }
 0xdd0   :  { %6121 = vmatprep.subr.bf16.mxu1 %v6803_v10 }
 0xe82   :  { %v1261_v29 = vpop.f32.mrf.mxu1 }
 0xe83   :  { %v1262_v30 = vadd.f32 %v7125_v45, %v1261_v29 }
 0xe84   :  { %v6087_v31 = vpop.f32.mrf.mxu1 }
 0xe85   :  { %v1267_v32 = vmax.f32 %v1262_v30, 0.0 }
 0xe86   :  { %v1264_v33 = vpop.f32.mrf.mxu1 }
 0xe87   :  { %v1268_v34 = vpack.c.bf16 %v1267_v32, %v1267_v32 }
 0xe88   :  { %v6088_v35 = vpop.f32.mrf.mxu1 }
 0xe89   :  { %v1270_v36 = vsel %vm570_vm4, %v1268_v34, 0 }
 0xe8a   :  { %6090 = vmatpush3.bf16.msra.mxu0 %v1270_v36  ;;  %v1352_v37 = vpop.f32.mrf.mxu1 }
 0xe8b   :  { %vm1358_vm11 = vcmp.ge.f32.partialorder %v1352_v37, 0.0  ;;  %v1359_v38 = vmul.f32 0.01, %v1352_v37  ;;  %6101 = vmatprep.subr.bf16.mxu0 %v6803_v10 }
 0xe8c   :  { %v6099_v39 = vpop.f32.mrf.mxu1 }
 0xe8d   :  { %6092 = vmatmul.mubr.msk.bf16.vlgmr.msra.gmra.mxu0 %vm566_vm7, %v7141_v58  ;;  %v1360_v41 = vsel %vm1358_vm11, %v1352_v37, %v1359_v38 }
 0xe8e   :  { %v1355_v42 = vpop.f32.mrf.mxu1  ;;  %6102 = vmatpush3.bf16.msra.mxu0 %v1378_v40  ;;  %v1361_v44 = vadd.f32 %v1360_v41, %v7052_v43  ;;  %6103 = vmatprep.mubr.msk.bf16.mxu0 %vm6804_vm2, %v6803_v10 }
 0xe8f   :  { %6115 = vmatprep.subr.bf16.mxu0 %v6803_v10 }
 0xe90   :  { %v6100_v46 = vpop.f32.mrf.mxu1  ;;  %v1362_v47 = vsel %vm552_vm6, %v1361_v44, -inf }
 0xe91   :  { %1363 = vmax.xlane.f32.xlu0 %v1362_v47  ;;  %v7285_v47 = vld [vmem:[#allocation2 + $0x18] sm:$0xf] }
 0xf1a   :  { %v1364_v48 = vpop.xlane.xlu0 %1363 }
 0xf1b   :  { %v1365_v49 = vsub.f32 %v1361_v44, %v1364_v48 }
 0xf1d   :  { %v1366_v50 = vmul.f32 1.442695, %v1365_v49 }
 0xf1f   :  { %6689 = vpow2.f32 %v1366_v50  ;;  %v1708_v50 = vpack.c.bf16 %v7285_v47, %v7285_v47 }
 0xf2c   :  { %v6690_v51 = vpop.eup %6689 }
 0xf2d   :  { %v1368_v52 = vsel %vm552_vm6, %v6690_v51, 0.0 }
 0xf2e   :  { %1369 = vadd.xlane.f32.xlu1 %v1368_v52 }
 0xf4d   :  { %v1306_v53 = vpop.f32.mrf.mxu0 }
 0xf4e   :  { %v7243_v54 = vadd.f32 %v1306_v53, %v7207_v11  ;;  %v1513_v11 = vsel %vm478_vm3, %v1511_v4, 0 }
 0xf4f   :  { %v6093_v55 = vpop.f32.mrf.mxu0 }
 0xf51   :  { %v1309_v56 = vpop.f32.mrf.mxu0 }
 0xf53   :  { %v6094_v57 = vpop.f32.mrf.mxu0 }
 0xfb7   :  { %v1370_v59 = vpop.xlane.xlu1 %1369 }
 0xfb8   :  { %6691 = vrcp.f32 %v1370_v59 }
 0xfc5   :  { %v6692_v60 = vpop.eup %6691 }
 0xfc6   :  { %v1372_v61 = vmul.f32 %v6692_v60, %v6690_v51 }
 0xfc8   :  { %v1373_v62 = vmul.f32 %v1372_v61, %v7083_v6 }
 0xfca   :  { %v1374_v63 = vpack.c.bf16 %v1373_v62, %v1373_v62 }
 0xfcc   :  { %6104 = vmatmul.mubr.msk.bf16.vlgmr.msra.gmra.mxu0 %vm566_vm7, %v1374_v63 }
 0xfcd   :  { %6117 = vmatprep.mubr.msk.bf16.mxu0 %vm6804_vm2, %v6803_v10 }
0x108c   :  { %v1414_v1 = vpop.f32.mrf.mxu0 }
0x108d   :  { %v1415_v2 = vadd.f32 %v1414_v1, %v7213_v22 }
0x108e   :  { %v6105_v5 = vpop.f32.mrf.mxu0 }
0x108f   :  { %v1420_v8 = vpack.c.bf16 %v1415_v2, %v1415_v2  ;;  %v1772_v5 = vsel %vm570_vm4, %v1708_v50, 0 }
0x1090   :  { %v1417_v9 = vpop.f32.mrf.mxu0 }
0x1091   :  { %6112 = vmatmul.mubr.msk.bf16.vlgmr.msra.gmra.mxu1 %vm478_vm3, %v1420_v8 }
0x1092   :  { %6122 = vmatpush3.bf16.xpose.msra.mxu1 %v1513_v11  ;;  %v6106_v13 = vpop.f32.mrf.mxu0  ;;  %6123 = vmatprep.mubr.msk.bf16.mxu1 %vm6804_vm2, %v6803_v10 }
0x1093   :  { %6133 = vmatprep.subr.bf16.mxu1 %v6803_v10 }
0x1099   :  { %6124 = vmatmul.mubr.msk.bf16.vlgmr.msra.gmra.mxu1 %vm478_vm3, %v1511_v4 }
0x109a   :  { %6134 = vmatpush3.bf16.msra.mxu1 %v7076_v3  ;;  %6137 = vmatprep.mubr.msk.bf16.mxu1 %vm6804_vm2, %v6803_v10 }
0x109b   :  { %6135 = vmatprep.subr.bf16.mxu1 %v6803_v10 }
0x109e   :  { %6136 = vmatpush3.bf16.msra.mxu1 %v7103_v14 }
0x109f   :  { %6147 = vmatprep.subr.bf16.mxu1 %v6803_v10 }
0x1151   :  { %v1458_v15 = vpop.f32.mrf.mxu1 }
0x1152   :  { %v1459_v16 = vadd.f32 %v7125_v45, %v1458_v15 }
0x1153   :  { %v6113_v17 = vpop.f32.mrf.mxu1 }
0x1154   :  { %v1464_v18 = vmax.f32 %v1459_v16, 0.0 }
0x1155   :  { %v1461_v19 = vpop.f32.mrf.mxu1 }
0x1156   :  { %v1465_v20 = vpack.c.bf16 %v1464_v18, %v1464_v18 }
0x1157   :  { %v6114_v21 = vpop.f32.mrf.mxu1 }
0x1158   :  { %v1467_v22 = vsel %vm570_vm4, %v1465_v20, 0 }
0x1159   :  { %6116 = vmatpush3.bf16.msra.mxu0 %v1467_v22  ;;  %v1549_v7 = vpop.f32.mrf.mxu1 }
0x115a   :  { %vm1555_vm12 = vcmp.ge.f32.partialorder %v1549_v7, 0.0  ;;  %v1556_v12 = vmul.f32 0.01, %v1549_v7  ;;  %6127 = vmatprep.subr.bf16.mxu0 %v6803_v10 }
0x115b   :  { %v6125_v23 = vpop.f32.mrf.mxu1 }
0x115c   :  { %6118 = vmatmul.mubr.msk.bf16.vlgmr.msra.gmra.mxu0 %vm566_vm7, %v7141_v58  ;;  %v1557_v25 = vsel %vm1555_vm12, %v1549_v7, %v1556_v12 }
0x115d   :  { %v1552_v26 = vpop.f32.mrf.mxu1  ;;  %6128 = vmatpush3.bf16.msra.mxu0 %v1575_v24  ;;  %v1558_v27 = vadd.f32 %v1557_v25, %v7052_v43  ;;  %6129 = vmatprep.mubr.msk.bf16.mxu0 %vm6804_vm2, %v6803_v10 }
0x115e   :  { %6141 = vmatprep.subr.bf16.mxu0 %v6803_v10 }
0x115f   :  { %v6126_v28 = vpop.f32.mrf.mxu1  ;;  %v1559_v29 = vsel %vm552_vm6, %v1558_v27, -inf }
0x1160   :  { %1560 = vmax.xlane.f32.xlu0 %v1559_v29  ;;  %v7321_v29 = vld [vmem:[#allocation2 + $0x1c] sm:$0xf] }
0x11e9   :  { %v1561_v30 = vpop.xlane.xlu0 %1560 }
0x11ea   :  { %v1562_v31 = vsub.f32 %v1558_v27, %v1561_v30 }
0x11ec   :  { %v1563_v32 = vmul.f32 1.442695, %v1562_v31 }
0x11ee   :  { %6693 = vpow2.f32 %v1563_v32  ;;  %v1905_v32 = vpack.c.bf16 %v7321_v29, %v7321_v29 }
0x11fb   :  { %v6694_v33 = vpop.eup %6693 }
0x11fc   :  { %v1565_v34 = vsel %vm552_vm6, %v6694_v33, 0.0 }
0x11fd   :  { %1566 = vadd.xlane.f32.xlu1 %v1565_v34 }
0x121c   :  { %v1503_v35 = vpop.f32.mrf.mxu0 }
0x121d   :  { %v7279_v36 = vadd.f32 %v1503_v35, %v7243_v54  ;;  %v1710_v54 = vsel %vm478_vm3, %v1708_v50, 0 }
0x121e   :  { %v6119_v37 = vpop.f32.mrf.mxu0 }
0x1220   :  { %v1506_v38 = vpop.f32.mrf.mxu0 }
0x1222   :  { %v6120_v39 = vpop.f32.mrf.mxu0 }
0x1286   :  { %v1567_v40 = vpop.xlane.xlu1 %1566 }
0x1287   :  { %6695 = vrcp.f32 %v1567_v40 }
0x1294   :  { %v6696_v41 = vpop.eup %6695 }
0x1295   :  { %v1569_v42 = vmul.f32 %v6696_v41, %v6694_v33 }
0x1297   :  { %v1570_v44 = vmul.f32 %v1569_v42, %v7083_v6 }
0x1299   :  { %v1571_v46 = vpack.c.bf16 %v1570_v44, %v1570_v44 }
0x129b   :  { %6130 = vmatmul.mubr.msk.bf16.vlgmr.msra.gmra.mxu0 %vm566_vm7, %v1571_v46 }
0x129c   :  { %6143 = vmatprep.mubr.msk.bf16.mxu0 %vm6804_vm2, %v6803_v10 }
0x135b   :  { %v1611_v48 = vpop.f32.mrf.mxu0 }
0x135c   :  { %v1612_v49 = vadd.f32 %v1611_v48, %v7249_v0 }
0x135d   :  { %v6131_v51 = vpop.f32.mrf.mxu0 }
0x135e   :  { %v1617_v52 = vpack.c.bf16 %v1612_v49, %v1612_v49 }
0x135f   :  { %v1614_v53 = vpop.f32.mrf.mxu0 }
0x1360   :  { %6138 = vmatmul.mubr.msk.bf16.vlgmr.msra.gmra.mxu1 %vm478_vm3, %v1617_v52 }
0x1361   :  { %6148 = vmatpush3.bf16.xpose.msra.mxu1 %v1710_v54  ;;  %v6132_v55 = vpop.f32.mrf.mxu0  ;;  %6149 = vmatprep.mubr.msk.bf16.mxu1 %vm6804_vm2, %v6803_v10 }
0x1362   :  { %6159 = vmatprep.subr.bf16.mxu1 %v6803_v10 }
0x1368   :  { %6150 = vmatmul.mubr.msk.bf16.vlgmr.msra.gmra.mxu1 %vm478_vm3, %v1708_v50 }
0x1369   :  { %6160 = vmatpush3.bf16.msra.mxu1 %v7076_v3  ;;  %6163 = vmatprep.mubr.msk.bf16.mxu1 %vm6804_vm2, %v6803_v10 }
0x136a   :  { %6161 = vmatprep.subr.bf16.mxu1 %v6803_v10 }
0x136d   :  { %6162 = vmatpush3.bf16.msra.mxu1 %v7103_v14 }
0x136e   :  { %6173 = vmatprep.subr.bf16.mxu1 %v6803_v10 }
0x1420   :  { %v1655_v56 = vpop.f32.mrf.mxu1 }
0x1421   :  { %v1656_v57 = vadd.f32 %v7125_v45, %v1655_v56 }
0x1422   :  { %v6139_v59 = vpop.f32.mrf.mxu1 }
0x1423   :  { %v1661_v60 = vmax.f32 %v1656_v57, 0.0 }
0x1424   :  { %v1658_v61 = vpop.f32.mrf.mxu1 }
0x1425   :  { %v1662_v62 = vpack.c.bf16 %v1661_v60, %v1661_v60 }
0x1426   :  { %v6140_v63 = vpop.f32.mrf.mxu1 }
0x1427   :  { %v1664_v0 = vsel %vm570_vm4, %v1662_v62, 0 }
0x1428   :  { %6142 = vmatpush3.bf16.msra.mxu0 %v1664_v0  ;;  %v1746_v1 = vpop.f32.mrf.mxu1 }
0x1429   :  { %vm1752_vm13 = vcmp.ge.f32.partialorder %v1746_v1, 0.0  ;;  %v1753_v2 = vmul.f32 0.01, %v1746_v1  ;;  %6153 = vmatprep.subr.bf16.mxu0 %v6803_v10 }
0x142a   :  { %v6151_v4 = vpop.f32.mrf.mxu1 }
0x142b   :  { %6144 = vmatmul.mubr.msk.bf16.vlgmr.msra.gmra.mxu0 %vm566_vm7, %v7141_v58  ;;  %v1754_v8 = vsel %vm1752_vm13, %v1746_v1, %v1753_v2 }
0x142c   :  { %v1749_v9 = vpop.f32.mrf.mxu1  ;;  %6154 = vmatpush3.bf16.msra.mxu0 %v1772_v5  ;;  %v1755_v11 = vadd.f32 %v1754_v8, %v7052_v43  ;;  %6155 = vmatprep.mubr.msk.bf16.mxu0 %vm6804_vm2, %v6803_v10 }
0x142d   :  { %6167 = vmatprep.subr.bf16.mxu0 %v6803_v10  ;;  %v7357_v9 = vld [vmem:[#allocation2] sm:$0xff] }
0x142e   :  { %v6152_v13 = vpop.f32.mrf.mxu1  ;;  %v1756_v15 = vsel %vm552_vm6, %v1755_v11, -inf }
0x142f   :  { %1757 = vmax.xlane.f32.xlu0 %v1756_v15  ;;  %v2104_v15 = vpack.c.bf16 %v7357_v9, %v7357_v9 }
0x14b8   :  { %v1758_v16 = vpop.xlane.xlu0 %1757 }
0x14b9   :  { %v1759_v17 = vsub.f32 %v1755_v11, %v1758_v16 }
0x14bb   :  { %v1760_v18 = vmul.f32 1.442695, %v1759_v17 }
0x14bd   :  { %6697 = vpow2.f32 %v1760_v18 }
0x14ca   :  { %v6698_v19 = vpop.eup %6697 }
0x14cb   :  { %v1762_v20 = vsel %vm552_vm6, %v6698_v19, 0.0 }
0x14cc   :  { %1763 = vadd.xlane.f32.xlu1 %v1762_v20 }
0x14eb   :  { %v1700_v21 = vpop.f32.mrf.mxu0 }
0x14ec   :  { %v7315_v22 = vadd.f32 %v1700_v21, %v7279_v36  ;;  %v1907_v36 = vsel %vm478_vm3, %v1905_v32, 0 }
0x14ed   :  { %v6145_v7 = vpop.f32.mrf.mxu0 }
0x14ef   :  { %v1703_v12 = vpop.f32.mrf.mxu0 }
0x14f1   :  { %v6146_v23 = vpop.f32.mrf.mxu0 }
0x1555   :  { %v1764_v24 = vpop.xlane.xlu1 %1763 }
0x1556   :  { %6699 = vrcp.f32 %v1764_v24 }
0x1563   :  { %v6700_v25 = vpop.eup %6699 }
0x1564   :  { %v1766_v26 = vmul.f32 %v6700_v25, %v6698_v19 }
0x1566   :  { %v1767_v27 = vmul.f32 %v1766_v26, %v7083_v6 }
0x1568   :  { %v1768_v28 = vpack.c.bf16 %v1767_v27, %v1767_v27 }
0x156a   :  { %6156 = vmatmul.mubr.msk.bf16.vlgmr.msra.gmra.mxu0 %vm566_vm7, %v1768_v28  ;;  %v7376_v28 = vld [vmem:[%s8074_s14] sm:$0xff] }
0x156b   :  { %6169 = vmatprep.mubr.msk.bf16.mxu0 %vm6804_vm2, %v6803_v10 }
0x162a   :  { %v1808_v30 = vpop.f32.mrf.mxu0 }
0x162b   :  { %v1809_v31 = vadd.f32 %v1808_v30, %v7285_v47 }
0x162c   :  { %v6157_v33 = vpop.f32.mrf.mxu0 }
0x162d   :  { %v1814_v34 = vpack.c.bf16 %v1809_v31, %v1809_v31 }
0x162e   :  { %v1811_v35 = vpop.f32.mrf.mxu0 }
0x162f   :  { %6164 = vmatmul.mubr.msk.bf16.vlgmr.msra.gmra.mxu1 %vm478_vm3, %v1814_v34 }
0x1630   :  { %6174 = vmatpush3.bf16.xpose.msra.mxu1 %v1907_v36  ;;  %v6158_v37 = vpop.f32.mrf.mxu0  ;;  %6175 = vmatprep.mubr.msk.bf16.mxu1 %vm6804_vm2, %v6803_v10 }
0x1631   :  { %6185 = vmatprep.subr.bf16.mxu1 %v6803_v10 }
0x1637   :  { %6176 = vmatmul.mubr.msk.bf16.vlgmr.msra.gmra.mxu1 %vm478_vm3, %v1905_v32 }
0x1638   :  { %6186 = vmatpush3.bf16.msra.mxu1 %v7076_v3  ;;  %6189 = vmatprep.mubr.msk.bf16.mxu1 %vm6804_vm2, %v6803_v10 }
0x1639   :  { %6187 = vmatprep.subr.bf16.mxu1 %v6803_v10 }
0x163c   :  { %6188 = vmatpush3.bf16.msra.mxu1 %v7103_v14  ;;  %v1969_v14 = vsel %vm570_vm4, %v1905_v32, 0 }
0x163d   :  { %6199 = vmatprep.subr.bf16.mxu1 %v6803_v10 }
0x16ef   :  { %v1852_v38 = vpop.f32.mrf.mxu1 }
0x16f0   :  { %v1853_v39 = vadd.f32 %v7125_v45, %v1852_v38 }
0x16f1   :  { %v6165_v40 = vpop.f32.mrf.mxu1 }
0x16f2   :  { %v1858_v41 = vmax.f32 %v1853_v39, 0.0 }
0x16f3   :  { %v1855_v42 = vpop.f32.mrf.mxu1 }
0x16f4   :  { %v1859_v44 = vpack.c.bf16 %v1858_v41, %v1858_v41 }
0x16f5   :  { %v6166_v46 = vpop.f32.mrf.mxu1 }
0x16f6   :  { %v1861_v47 = vsel %vm570_vm4, %v1859_v44, 0  ;;  %v7392_v46 = vld [vmem:[%s8072_s12 + $0x8] sm:$0xff]  }
0x16f7   :  { %6168 = vmatpush3.bf16.msra.mxu0 %v1861_v47  ;;  %v1943_v3 = vpop.f32.mrf.mxu1 }
0x16f8   :  { %vm1949_vm14 = vcmp.ge.f32.partialorder %v1943_v3, 0.0  ;;  %v1950_v48 = vmul.f32 0.01, %v1943_v3  ;;  %6179 = vmatprep.subr.bf16.mxu0 %v6803_v10 }
0x16f9   :  { %v6177_v49 = vpop.f32.mrf.mxu1 }
0x16fa   :  { %6170 = vmatmul.mubr.msk.bf16.vlgmr.msra.gmra.mxu0 %vm566_vm7, %v7141_v58  ;;  %v1951_v50 = vsel %vm1949_vm14, %v1943_v3, %v1950_v48  ;;  %v7399_v48 = vld [vmem:[%s8075_s15] sm:$0xff]  ;;  %v7401_v49 = vld [vmem:[#allocation2 + $0x8] sm:$0xff] }
0x16fb   :  { %v1946_v51 = vpop.f32.mrf.mxu1  ;;  %6180 = vmatpush3.bf16.msra.mxu0 %v1969_v14  ;;  %v1952_v52 = vadd.f32 %v1951_v50, %v7052_v43  ;;  %6181 = vmatprep.mubr.msk.bf16.mxu0 %vm6804_vm2, %v6803_v10 }
0x16fc   :  { %6193 = vmatprep.subr.bf16.mxu0 %v6803_v10  ;;  %v2277_v51 = vpack.c.bf16 %v7401_v49, %v7401_v49 }
0x16fd   :  { %v6178_v53 = vpop.f32.mrf.mxu1  ;;  %v1953_v54 = vsel %vm552_vm6, %v1952_v52, -inf }
0x16fe   :  { %1954 = vmax.xlane.f32.xlu0 %v1953_v54  ;;  %v2279_v53 = vsel %vm478_vm3, %v2277_v51, 0  ;;  %v7419_v54 = vld [vmem:[%s8072_s12] sm:$0xff]  }
0x1787   :  { %v1955_v55 = vpop.xlane.xlu0 %1954 }
0x1788   :  { %v1956_v56 = vsub.f32 %v1952_v52, %v1955_v55 }
0x178a   :  { %v1957_v57 = vmul.f32 1.442695, %v1956_v56 }
0x178c   :  { %6701 = vpow2.f32 %v1957_v57 }
0x1799   :  { %v6702_v59 = vpop.eup %6701 }
0x179a   :  { %v1959_v60 = vsel %vm552_vm6, %v6702_v59, 0.0 }
0x179b   :  { %1960 = vadd.xlane.f32.xlu1 %v1959_v60 }
0x17ba   :  { %v1897_v61 = vpop.f32.mrf.mxu0 }
0x17bb   :  { %v7351_v43 = vadd.f32 %v1897_v61, %v7315_v22  ;;  %v2341_v61 = vsel %vm2169_vm0, %v2277_v51, 0 }
0x17bc   :  { %v6171_v62 = vpop.f32.mrf.mxu0 }
0x17be   :  { %v1900_v63 = vpop.f32.mrf.mxu0 }
0x17c0   :  { %v6172_v0 = vpop.f32.mrf.mxu0 }
0x1824   :  { %v1961_v1 = vpop.xlane.xlu1 %1960 }
0x1825   :  { %6703 = vrcp.f32 %v1961_v1 }
0x1832   :  { %v6704_v2 = vpop.eup %6703 }
0x1833   :  { %v1963_v4 = vmul.f32 %v6704_v2, %v6702_v59 }
0x1835   :  { %v1964_v5 = vmul.f32 %v1963_v4, %v7083_v6  ;;  %v2106_v6 = vsel %vm478_vm3, %v2104_v15, 0 }
0x1837   :  { %v1965_v8 = vpack.c.bf16 %v1964_v5, %v1964_v5 }
0x1839   :  { %6182 = vmatmul.mubr.msk.bf16.vlgmr.msra.gmra.mxu0 %vm566_vm7, %v1965_v8 }
0x183a   :  { %6195 = vmatprep.mubr.msk.bf16.mxu0 %vm6804_vm2, %v6803_v10 }
0x18f9   :  { %v2005_v11 = vpop.f32.mrf.mxu0 }
0x18fa   :  { %v2006_v13 = vadd.f32 %v2005_v11, %v7321_v29 }
0x18fb   :  { %v6183_v16 = vpop.f32.mrf.mxu0 }
0x18fc   :  { %v2011_v17 = vpack.c.bf16 %v2006_v13, %v2006_v13 }
0x18fd   :  { %v2008_v18 = vpop.f32.mrf.mxu0 }
0x18fe   :  { %6190 = vmatmul.mubr.msk.bf16.vlgmr.msra.gmra.mxu1 %vm478_vm3, %v2011_v17 }
0x18ff   :  { %6200 = vmatpush3.bf16.xpose.msra.mxu1 %v2106_v6  ;;  %v6184_v19 = vpop.f32.mrf.mxu0  ;;  %6201 = vmatprep.mubr.msk.bf16.mxu1 %vm6804_vm2, %v6803_v10 }
0x1900   :  { %6211 = vmatprep.subr.bf16.mxu1 %v6803_v10 }
0x1906   :  { %6202 = vmatmul.mubr.msk.bf16.vlgmr.msra.gmra.mxu1 %vm478_vm3, %v2104_v15 }
0x1907   :  { %6215 = vmatprep.mubr.msk.bf16.mxu1 %vm6804_vm2, %v6803_v10  ;;  %6212 = vmatpush3.bf16.msra.mxu1 %v7392_v46 }
0x1908   :  { %6213 = vmatprep.subr.bf16.mxu1 %v6803_v10 }
0x190b   :  { %6214 = vmatpush3.bf16.msra.mxu1 %v7419_v54 }
0x190c   :  { %6225 = vmatprep.subr.bf16.mxu1 %v6803_v10 }
0x19be   :  { %v2049_v20 = vpop.f32.mrf.mxu1 }
0x19bf   :  { %v2050_v21 = vadd.f32 %v7125_v45, %v2049_v20  ;;  %v2170_v45 = vsel %vm2169_vm0, %v2104_v15, 0 }
0x19c0   :  { %v6191_v22 = vpop.f32.mrf.mxu1 }
0x19c1   :  { %v2055_v7 = vmax.f32 %v2050_v21, 0.0 }
0x19c2   :  { %v2052_v12 = vpop.f32.mrf.mxu1 }
0x19c3   :  { %v2056_v23 = vpack.c.bf16 %v2055_v7, %v2055_v7 }
0x19c4   :  { %v6192_v24 = vpop.f32.mrf.mxu1 }
0x19c5   :  { %v2058_v25 = vsel %vm570_vm4, %v2056_v23, 0  ;;  %v7441_v23 = vld [vmem:[%s8073_s13] ss:$0 sm:$0xff] }
0x19c6   :  { %6194 = vmatpush3.bf16.msra.mxu0 %v2058_v25  ;;  %v2142_v26 = vpop.f32.mrf.mxu1 }
0x19c7   :  { %vm2148_vm15 = vcmp.ge.f32.partialorder %v2142_v26, 0.0  ;;  %v2149_v27 = vmul.f32 0.01, %v2142_v26  ;;  %6205 = vmatprep.subr.bf16.mxu0 %v6803_v10 }
0x19c8   :  { %v6203_v29 = vpop.f32.mrf.mxu1 }
0x19c9   :  { %6196 = vmatmul.mubr.msk.bf16.vlgmr.msra.gmra.mxu0 %vm566_vm7, %v7141_v58  ;;  %v2150_v30 = vsel %vm2148_vm15, %v2142_v26, %v2149_v27 }
0x19ca   :  { %v2145_v31 = vpop.f32.mrf.mxu1  ;;  %6206 = vmatpush3.bf16.msra.mxu0 %v2170_v45  ;;  %v2151_v32 = vadd.f32 %v2150_v30, %v7376_v28  ;;  %6207 = vmatprep.mubr.msk.bf16.mxu0 %vm6804_vm2, %v6803_v10 }
0x19cb   :  { %6219 = vmatprep.subr.bf16.mxu0 %v6803_v10 }
0x19cc   :  { %v6204_v33 = vpop.f32.mrf.mxu1  ;;  %v2153_v34 = vsel %vm2152_vm1, %v2151_v32, -inf }
0x19cd   :  { %2154 = vmax.xlane.f32.xlu0 %v2153_v34  ;;  %v7449_v34 = vld [vmem:[#allocation2 + $0x10] sm:$0xff] }
0x1a56   :  { %v2155_v35 = vpop.xlane.xlu0 %2154 }
0x1a57   :  { %v2156_v36 = vsub.f32 %v2151_v32, %v2155_v35  ;;  %v2519_v35 = vpack.c.bf16 %v7449_v34, %v7449_v34 }
0x1a59   :  { %v2157_v58 = vmul.f32 1.442695, %v2156_v36  ;;  %v7457_v36 = vld [vmem:[%s8076_s16] sm:$0x3] }
0x1a5b   :  { %6705 = vpow2.f32 %v2157_v58  ;;  %v2583_v58 = vsel %vm2169_vm0, %v2519_v35, 0 }
0x1a68   :  { %v6706_v37 = vpop.eup %6705 }
0x1a69   :  { %v2159_v38 = vsel %vm2152_vm1, %v6706_v37, 0.0 }
0x1a6a   :  { %2160 = vadd.xlane.f32.xlu1 %v2159_v38 }
0x1a89   :  { %v2094_v39 = vpop.f32.mrf.mxu0 }
0x1a8a   :  { %v2100_v40 = vadd.f32 %v2094_v39, %v7351_v43 }
0x1a8b   :  { %v6197_v41 = vpop.f32.mrf.mxu0 }
0x1a8c   :  { %2102 = vst.msk [vmem:[#allocation3] sm:$0xf] %vm2101_vm5, %v2100_v40 }
0x1a8d   :  { %v2097_v42 = vpop.f32.mrf.mxu0 }
0x1a8f   :  { %v6198_v44 = vpop.f32.mrf.mxu0 }
0x1af3   :  { %v2161_v47 = vpop.xlane.xlu1 %2160 }
0x1af4   :  { %6707 = vrcp.f32 %v2161_v47 }
0x1b01   :  { %v6708_v3 = vpop.eup %6707 }
0x1b02   :  { %v2163_v14 = vmul.f32 %v6708_v3, %v6706_v37  ;;  %v2521_v3 = vsel %vm478_vm3, %v2519_v35, 0 }
0x1b04   :  { %v2164_v50 = vmul.f32 %v2163_v14, %v7399_v48 }
0x1b06   :  { %v2165_v52 = vpack.c.bf16 %v2164_v50, %v2164_v50 }
0x1b08   :  { %6208 = vmatmul.mubr.msk.bf16.vlgmr.msra.gmra.mxu0 %vm2152_vm1, %v2165_v52 }
0x1b09   :  { %6220 = vmatpush3.bf16.xpose.msra.mxu0 %v2279_v53  ;;  %6221 = vmatprep.mubr.msk.bf16.mxu0 %vm6804_vm2, %v6803_v10 }
0x1b0a   :  { %6231 = vmatprep.subr.bf16.mxu0 %v6803_v10 }
0x1b10   :  { %6222 = vmatmul.mubr.msk.bf16.vlgmr.msra.gmra.mxu0 %vm478_vm3, %v2277_v51 }
0x1b11   :  { %6232 = vmatpush3.bf16.msra.mxu0 %v7392_v46  ;;  %6235 = vmatprep.mubr.msk.bf16.mxu0 %vm6804_vm2, %v6803_v10 }
0x1b12   :  { %6233 = vmatprep.subr.bf16.mxu0 %v6803_v10 }
0x1b15   :  { %6234 = vmatpush3.bf16.msra.mxu0 %v7419_v54 }
0x1b16   :  { %6245 = vmatprep.subr.bf16.mxu0 %v6803_v10 }
0x1bc8   :  { %v2206_v55 = vpop.f32.mrf.mxu0 }
0x1bc9   :  { %v2207_v56 = vadd.f32 %v2206_v55, %v7357_v9 }
0x1bca   :  { %v6209_v57 = vpop.f32.mrf.mxu0 }
0x1bcb   :  { %v2212_v59 = vpack.c.bf16 %v2207_v56, %v2207_v56 }
0x1bcc   :  { %v2209_v60 = vpop.f32.mrf.mxu0 }
0x1bcd   :  { %6216 = vmatmul.mubr.msk.bf16.vlgmr.msra.gmra.mxu1 %vm478_vm3, %v2212_v59 }
0x1bce   :  { %6226 = vmatpush3.bf16.msra.mxu1 %v2341_v61  ;;  %v6210_v43 = vpop.f32.mrf.mxu0  ;;  %6227 = vmatprep.mubr.msk.bf16.mxu1 %vm6804_vm2, %v6803_v10 }
0x1bcf   :  { %6239 = vmatprep.subr.bf16.mxu1 %v6803_v10 }
0x1bd0   :  { %v2315_v62 = vpop.f32.mrf.mxu0 }
0x1bd1   :  { %vm2321_vm8 = vcmp.ge.f32.partialorder %v2315_v62, 0.0  ;;  %v2322_v63 = vmul.f32 0.01, %v2315_v62 }
0x1bd2   :  { %v6223_v0 = vpop.f32.mrf.mxu0 }
0x1bd3   :  { %v2323_v1 = vsel %vm2321_vm8, %v2315_v62, %v2322_v63 }
0x1bd4   :  { %v2318_v2 = vpop.f32.mrf.mxu0  ;;  %v2324_v4 = vadd.f32 %v2323_v1, %v7376_v28 }
0x1bd6   :  { %v6224_v5 = vpop.f32.mrf.mxu0  ;;  %v2325_v8 = vsel %vm2152_vm1, %v2324_v4, -inf }
0x1bd7   :  { %2326 = vmax.xlane.f32.xlu0 %v2325_v8 }
0x1c60   :  { %v2327_v9 = vpop.xlane.xlu0 %2326 }
0x1c61   :  { %v2328_v11 = vsub.f32 %v2324_v4, %v2327_v9 }
0x1c63   :  { %v2329_v13 = vmul.f32 1.442695, %v2328_v11 }
0x1c65   :  { %6709 = vpow2.f32 %v2329_v13 }
0x1c72   :  { %v6710_v15 = vpop.eup %6709 }
0x1c73   :  { %v2331_v16 = vsel %vm2152_vm1, %v6710_v15, 0.0 }
0x1c74   :  { %2332 = vadd.xlane.f32.xlu1 %v2331_v16 }
0x1c8d   :  { %v2268_v17 = vpop.f32.mrf.mxu1 }
0x1c8e   :  { %v2269_v24 = vadd.f32 %v7441_v23, %v2268_v17  ;;  %v7492_v17 = vld [vmem:[#allocation2 + $0x18] sm:$0xff] }
0x1c8f   :  { %v6217_v18 = vpop.f32.mrf.mxu1 }
0x1c90   :  { %v2274_v25 = vmax.f32 %v2269_v24, 0.0 }
0x1c91   :  { %v2271_v6 = vpop.f32.mrf.mxu1 }
0x1c92   :  { %v2275_v27 = vpack.c.bf16 %v2274_v25, %v2274_v25 }
0x1c93   :  { %v6218_v19 = vpop.f32.mrf.mxu1 }
0x1c94   :  { %v2476_v32 = vsel %vm2169_vm0, %v2275_v27, 0  ;;  %v2716_v19 = vpack.c.bf16 %v7492_v17, %v7492_v17 }
0x1cfd   :  { %v2333_v20 = vpop.xlane.xlu1 %2332 }
0x1cfe   :  { %6711 = vrcp.f32 %v2333_v20 }
0x1d0b   :  { %v6712_v21 = vpop.eup %6711 }
0x1d0c   :  { %v2335_v22 = vmul.f32 %v6712_v21, %v6710_v15 }
0x1d0e   :  { %v2336_v7 = vmul.f32 %v2335_v22, %v7399_v48 }
0x1d10   :  { %v2337_v12 = vpack.c.bf16 %v2336_v7, %v2336_v7  ;;  %v2718_v7 = vsel %vm478_vm3, %v2716_v19, 0 }
0x1d12   :  { %6228 = vmatmul.mubr.msk.bf16.vlgmr.msra.gmra.mxu1 %vm2152_vm1, %v2337_v12 }
0x1d13   :  { %6241 = vmatprep.mubr.msk.bf16.mxu1 %vm6804_vm2, %v6803_v10 }
0x1dd2   :  { %v2377_v26 = vpop.f32.mrf.mxu1 }
0x1dd3   :  { %v2378_v29 = vadd.f32 %v2377_v26, %v7401_v49 }
0x1dd4   :  { %v6229_v45 = vpop.f32.mrf.mxu1 }
0x1dd5   :  { %v2383_v30 = vpack.c.bf16 %v2378_v29, %v2378_v29 }
0x1dd6   :  { %v2380_v31 = vpop.f32.mrf.mxu1 }
0x1dd7   :  { %6236 = vmatmul.mubr.msk.bf16.vlgmr.msra.gmra.mxu0 %vm478_vm3, %v2383_v30 }
0x1dd8   :  { %6246 = vmatpush3.bf16.msra.mxu0 %v2476_v32  ;;  %v6230_v33 = vpop.f32.mrf.mxu1  ;;  %6247 = vmatprep.mubr.msk.bf16.mxu0 %vm6804_vm2, %v6803_v10 }
0x1dd9   :  { %6257 = vmatprep.subr.bf16.mxu0 %v6803_v10 }
0x1ddf   :  { %6248 = vmatmul.mubr.msk.bf16.vlgmr.msra.gmra.mxu0 %vm2152_vm1, %v7457_v36 }
0x1de0   :  { %6258 = vmatpush3.bf16.msra.mxu0 %v2583_v58  ;;  %6259 = vmatprep.mubr.msk.bf16.mxu0 %vm6804_vm2, %v6803_v10 }
0x1de1   :  { %6271 = vmatprep.subr.bf16.mxu0 %v6803_v10 }
0x1e97   :  { %v2421_v37 = vpop.f32.mrf.mxu0 }
0x1e98   :  { %v2422_v38 = vadd.f32 %v7441_v23, %v2421_v37 }
0x1e99   :  { %v6237_v39 = vpop.f32.mrf.mxu0 }
0x1e9a   :  { %v2427_v40 = vmax.f32 %v2422_v38, 0.0 }
0x1e9b   :  { %v2424_v41 = vpop.f32.mrf.mxu0 }
0x1e9c   :  { %v2428_v42 = vpack.c.bf16 %v2427_v40, %v2427_v40 }
0x1e9d   :  { %v6238_v44 = vpop.f32.mrf.mxu0 }
0x1e9e   :  { %v2433_v47 = vsel %vm2169_vm0, %v2428_v42, 0 }
0x1e9f   :  { %6240 = vmatpush3.bf16.msra.mxu1 %v2433_v47  ;;  %v7481_v49 = vpop.f32.mrf.mxu0 }
0x1ea0   :  { %6251 = vmatprep.subr.bf16.mxu1 %v6803_v10 }
0x1ea1   :  { %v6249_v14 = vpop.f32.mrf.mxu0 }
0x1ea2   :  { %6242 = vmatmul.mubr.msk.bf16.vlgmr.msra.gmra.mxu1 %vm2152_vm1, %v7457_v36 }
0x1ea3   :  { %6252 = vmatpush3.bf16.xpose.msra.mxu1 %v2521_v3  ;;  %6253 = vmatprep.mubr.msk.bf16.mxu1 %vm6804_vm2, %v6803_v10  ;;  %v2515_v50 = vpop.f32.mrf.mxu0 }
0x1ea4   :  { %6263 = vmatprep.subr.bf16.mxu1 %v6803_v10 }
0x1ea5   :  { %v6250_v51 = vpop.f32.mrf.mxu0 }
0x1eaa   :  { %6254 = vmatmul.mubr.msk.bf16.vlgmr.msra.gmra.mxu1 %vm478_vm3, %v2519_v35 }
0x1eab   :  { %6264 = vmatpush3.bf16.msra.mxu1 %v7392_v46  ;;  %6267 = vmatprep.mubr.msk.bf16.mxu1 %vm6804_vm2, %v6803_v10 }
0x1eac   :  { %6265 = vmatprep.subr.bf16.mxu1 %v6803_v10 }
0x1eaf   :  { %6266 = vmatpush3.bf16.msra.mxu1 %v7419_v54 }
0x1eb0   :  { %6277 = vmatprep.subr.bf16.mxu1 %v6803_v10 }
0x1f62   :  { %v7483_v52 = vpop.f32.mrf.mxu1 }
0x1f64   :  { %v6243_v53 = vpop.f32.mrf.mxu1 }
0x1f66   :  { %v2472_v55 = vpop.f32.mrf.mxu1 }
0x1f68   :  { %v6244_v56 = vpop.f32.mrf.mxu1 }
0x1f6a   :  { %v2557_v57 = vpop.f32.mrf.mxu1 }
0x1f6b   :  { %vm2563_vm9 = vcmp.ge.f32.partialorder %v2557_v57, 0.0  ;;  %v2564_v59 = vmul.f32 0.01, %v2557_v57 }
0x1f6c   :  { %v6255_v60 = vpop.f32.mrf.mxu1 }
0x1f6d   :  { %v2565_v61 = vsel %vm2563_vm9, %v2557_v57, %v2564_v59  ;;  %v7529_v60 = vld [vmem:[#allocation2 + $0x20] sm:$0xf] }
0x1f6e   :  { %v2560_v43 = vpop.f32.mrf.mxu1  ;;  %v2566_v62 = vadd.f32 %v2565_v61, %v7376_v28  ;;  %v2914_v61 = vpack.c.bf16 %v7529_v60, %v7529_v60 }
0x1f70   :  { %v6256_v63 = vpop.f32.mrf.mxu1  ;;  %v2567_v0 = vsel %vm2152_vm1, %v2566_v62, -inf }
0x1f71   :  { %2568 = vmax.xlane.f32.xlu0 %v2567_v0 }
0x1ffa   :  { %v2569_v1 = vpop.xlane.xlu0 %2568 }
0x1ffb   :  { %v2570_v2 = vsub.f32 %v2566_v62, %v2569_v1  ;;  %v7543_v1 = vld [vmem:[%s8107_s29 + $0x8] sm:$0xff]  }
0x1ffd   :  { %v2571_v4 = vmul.f32 1.442695, %v2570_v2  ;;  %v7552_v2 = vld [vmem:[%s8107_s29] sm:$0xff]  }
0x1fff   :  { %6713 = vpow2.f32 %v2571_v4 }
0x200c   :  { %v6714_v5 = vpop.eup %6713 }
0x200d   :  { %v2573_v8 = vsel %vm2152_vm1, %v6714_v5, 0.0 }
0x200e   :  { %2574 = vadd.xlane.f32.xlu1 %v2573_v8 }
0x2097   :  { %v2575_v9 = vpop.xlane.xlu1 %2574 }
0x2098   :  { %6715 = vrcp.f32 %v2575_v9 }
0x20a5   :  { %v6716_v11 = vpop.eup %6715 }
0x20a6   :  { %v2577_v13 = vmul.f32 %v6716_v11, %v6714_v5 }
0x20a8   :  { %v2578_v15 = vmul.f32 %v2577_v13, %v7399_v48 }
0x20aa   :  { %v2579_v16 = vpack.c.bf16 %v2578_v15, %v2578_v15 }
0x20ac   :  { %6260 = vmatmul.mubr.msk.bf16.vlgmr.msra.gmra.mxu0 %vm2152_vm1, %v2579_v16 }
0x20ad   :  { %6273 = vmatprep.mubr.msk.bf16.mxu0 %vm6804_vm2, %v6803_v10 }
0x216c   :  { %v2619_v18 = vpop.f32.mrf.mxu0 }
0x216d   :  { %v2620_v6 = vadd.f32 %v2619_v18, %v7449_v34 }
0x216e   :  { %v6261_v20 = vpop.f32.mrf.mxu0 }
0x216f   :  { %v2625_v21 = vpack.c.bf16 %v2620_v6, %v2620_v6 }
0x2170   :  { %v2622_v22 = vpop.f32.mrf.mxu0 }
0x2171   :  { %6268 = vmatmul.mubr.msk.bf16.vlgmr.msra.gmra.mxu1 %vm478_vm3, %v2625_v21  ;;  %v7565_v21 = vld [vmem:[%s8069_s9] sm:$0xf] }
0x2172   :  { %6278 = vmatpush3.bf16.xpose.msra.mxu1 %v2718_v7  ;;  %v6262_v12 = vpop.f32.mrf.mxu0  ;;  %6279 = vmatprep.mubr.msk.bf16.mxu1 %vm6804_vm2, %v6803_v10 }
0x2173   :  { %6289 = vmatprep.subr.bf16.mxu1 %v6803_v10 }
0x2179   :  { %6280 = vmatmul.mubr.msk.bf16.vlgmr.msra.gmra.mxu1 %vm478_vm3, %v2716_v19 }
0x217a   :  { %6290 = vmatpush3.bf16.msra.mxu1 %v7392_v46  ;;  %6293 = vmatprep.mubr.msk.bf16.mxu1 %vm6804_vm2, %v6803_v10 }
0x217b   :  { %6291 = vmatprep.subr.bf16.mxu1 %v6803_v10 }
0x217e   :  { %6292 = vmatpush3.bf16.msra.mxu1 %v7419_v54  ;;  %v2780_v54 = vsel %vm2169_vm0, %v2716_v19, 0  ;;  %v2978_v19 = vsel %vm570_vm4, %v2914_v61, 0 }
0x217f   :  { %6303 = vmatprep.subr.bf16.mxu1 %v6803_v10 }
0x2231   :  { %v2663_v24 = vpop.f32.mrf.mxu1 }
0x2232   :  { %v2664_v25 = vadd.f32 %v7441_v23, %v2663_v24 }
0x2233   :  { %v6269_v26 = vpop.f32.mrf.mxu1 }
0x2234   :  { %v2669_v27 = vmax.f32 %v2664_v25, 0.0 }
0x2235   :  { %v2666_v29 = vpop.f32.mrf.mxu1 }
0x2236   :  { %v2670_v45 = vpack.c.bf16 %v2669_v27, %v2669_v27 }
0x2237   :  { %v6270_v30 = vpop.f32.mrf.mxu1 }
0x2238   :  { %v2672_v31 = vsel %vm2169_vm0, %v2670_v45, 0 }
0x2239   :  { %6272 = vmatpush3.bf16.msra.mxu0 %v2672_v31  ;;  %v2754_v46 = vpop.f32.mrf.mxu1 }
0x223a   :  { %vm2760_vm10 = vcmp.ge.f32.partialorder %v2754_v46, 0.0  ;;  %v2761_v32 = vmul.f32 0.01, %v2754_v46  ;;  %6283 = vmatprep.subr.bf16.mxu0 %v6803_v10 }
0x223b   :  { %v6281_v33 = vpop.f32.mrf.mxu1 }
0x223c   :  { %6274 = vmatmul.mubr.msk.bf16.vlgmr.msra.gmra.mxu0 %vm2152_vm1, %v7457_v36  ;;  %v2762_v34 = vsel %vm2760_vm10, %v2754_v46, %v2761_v32 }
0x223d   :  { %v2757_v35 = vpop.f32.mrf.mxu1  ;;  %6284 = vmatpush3.bf16.msra.mxu0 %v2780_v54  ;;  %v2763_v58 = vadd.f32 %v2762_v34, %v7376_v28  ;;  %6285 = vmatprep.mubr.msk.bf16.mxu0 %vm6804_vm2, %v6803_v10  ;;  %v2513_v28 = vadd.f32 %v7481_v49, %v7483_v52  ;;  %v3066_v54 = vld [vmem:[#allocation2 + $0x24] sm:$0xf] }
0x223e   :  { %6297 = vmatprep.subr.bf16.mxu0 %v6803_v10  ;;  %v7578_v35 = vld [vmem:[%s8070_s10] sm:$0xf] }
0x223f   :  { %v6282_v37 = vpop.f32.mrf.mxu1  ;;  %v2764_v38 = vsel %vm2152_vm1, %v2763_v58, -inf }
0x2240   :  { %2765 = vmax.xlane.f32.xlu0 %v2764_v38  ;;  %v3067_v37 = vpack.c.bf16 %v3066_v54, %v3066_v54 }
0x22c9   :  { %v2766_v39 = vpop.xlane.xlu0 %2765 }
0x22ca   :  { %v2767_v40 = vsub.f32 %v2763_v58, %v2766_v39  ;;  %v3069_v39 = vsel %vm478_vm3, %v3067_v37, 0 }
0x22cc   :  { %v2768_v41 = vmul.f32 1.442695, %v2767_v40 }
0x22ce   :  { %6717 = vpow2.f32 %v2768_v41 }
0x22db   :  { %v6718_v42 = vpop.eup %6717 }
0x22dc   :  { %v2770_v44 = vsel %vm2152_vm1, %v6718_v42, 0.0 }
0x22dd   :  { %2771 = vadd.xlane.f32.xlu1 %v2770_v44 }
0x22fc   :  { %v2708_v47 = vpop.f32.mrf.mxu0 }
0x22fd   :  { %v7523_v3 = vadd.f32 %v2708_v47, %v2513_v28  ;;  %v3131_v47 = vsel %vm570_vm4, %v3067_v37, 0 }
0x22fe   :  { %v6275_v14 = vpop.f32.mrf.mxu0 }
0x2300   :  { %v2711_v50 = vpop.f32.mrf.mxu0 }
0x2302   :  { %v6276_v51 = vpop.f32.mrf.mxu0 }
0x2366   :  { %v2772_v53 = vpop.xlane.xlu1 %2771 }
0x2367   :  { %6719 = vrcp.f32 %v2772_v53 }
0x2374   :  { %v6720_v55 = vpop.eup %6719 }
0x2375   :  { %v2774_v56 = vmul.f32 %v6720_v55, %v6718_v42 }
0x2377   :  { %v2775_v57 = vmul.f32 %v2774_v56, %v7399_v48  ;;  %v2916_v48 = vsel %vm478_vm3, %v2914_v61, 0 }
0x2379   :  { %v2776_v59 = vpack.c.bf16 %v2775_v57, %v2775_v57 }
0x237b   :  { %6286 = vmatmul.mubr.msk.bf16.vlgmr.msra.gmra.mxu0 %vm2152_vm1, %v2776_v59 }
0x237c   :  { %6299 = vmatprep.mubr.msk.bf16.mxu0 %vm6804_vm2, %v6803_v10 }
0x243b   :  { %v2816_v49 = vpop.f32.mrf.mxu0 }
0x243c   :  { %v2817_v52 = vadd.f32 %v2816_v49, %v7492_v17 }
0x243d   :  { %v6287_v43 = vpop.f32.mrf.mxu0 }
0x243e   :  { %v2822_v62 = vpack.c.bf16 %v2817_v52, %v2817_v52 }
0x243f   :  { %v2819_v63 = vpop.f32.mrf.mxu0 }
0x2440   :  { %6294 = vmatmul.mubr.msk.bf16.vlgmr.msra.gmra.mxu1 %vm478_vm3, %v2822_v62 }
0x2441   :  { %6304 = vmatpush3.bf16.xpose.msra.mxu1 %v2916_v48  ;;  %v6288_v0 = vpop.f32.mrf.mxu0  ;;  %6305 = vmatprep.mubr.msk.bf16.mxu1 %vm6804_vm2, %v6803_v10 }
0x2442   :  { %6315 = vmatprep.subr.bf16.mxu1 %v6803_v10 }
0x2448   :  { %6306 = vmatmul.mubr.msk.bf16.vlgmr.msra.gmra.mxu1 %vm478_vm3, %v2914_v61 }
0x2449   :  { %6316 = vmatpush3.bf16.msra.mxu1 %v7543_v1  ;;  %6319 = vmatprep.mubr.msk.bf16.mxu1 %vm6804_vm2, %v6803_v10 }
0x244a   :  { %6317 = vmatprep.subr.bf16.mxu1 %v6803_v10 }
0x244d   :  { %6318 = vmatpush3.bf16.msra.mxu1 %v7552_v2 }
0x244e   :  { %6329 = vmatprep.subr.bf16.mxu1 %v6803_v10 }
0x2500   :  { %v2860_v4 = vpop.f32.mrf.mxu1 }
0x2501   :  { %v2861_v5 = vadd.f32 %v7441_v23, %v2860_v4 }
0x2502   :  { %v6295_v8 = vpop.f32.mrf.mxu1 }
0x2503   :  { %v2866_v9 = vmax.f32 %v2861_v5, 0.0 }
0x2504   :  { %v2863_v11 = vpop.f32.mrf.mxu1 }
0x2505   :  { %v2867_v13 = vpack.c.bf16 %v2866_v9, %v2866_v9 }
0x2506   :  { %v6296_v15 = vpop.f32.mrf.mxu1 }
0x2507   :  { %v2869_v16 = vsel %vm2169_vm0, %v2867_v13, 0  ;;  %v7609_v13 = vld [vmem:[%s8108_s26] ss:$0 sm:$0xff] }
0x2508   :  { %6298 = vmatpush3.bf16.msra.mxu0 %v2869_v16  ;;  %v2952_v17 = vpop.f32.mrf.mxu1 }
0x2509   :  { %vm2958_vm11 = vcmp.ge.f32.partialorder %v2952_v17, 0.0  ;;  %v2959_v18 = vmul.f32 0.01, %v2952_v17  ;;  %6309 = vmatprep.subr.bf16.mxu0 %v6803_v10 }
0x250a   :  { %v6307_v6 = vpop.f32.mrf.mxu1 }
0x250b   :  { %6300 = vmatmul.mubr.msk.bf16.vlgmr.msra.gmra.mxu0 %vm2152_vm1, %v7457_v36  ;;  %v2960_v23 = vsel %vm2958_vm11, %v2952_v17, %v2959_v18 }
0x250c   :  { %v2955_v20 = vpop.f32.mrf.mxu1  ;;  %6310 = vmatpush3.bf16.msra.mxu0 %v2978_v19  ;;  %v2961_v22 = vadd.f32 %v7565_v21, %v2960_v23  ;;  %6311 = vmatprep.mubr.msk.bf16.mxu0 %vm6804_vm2, %v6803_v10 }
0x250d   :  { %6323 = vmatprep.subr.bf16.mxu0 %v6803_v10 }
0x250e   :  { %v6308_v7 = vpop.f32.mrf.mxu1  ;;  %v2962_v36 = vsel %vm552_vm6, %v2961_v22, -inf }
0x250f   :  { %2963 = vmax.xlane.f32.xlu0 %v2962_v36  ;;  %v7616_v36 = vld [vmem:[#allocation2 + $0x28] sm:$0xf] }
0x2598   :  { %v2964_v12 = vpop.xlane.xlu0 %2963 }
0x2599   :  { %v2965_v24 = vsub.f32 %v2961_v22, %v2964_v12  ;;  %v3306_v12 = vpack.c.bf16 %v7616_v36, %v7616_v36 }
0x259b   :  { %v2966_v25 = vmul.f32 1.442695, %v2965_v24  ;;  %v7624_v24 = vld [vmem:[%s8071_s11] sm:$0x3] }
0x259d   :  { %6721 = vpow2.f32 %v2966_v25  ;;  %v3370_v25 = vsel %vm570_vm4, %v3306_v12, 0 }
0x25aa   :  { %v6722_v26 = vpop.eup %6721 }
0x25ab   :  { %v2968_v27 = vsel %vm552_vm6, %v6722_v26, 0.0 }
0x25ac   :  { %2969 = vadd.xlane.f32.xlu1 %v2968_v27 }
0x25cb   :  { %v2905_v29 = vpop.f32.mrf.mxu0 }
0x25cc   :  { %v2911_v45 = vadd.f32 %v2905_v29, %v7523_v3 }
0x25cd   :  { %v6301_v30 = vpop.f32.mrf.mxu0 }
0x25ce   :  { %2912 = vst.msk [vmem:[#allocation4] sm:$0xf] %vm2101_vm5, %v2911_v45 }
0x25cf   :  { %v2908_v31 = vpop.f32.mrf.mxu0 }
0x25d1   :  { %v6302_v46 = vpop.f32.mrf.mxu0 }
0x2635   :  { %v2970_v32 = vpop.xlane.xlu1 %2969 }
0x2636   :  { %6723 = vrcp.f32 %v2970_v32 }
0x2643   :  { %v6724_v33 = vpop.eup %6723 }
0x2644   :  { %v2972_v34 = vmul.f32 %v6724_v33, %v6722_v26  ;;  %v3308_v33 = vsel %vm478_vm3, %v3306_v12, 0 }
0x2646   :  { %v2973_v58 = vmul.f32 %v7578_v35, %v2972_v34 }
0x2648   :  { %v2974_v38 = vpack.c.bf16 %v2973_v58, %v2973_v58 }
0x264a   :  { %6312 = vmatmul.mubr.msk.bf16.vlgmr.msra.gmra.mxu0 %vm566_vm7, %v2974_v38 }
0x264b   :  { %6324 = vmatpush3.bf16.xpose.msra.mxu0 %v3069_v39  ;;  %6325 = vmatprep.mubr.msk.bf16.mxu0 %vm6804_vm2, %v6803_v10 }
0x264c   :  { %6335 = vmatprep.subr.bf16.mxu0 %v6803_v10 }
0x2652   :  { %6326 = vmatmul.mubr.msk.bf16.vlgmr.msra.gmra.mxu0 %vm478_vm3, %v3067_v37 }
0x2653   :  { %6336 = vmatpush3.bf16.msra.mxu0 %v7543_v1  ;;  %6339 = vmatprep.mubr.msk.bf16.mxu0 %vm6804_vm2, %v6803_v10 }
0x2654   :  { %6337 = vmatprep.subr.bf16.mxu0 %v6803_v10 }
0x2657   :  { %6338 = vmatpush3.bf16.msra.mxu0 %v7552_v2 }
0x2658   :  { %6349 = vmatprep.subr.bf16.mxu0 %v6803_v10 }
0x270a   :  { %v3014_v40 = vpop.f32.mrf.mxu0 }
0x270b   :  { %v3015_v41 = vadd.f32 %v3014_v40, %v7529_v60 }
0x270c   :  { %v6313_v42 = vpop.f32.mrf.mxu0 }
0x270d   :  { %v3020_v44 = vpack.c.bf16 %v3015_v41, %v3015_v41 }
0x270e   :  { %v3017_v28 = vpop.f32.mrf.mxu0 }
0x270f   :  { %6320 = vmatmul.mubr.msk.bf16.vlgmr.msra.gmra.mxu1 %vm478_vm3, %v3020_v44 }
0x2710   :  { %6330 = vmatpush3.bf16.msra.mxu1 %v3131_v47  ;;  %v6314_v3 = vpop.f32.mrf.mxu0  ;;  %6331 = vmatprep.mubr.msk.bf16.mxu1 %vm6804_vm2, %v6803_v10 }
0x2711   :  { %6343 = vmatprep.subr.bf16.mxu1 %v6803_v10 }
0x2712   :  { %v3105_v14 = vpop.f32.mrf.mxu0 }
0x2713   :  { %vm3111_vm12 = vcmp.ge.f32.partialorder %v3105_v14, 0.0  ;;  %v3112_v50 = vmul.f32 0.01, %v3105_v14 }
0x2714   :  { %v6327_v51 = vpop.f32.mrf.mxu0 }
0x2715   :  { %v3113_v53 = vsel %vm3111_vm12, %v3105_v14, %v3112_v50  ;;  %vm5289_vm12 = vcmask 130048  }
0x2716   :  { %v3108_v55 = vpop.f32.mrf.mxu0  ;;  %v3114_v56 = vadd.f32 %v7565_v21, %v3113_v53 }
0x2718   :  { %v6328_v57 = vpop.f32.mrf.mxu0  ;;  %v3115_v59 = vsel %vm552_vm6, %v3114_v56, -inf }
0x2719   :  { %3116 = vmax.xlane.f32.xlu0 %v3115_v59 }
0x27a2   :  { %v3117_v60 = vpop.xlane.xlu0 %3116 }
0x27a3   :  { %v3118_v49 = vsub.f32 %v3114_v56, %v3117_v60 }
0x27a5   :  { %v3119_v52 = vmul.f32 1.442695, %v3118_v49 }
0x27a7   :  { %6725 = vpow2.f32 %v3119_v52 }
0x27b4   :  { %v6726_v61 = vpop.eup %6725 }
0x27b5   :  { %v3121_v43 = vsel %vm552_vm6, %v6726_v61, 0.0 }
0x27b6   :  { %3122 = vadd.xlane.f32.xlu1 %v3121_v43 }
0x27cf   :  { %v3058_v62 = vpop.f32.mrf.mxu1 }
0x27d0   :  { %v3059_v15 = vadd.f32 %v7609_v13, %v3058_v62  ;;  %v7659_v62 = vld [vmem:[#allocation2 + $0x2c] sm:$0xf] }
0x27d1   :  { %v6321_v63 = vpop.f32.mrf.mxu1 }
0x27d2   :  { %v3064_v16 = vmax.f32 %v3059_v15, 0.0 }
0x27d3   :  { %v3061_v48 = vpop.f32.mrf.mxu1 }
0x27d4   :  { %v3065_v18 = vpack.c.bf16 %v3064_v16, %v3064_v16 }
0x27d5   :  { %v6322_v0 = vpop.f32.mrf.mxu1 }
0x27d6   :  { %v3263_v22 = vsel %vm570_vm4, %v3065_v18, 0  ;;  %v3503_v0 = vpack.c.bf16 %v7659_v62, %v7659_v62 }
0x283f   :  { %v3123_v4 = vpop.xlane.xlu1 %3122 }
0x2840   :  { %6727 = vrcp.f32 %v3123_v4 }
0x284d   :  { %v6728_v5 = vpop.eup %6727 }
0x284e   :  { %v3125_v8 = vmul.f32 %v6728_v5, %v6726_v61 }
0x2850   :  { %v3126_v9 = vmul.f32 %v7578_v35, %v3125_v8 }
0x2852   :  { %v3127_v11 = vpack.c.bf16 %v3126_v9, %v3126_v9  ;;  %v3505_v9 = vsel %vm478_vm3, %v3503_v0, 0 }
0x2854   :  { %6332 = vmatmul.mubr.msk.bf16.vlgmr.msra.gmra.mxu1 %vm566_vm7, %v3127_v11 }
0x2855   :  { %6345 = vmatprep.mubr.msk.bf16.mxu1 %vm6804_vm2, %v6803_v10 }
0x2914   :  { %v3167_v17 = vpop.f32.mrf.mxu1 }
0x2915   :  { %v3168_v6 = vadd.f32 %v3167_v17, %v3066_v54 }
0x2916   :  { %v6333_v19 = vpop.f32.mrf.mxu1 }
0x2917   :  { %v3173_v23 = vpack.c.bf16 %v3168_v6, %v3168_v6 }
0x2918   :  { %v3170_v20 = vpop.f32.mrf.mxu1 }
0x2919   :  { %6340 = vmatmul.mubr.msk.bf16.vlgmr.msra.gmra.mxu0 %vm478_vm3, %v3173_v23 }
0x291a   :  { %6350 = vmatpush3.bf16.msra.mxu0 %v3263_v22  ;;  %v6334_v7 = vpop.f32.mrf.mxu1  ;;  %6351 = vmatprep.mubr.msk.bf16.mxu0 %vm6804_vm2, %v6803_v10 }
0x291b   :  { %6361 = vmatprep.subr.bf16.mxu0 %v6803_v10 }
0x2921   :  { %6352 = vmatmul.mubr.msk.bf16.vlgmr.msra.gmra.mxu0 %vm566_vm7, %v7624_v24 }
0x2922   :  { %6362 = vmatpush3.bf16.msra.mxu0 %v3370_v25  ;;  %6363 = vmatprep.mubr.msk.bf16.mxu0 %vm6804_vm2, %v6803_v10 }
0x2923   :  { %6375 = vmatprep.subr.bf16.mxu0 %v6803_v10 }
0x29d9   :  { %v3211_v26 = vpop.f32.mrf.mxu0 }
0x29da   :  { %v3212_v27 = vadd.f32 %v7609_v13, %v3211_v26 }
0x29db   :  { %v6341_v29 = vpop.f32.mrf.mxu0 }
0x29dc   :  { %v3217_v45 = vmax.f32 %v3212_v27, 0.0 }
0x29dd   :  { %v3214_v30 = vpop.f32.mrf.mxu0 }
0x29de   :  { %v3218_v31 = vpack.c.bf16 %v3217_v45, %v3217_v45 }
0x29df   :  { %v6342_v46 = vpop.f32.mrf.mxu0 }
0x29e0   :  { %v3220_v32 = vsel %vm570_vm4, %v3218_v31, 0 }
0x29e1   :  { %6344 = vmatpush3.bf16.msra.mxu1 %v3220_v32  ;;  %v7648_v54 = vpop.f32.mrf.mxu0 }
0x29e2   :  { %6355 = vmatprep.subr.bf16.mxu1 %v6803_v10 }
0x29e3   :  { %v6353_v34 = vpop.f32.mrf.mxu0 }
0x29e4   :  { %6346 = vmatmul.mubr.msk.bf16.vlgmr.msra.gmra.mxu1 %vm566_vm7, %v7624_v24 }
0x29e5   :  { %6356 = vmatpush3.bf16.xpose.msra.mxu1 %v3308_v33  ;;  %6357 = vmatprep.mubr.msk.bf16.mxu1 %vm6804_vm2, %v6803_v10  ;;  %v3302_v58 = vpop.f32.mrf.mxu0 }
0x29e6   :  { %6367 = vmatprep.subr.bf16.mxu1 %v6803_v10 }
0x29e7   :  { %v6354_v37 = vpop.f32.mrf.mxu0 }
0x29ec   :  { %6358 = vmatmul.mubr.msk.bf16.vlgmr.msra.gmra.mxu1 %vm478_vm3, %v3306_v12  ;;  %v3567_v12 = vsel %vm570_vm4, %v3503_v0, 0 }
0x29ed   :  { %6368 = vmatpush3.bf16.msra.mxu1 %v7543_v1  ;;  %6371 = vmatprep.mubr.msk.bf16.mxu1 %vm6804_vm2, %v6803_v10 }
0x29ee   :  { %6369 = vmatprep.subr.bf16.mxu1 %v6803_v10 }
0x29f1   :  { %6370 = vmatpush3.bf16.msra.mxu1 %v7552_v2 }
0x29f2   :  { %6381 = vmatprep.subr.bf16.mxu1 %v6803_v10 }
0x2aa4   :  { %v7650_v38 = vpop.f32.mrf.mxu1 }
0x2aa5   :  { %v3300_v34 = vadd.f32 %v7648_v54, %v7650_v38 }
0x2aa6   :  { %v6347_v39 = vpop.f32.mrf.mxu1 }
0x2aa8   :  { %v3259_v40 = vpop.f32.mrf.mxu1 }
0x2aaa   :  { %v6348_v41 = vpop.f32.mrf.mxu1 }
0x2aac   :  { %v3344_v42 = vpop.f32.mrf.mxu1 }
0x2aad   :  { %vm3350_vm13 = vcmp.ge.f32.partialorder %v3344_v42, 0.0  ;;  %v3351_v44 = vmul.f32 0.01, %v3344_v42 }
0x2aae   :  { %v6359_v28 = vpop.f32.mrf.mxu1 }
0x2aaf   :  { %v3352_v47 = vsel %vm3350_vm13, %v3344_v42, %v3351_v44 }
0x2ab0   :  { %v3347_v3 = vpop.f32.mrf.mxu1  ;;  %v3353_v14 = vadd.f32 %v7565_v21, %v3352_v47 }
0x2ab2   :  { %v6360_v50 = vpop.f32.mrf.mxu1  ;;  %v3354_v51 = vsel %vm552_vm6, %v3353_v14, -inf }
0x2ab3   :  { %3355 = vmax.xlane.f32.xlu0 %v3354_v51 }
0x2b3c   :  { %v3356_v53 = vpop.xlane.xlu0 %3355 }
0x2b3d   :  { %v3357_v55 = vsub.f32 %v3353_v14, %v3356_v53  ;;  %v7696_v14 = vld [vmem:[#allocation2 + $0x30] sm:$0xf] }
0x2b3e   :  { %v3700_v50 = vpack.c.bf16 %v7696_v14, %v7696_v14 }
0x2b3f   :  { %v3358_v56 = vmul.f32 1.442695, %v3357_v55 }
0x2b41   :  { %6729 = vpow2.f32 %v3358_v56  ;;  %v3702_v56 = vsel %vm478_vm3, %v3700_v50, 0 }
0x2b4e   :  { %v6730_v57 = vpop.eup %6729 }
0x2b4f   :  { %v3360_v59 = vsel %vm552_vm6, %v6730_v57, 0.0 }
0x2b50   :  { %3361 = vadd.xlane.f32.xlu1 %v3360_v59 }
0x2bd9   :  { %v3362_v60 = vpop.xlane.xlu1 %3361 }
0x2bda   :  { %6731 = vrcp.f32 %v3362_v60 }
0x2be7   :  { %v6732_v49 = vpop.eup %6731 }
0x2be8   :  { %v3364_v52 = vmul.f32 %v6732_v49, %v6730_v57 }
0x2bea   :  { %v3365_v61 = vmul.f32 %v7578_v35, %v3364_v52 }
0x2bec   :  { %v3366_v43 = vpack.c.bf16 %v3365_v61, %v3365_v61 }
0x2bee   :  { %6364 = vmatmul.mubr.msk.bf16.vlgmr.msra.gmra.mxu0 %vm566_vm7, %v3366_v43 }
0x2bef   :  { %6377 = vmatprep.mubr.msk.bf16.mxu0 %vm6804_vm2, %v6803_v10 }
0x2cae   :  { %v3406_v63 = vpop.f32.mrf.mxu0 }
0x2caf   :  { %v3407_v48 = vadd.f32 %v3406_v63, %v7616_v36 }
0x2cb0   :  { %v6365_v4 = vpop.f32.mrf.mxu0 }
0x2cb1   :  { %v3412_v5 = vpack.c.bf16 %v3407_v48, %v3407_v48 }
0x2cb2   :  { %v3409_v8 = vpop.f32.mrf.mxu0 }
0x2cb3   :  { %6372 = vmatmul.mubr.msk.bf16.vlgmr.msra.gmra.mxu1 %vm478_vm3, %v3412_v5  ;;  %v3764_v5 = vsel %vm570_vm4, %v3700_v50, 0 }
0x2cb4   :  { %6382 = vmatpush3.bf16.xpose.msra.mxu1 %v3505_v9  ;;  %v6366_v11 = vpop.f32.mrf.mxu0  ;;  %6383 = vmatprep.mubr.msk.bf16.mxu1 %vm6804_vm2, %v6803_v10 }
0x2cb5   :  { %6393 = vmatprep.subr.bf16.mxu1 %v6803_v10 }
0x2cbb   :  { %6384 = vmatmul.mubr.msk.bf16.vlgmr.msra.gmra.mxu1 %vm478_vm3, %v3503_v0 }
0x2cbc   :  { %6394 = vmatpush3.bf16.msra.mxu1 %v7543_v1  ;;  %6397 = vmatprep.mubr.msk.bf16.mxu1 %vm6804_vm2, %v6803_v10 }
0x2cbd   :  { %6395 = vmatprep.subr.bf16.mxu1 %v6803_v10 }
0x2cc0   :  { %6396 = vmatpush3.bf16.msra.mxu1 %v7552_v2 }
0x2cc1   :  { %6407 = vmatprep.subr.bf16.mxu1 %v6803_v10 }
0x2d73   :  { %v3450_v15 = vpop.f32.mrf.mxu1 }
0x2d74   :  { %v3451_v16 = vadd.f32 %v7609_v13, %v3450_v15 }
0x2d75   :  { %v6373_v17 = vpop.f32.mrf.mxu1 }
0x2d76   :  { %v3456_v18 = vmax.f32 %v3451_v16, 0.0 }
0x2d77   :  { %v3453_v6 = vpop.f32.mrf.mxu1 }
0x2d78   :  { %v3457_v19 = vpack.c.bf16 %v3456_v18, %v3456_v18 }
0x2d79   :  { %v6374_v23 = vpop.f32.mrf.mxu1 }
0x2d7a   :  { %v3459_v20 = vsel %vm570_vm4, %v3457_v19, 0 }
0x2d7b   :  { %6376 = vmatpush3.bf16.msra.mxu0 %v3459_v20  ;;  %v3541_v22 = vpop.f32.mrf.mxu1 }
0x2d7c   :  { %vm3547_vm14 = vcmp.ge.f32.partialorder %v3541_v22, 0.0  ;;  %v3548_v7 = vmul.f32 0.01, %v3541_v22  ;;  %6387 = vmatprep.subr.bf16.mxu0 %v6803_v10 }
0x2d7d   :  { %v6385_v36 = vpop.f32.mrf.mxu1 }
0x2d7e   :  { %6378 = vmatmul.mubr.msk.bf16.vlgmr.msra.gmra.mxu0 %vm566_vm7, %v7624_v24  ;;  %v3549_v25 = vsel %vm3547_vm14, %v3541_v22, %v3548_v7 }
0x2d7f   :  { %v3544_v26 = vpop.f32.mrf.mxu1  ;;  %6388 = vmatpush3.bf16.msra.mxu0 %v3567_v12  ;;  %v3550_v27 = vadd.f32 %v7565_v21, %v3549_v25  ;;  %6389 = vmatprep.mubr.msk.bf16.mxu0 %vm6804_vm2, %v6803_v10 }
0x2d80   :  { %6401 = vmatprep.subr.bf16.mxu0 %v6803_v10 }
0x2d81   :  { %v6386_v29 = vpop.f32.mrf.mxu1  ;;  %v3551_v45 = vsel %vm552_vm6, %v3550_v27, -inf }
0x2d82   :  { %3552 = vmax.xlane.f32.xlu0 %v3551_v45 }
0x2e0b   :  { %v3553_v30 = vpop.xlane.xlu0 %3552 }
0x2e0c   :  { %v3554_v31 = vsub.f32 %v3550_v27, %v3553_v30  ;;  %v7732_v30 = vld [vmem:[#allocation2 + $0x34] sm:$0xf] }
0x2e0e   :  { %v3555_v46 = vmul.f32 1.442695, %v3554_v31 }
0x2e10   :  { %6733 = vpow2.f32 %v3555_v46 }
0x2e1d   :  { %v6734_v32 = vpop.eup %6733 }
0x2e1e   :  { %v3557_v33 = vsel %vm552_vm6, %v6734_v32, 0.0 }
0x2e1f   :  { %3558 = vadd.xlane.f32.xlu1 %v3557_v33 }
0x2e3e   :  { %v3495_v58 = vpop.f32.mrf.mxu0 }
0x2e3f   :  { %v7690_v37 = vadd.f32 %v3495_v58, %v3300_v34 }
0x2e40   :  { %v6379_v39 = vpop.f32.mrf.mxu0 }
0x2e42   :  { %v3498_v40 = vpop.f32.mrf.mxu0 }
0x2e44   :  { %v6380_v41 = vpop.f32.mrf.mxu0 }
0x2ea8   :  { %v3559_v42 = vpop.xlane.xlu1 %3558 }
0x2ea9   :  { %6735 = vrcp.f32 %v3559_v42 }
0x2eb6   :  { %v6736_v44 = vpop.eup %6735 }
0x2eb7   :  { %v3561_v28 = vmul.f32 %v6736_v44, %v6734_v32  ;;  %v3897_v32 = vpack.c.bf16 %v7732_v30, %v7732_v30 }
0x2eb9   :  { %v3562_v47 = vmul.f32 %v7578_v35, %v3561_v28 }
0x2ebb   :  { %v3563_v3 = vpack.c.bf16 %v3562_v47, %v3562_v47 }
0x2ebd   :  { %6390 = vmatmul.mubr.msk.bf16.vlgmr.msra.gmra.mxu0 %vm566_vm7, %v3563_v3 }
0x2ebe   :  { %6403 = vmatprep.mubr.msk.bf16.mxu0 %vm6804_vm2, %v6803_v10 }
0x2f7d   :  { %v3603_v54 = vpop.f32.mrf.mxu0 }
0x2f7e   :  { %v3604_v38 = vadd.f32 %v3603_v54, %v7659_v62 }
0x2f7f   :  { %v6391_v51 = vpop.f32.mrf.mxu0 }
0x2f80   :  { %v3609_v53 = vpack.c.bf16 %v3604_v38, %v3604_v38  ;;  %v3961_v51 = vsel %vm570_vm4, %v3897_v32, 0 }
0x2f81   :  { %v3606_v55 = vpop.f32.mrf.mxu0 }
0x2f82   :  { %6398 = vmatmul.mubr.msk.bf16.vlgmr.msra.gmra.mxu1 %vm478_vm3, %v3609_v53 }
0x2f83   :  { %6408 = vmatpush3.bf16.xpose.msra.mxu1 %v3702_v56  ;;  %v6392_v57 = vpop.f32.mrf.mxu0  ;;  %6409 = vmatprep.mubr.msk.bf16.mxu1 %vm6804_vm2, %v6803_v10 }
0x2f84   :  { %6419 = vmatprep.subr.bf16.mxu1 %v6803_v10 }
0x2f8a   :  { %6410 = vmatmul.mubr.msk.bf16.vlgmr.msra.gmra.mxu1 %vm478_vm3, %v3700_v50 }
0x2f8b   :  { %6420 = vmatpush3.bf16.msra.mxu1 %v7543_v1  ;;  %6423 = vmatprep.mubr.msk.bf16.mxu1 %vm6804_vm2, %v6803_v10 }
0x2f8c   :  { %6421 = vmatprep.subr.bf16.mxu1 %v6803_v10 }
0x2f8f   :  { %6422 = vmatpush3.bf16.msra.mxu1 %v7552_v2 }
0x2f90   :  { %6433 = vmatprep.subr.bf16.mxu1 %v6803_v10 }
0x3042   :  { %v3647_v59 = vpop.f32.mrf.mxu1 }
0x3043   :  { %v3648_v60 = vadd.f32 %v7609_v13, %v3647_v59 }
0x3044   :  { %v6399_v49 = vpop.f32.mrf.mxu1 }
0x3045   :  { %v3653_v52 = vmax.f32 %v3648_v60, 0.0 }
0x3046   :  { %v3650_v61 = vpop.f32.mrf.mxu1 }
0x3047   :  { %v3654_v43 = vpack.c.bf16 %v3653_v52, %v3653_v52 }
0x3048   :  { %v6400_v62 = vpop.f32.mrf.mxu1 }
0x3049   :  { %v3656_v63 = vsel %vm570_vm4, %v3654_v43, 0 }
0x304a   :  { %6402 = vmatpush3.bf16.msra.mxu0 %v3656_v63  ;;  %v3738_v48 = vpop.f32.mrf.mxu1 }
0x304b   :  { %vm3744_vm15 = vcmp.ge.f32.partialorder %v3738_v48, 0.0  ;;  %v3745_v0 = vmul.f32 0.01, %v3738_v48  ;;  %6413 = vmatprep.subr.bf16.mxu0 %v6803_v10 }
0x304c   :  { %v6411_v4 = vpop.f32.mrf.mxu1 }
0x304d   :  { %6404 = vmatmul.mubr.msk.bf16.vlgmr.msra.gmra.mxu0 %vm566_vm7, %v7624_v24  ;;  %v3746_v8 = vsel %vm3744_vm15, %v3738_v48, %v3745_v0 }
0x304e   :  { %v3741_v9 = vpop.f32.mrf.mxu1  ;;  %6414 = vmatpush3.bf16.msra.mxu0 %v3764_v5  ;;  %v3747_v11 = vadd.f32 %v7565_v21, %v3746_v8  ;;  %6415 = vmatprep.mubr.msk.bf16.mxu0 %vm6804_vm2, %v6803_v10 }
0x304f   :  { %6427 = vmatprep.subr.bf16.mxu0 %v6803_v10 }
0x3050   :  { %v6412_v15 = vpop.f32.mrf.mxu1  ;;  %v3748_v16 = vsel %vm552_vm6, %v3747_v11, -inf }
0x3051   :  { %3749 = vmax.xlane.f32.xlu0 %v3748_v16  ;;  %v7768_v16 = vld [vmem:[#allocation2 + $0x38] sm:$0xf] }
0x30da   :  { %v3750_v17 = vpop.xlane.xlu0 %3749 }
0x30db   :  { %v3751_v18 = vsub.f32 %v3747_v11, %v3750_v17 }
0x30dd   :  { %v3752_v6 = vmul.f32 1.442695, %v3751_v18 }
0x30df   :  { %6737 = vpow2.f32 %v3752_v6  ;;  %v4094_v6 = vpack.c.bf16 %v7768_v16, %v7768_v16 }
0x30ec   :  { %v6738_v19 = vpop.eup %6737 }
0x30ed   :  { %v3754_v23 = vsel %vm552_vm6, %v6738_v19, 0.0 }
0x30ee   :  { %3755 = vadd.xlane.f32.xlu1 %v3754_v23 }
0x310d   :  { %v3692_v20 = vpop.f32.mrf.mxu0 }
0x310e   :  { %v7726_v22 = vadd.f32 %v3692_v20, %v7690_v37  ;;  %v3899_v37 = vsel %vm478_vm3, %v3897_v32, 0 }
0x310f   :  { %v6405_v7 = vpop.f32.mrf.mxu0 }
0x3111   :  { %v3695_v36 = vpop.f32.mrf.mxu0 }
0x3113   :  { %v6406_v12 = vpop.f32.mrf.mxu0 }
0x3177   :  { %v3756_v25 = vpop.xlane.xlu1 %3755 }
0x3178   :  { %6739 = vrcp.f32 %v3756_v25 }
0x3185   :  { %v6740_v26 = vpop.eup %6739 }
0x3186   :  { %v3758_v27 = vmul.f32 %v6740_v26, %v6738_v19 }
0x3188   :  { %v3759_v29 = vmul.f32 %v7578_v35, %v3758_v27 }
0x318a   :  { %v3760_v45 = vpack.c.bf16 %v3759_v29, %v3759_v29 }
0x318c   :  { %6416 = vmatmul.mubr.msk.bf16.vlgmr.msra.gmra.mxu0 %vm566_vm7, %v3760_v45 }
0x318d   :  { %6429 = vmatprep.mubr.msk.bf16.mxu0 %vm6804_vm2, %v6803_v10 }
0x324c   :  { %v3800_v31 = vpop.f32.mrf.mxu0 }
0x324d   :  { %v3801_v46 = vadd.f32 %v3800_v31, %v7696_v14 }
0x324e   :  { %v6417_v33 = vpop.f32.mrf.mxu0 }
0x324f   :  { %v3806_v34 = vpack.c.bf16 %v3801_v46, %v3801_v46  ;;  %v4158_v33 = vsel %vm570_vm4, %v4094_v6, 0 }
0x3250   :  { %v3803_v58 = vpop.f32.mrf.mxu0 }
0x3251   :  { %6424 = vmatmul.mubr.msk.bf16.vlgmr.msra.gmra.mxu1 %vm478_vm3, %v3806_v34 }
0x3252   :  { %6434 = vmatpush3.bf16.xpose.msra.mxu1 %v3899_v37  ;;  %v6418_v39 = vpop.f32.mrf.mxu0  ;;  %6435 = vmatprep.mubr.msk.bf16.mxu1 %vm6804_vm2, %v6803_v10 }
0x3253   :  { %6445 = vmatprep.subr.bf16.mxu1 %v6803_v10 }
0x3259   :  { %6436 = vmatmul.mubr.msk.bf16.vlgmr.msra.gmra.mxu1 %vm478_vm3, %v3897_v32 }
0x325a   :  { %6446 = vmatpush3.bf16.msra.mxu1 %v7543_v1  ;;  %6449 = vmatprep.mubr.msk.bf16.mxu1 %vm6804_vm2, %v6803_v10 }
0x325b   :  { %6447 = vmatprep.subr.bf16.mxu1 %v6803_v10 }
0x325e   :  { %6448 = vmatpush3.bf16.msra.mxu1 %v7552_v2 }
0x325f   :  { %6459 = vmatprep.subr.bf16.mxu1 %v6803_v10 }
0x3311   :  { %v3844_v40 = vpop.f32.mrf.mxu1 }
0x3312   :  { %v3845_v41 = vadd.f32 %v7609_v13, %v3844_v40 }
0x3313   :  { %v6425_v42 = vpop.f32.mrf.mxu1 }
0x3314   :  { %v3850_v44 = vmax.f32 %v3845_v41, 0.0 }
0x3315   :  { %v3847_v28 = vpop.f32.mrf.mxu1 }
0x3316   :  { %v3851_v47 = vpack.c.bf16 %v3850_v44, %v3850_v44 }
0x3317   :  { %v6426_v3 = vpop.f32.mrf.mxu1 }
0x3318   :  { %v3853_v14 = vsel %vm570_vm4, %v3851_v47, 0 }
0x3319   :  { %6428 = vmatpush3.bf16.msra.mxu0 %v3853_v14  ;;  %v3935_v54 = vpop.f32.mrf.mxu1 }
0x331a   :  { %vm3941_vm8 = vcmp.ge.f32.partialorder %v3935_v54, 0.0  ;;  %v3942_v38 = vmul.f32 0.01, %v3935_v54  ;;  %6439 = vmatprep.subr.bf16.mxu0 %v6803_v10 }
0x331b   :  { %v6437_v50 = vpop.f32.mrf.mxu1 }
0x331c   :  { %6430 = vmatmul.mubr.msk.bf16.vlgmr.msra.gmra.mxu0 %vm566_vm7, %v7624_v24  ;;  %v3943_v53 = vsel %vm3941_vm8, %v3935_v54, %v3942_v38 }
0x331d   :  { %v3938_v55 = vpop.f32.mrf.mxu1  ;;  %6440 = vmatpush3.bf16.msra.mxu0 %v3961_v51  ;;  %v3944_v56 = vadd.f32 %v7565_v21, %v3943_v53  ;;  %6441 = vmatprep.mubr.msk.bf16.mxu0 %vm6804_vm2, %v6803_v10 }
0x331e   :  { %6453 = vmatprep.subr.bf16.mxu0 %v6803_v10 }
0x331f   :  { %v6438_v57 = vpop.f32.mrf.mxu1  ;;  %v3945_v59 = vsel %vm552_vm6, %v3944_v56, -inf }
0x3320   :  { %3946 = vmax.xlane.f32.xlu0 %v3945_v59  ;;  %v7804_v59 = vld [vmem:[#allocation2 + $0x3c] sm:$0xf] }
0x33a9   :  { %v3947_v60 = vpop.xlane.xlu0 %3946 }
0x33aa   :  { %v3948_v49 = vsub.f32 %v3944_v56, %v3947_v60 }
0x33ac   :  { %v3949_v52 = vmul.f32 1.442695, %v3948_v49 }
0x33ae   :  { %6741 = vpow2.f32 %v3949_v52  ;;  %v4291_v52 = vpack.c.bf16 %v7804_v59, %v7804_v59 }
0x33bb   :  { %v6742_v61 = vpop.eup %6741 }
0x33bc   :  { %v3951_v43 = vsel %vm552_vm6, %v6742_v61, 0.0 }
0x33bd   :  { %3952 = vadd.xlane.f32.xlu1 %v3951_v43 }
0x33dc   :  { %v3889_v62 = vpop.f32.mrf.mxu0 }
0x33dd   :  { %v7762_v63 = vadd.f32 %v3889_v62, %v7726_v22  ;;  %v4096_v22 = vsel %vm478_vm3, %v4094_v6, 0 }
0x33de   :  { %v6431_v48 = vpop.f32.mrf.mxu0 }
0x33e0   :  { %v3892_v0 = vpop.f32.mrf.mxu0 }
0x33e2   :  { %v6432_v4 = vpop.f32.mrf.mxu0 }
0x3446   :  { %v3953_v5 = vpop.xlane.xlu1 %3952 }
0x3447   :  { %6743 = vrcp.f32 %v3953_v5 }
0x3454   :  { %v6744_v8 = vpop.eup %6743 }
0x3455   :  { %v3955_v9 = vmul.f32 %v6744_v8, %v6742_v61 }
0x3457   :  { %v3956_v11 = vmul.f32 %v7578_v35, %v3955_v9 }
0x3459   :  { %v3957_v15 = vpack.c.bf16 %v3956_v11, %v3956_v11 }
0x345b   :  { %6442 = vmatmul.mubr.msk.bf16.vlgmr.msra.gmra.mxu0 %vm566_vm7, %v3957_v15 }
0x345c   :  { %6455 = vmatprep.mubr.msk.bf16.mxu0 %vm6804_vm2, %v6803_v10 }
0x351b   :  { %v3997_v17 = vpop.f32.mrf.mxu0 }
0x351c   :  { %v3998_v18 = vadd.f32 %v3997_v17, %v7732_v30 }
0x351d   :  { %v6443_v19 = vpop.f32.mrf.mxu0 }
0x351e   :  { %v4003_v23 = vpack.c.bf16 %v3998_v18, %v3998_v18 }
0x351f   :  { %v4000_v20 = vpop.f32.mrf.mxu0 }
0x3520   :  { %6450 = vmatmul.mubr.msk.bf16.vlgmr.msra.gmra.mxu1 %vm478_vm3, %v4003_v23 }
0x3521   :  { %6460 = vmatpush3.bf16.xpose.msra.mxu1 %v4096_v22  ;;  %v6444_v7 = vpop.f32.mrf.mxu0  ;;  %6461 = vmatprep.mubr.msk.bf16.mxu1 %vm6804_vm2, %v6803_v10 }
0x3522   :  { %6471 = vmatprep.subr.bf16.mxu1 %v6803_v10 }
0x3528   :  { %6462 = vmatmul.mubr.msk.bf16.vlgmr.msra.gmra.mxu1 %vm478_vm3, %v4094_v6 }
0x3529   :  { %6472 = vmatpush3.bf16.msra.mxu1 %v7543_v1  ;;  %6475 = vmatprep.mubr.msk.bf16.mxu1 %vm6804_vm2, %v6803_v10 }
0x352a   :  { %6473 = vmatprep.subr.bf16.mxu1 %v6803_v10 }
0x352d   :  { %6474 = vmatpush3.bf16.msra.mxu1 %v7552_v2 }
0x352e   :  { %6485 = vmatprep.subr.bf16.mxu1 %v6803_v10 }
0x35e0   :  { %v4041_v36 = vpop.f32.mrf.mxu1 }
0x35e1   :  { %v4042_v12 = vadd.f32 %v7609_v13, %v4041_v36 }
0x35e2   :  { %v6451_v25 = vpop.f32.mrf.mxu1 }
0x35e3   :  { %v4047_v26 = vmax.f32 %v4042_v12, 0.0 }
0x35e4   :  { %v4044_v27 = vpop.f32.mrf.mxu1 }
0x35e5   :  { %v4048_v29 = vpack.c.bf16 %v4047_v26, %v4047_v26 }
0x35e6   :  { %v6452_v45 = vpop.f32.mrf.mxu1 }
0x35e7   :  { %v4050_v30 = vsel %vm570_vm4, %v4048_v29, 0 }
0x35e8   :  { %6454 = vmatpush3.bf16.msra.mxu0 %v4050_v30  ;;  %v4132_v31 = vpop.f32.mrf.mxu1 }
0x35e9   :  { %vm4138_vm9 = vcmp.ge.f32.partialorder %v4132_v31, 0.0  ;;  %v4139_v46 = vmul.f32 0.01, %v4132_v31  ;;  %6465 = vmatprep.subr.bf16.mxu0 %v6803_v10 }
0x35ea   :  { %v6463_v32 = vpop.f32.mrf.mxu1 }
0x35eb   :  { %6456 = vmatmul.mubr.msk.bf16.vlgmr.msra.gmra.mxu0 %vm566_vm7, %v7624_v24  ;;  %v4140_v34 = vsel %vm4138_vm9, %v4132_v31, %v4139_v46 }
0x35ec   :  { %v4135_v58 = vpop.f32.mrf.mxu1  ;;  %6466 = vmatpush3.bf16.msra.mxu0 %v4158_v33  ;;  %v4141_v37 = vadd.f32 %v7565_v21, %v4140_v34  ;;  %6467 = vmatprep.mubr.msk.bf16.mxu0 %vm6804_vm2, %v6803_v10 }
0x35ed   :  { %6479 = vmatprep.subr.bf16.mxu0 %v6803_v10  ;;  %v7840_v58 = vld [vmem:[#allocation2 + $0x20] sm:$0xff] }
0x35ee   :  { %v6464_v39 = vpop.f32.mrf.mxu1  ;;  %v4142_v40 = vsel %vm552_vm6, %v4141_v37, -inf }
0x35ef   :  { %4143 = vmax.xlane.f32.xlu0 %v4142_v40  ;;  %v4489_v40 = vpack.c.bf16 %v7840_v58, %v7840_v58 }
0x3678   :  { %v4144_v41 = vpop.xlane.xlu0 %4143 }
0x3679   :  { %v4145_v42 = vsub.f32 %v4141_v37, %v4144_v41 }
0x367b   :  { %v4146_v44 = vmul.f32 1.442695, %v4145_v42 }
0x367d   :  { %6745 = vpow2.f32 %v4146_v44 }
0x368a   :  { %v6746_v28 = vpop.eup %6745 }
0x368b   :  { %v4148_v47 = vsel %vm552_vm6, %v6746_v28, 0.0 }
0x368c   :  { %4149 = vadd.xlane.f32.xlu1 %v4148_v47  ;;  %v7854_v47 = vld [vmem:[%s8072_s12 + $0x8] sm:$0xff]  }
0x36ab   :  { %v4086_v3 = vpop.f32.mrf.mxu0 }
0x36ac   :  { %v7798_v14 = vadd.f32 %v4086_v3, %v7762_v63  ;;  %v4293_v63 = vsel %vm478_vm3, %v4291_v52, 0  ;;  %v7863_v3 = vld [vmem:[%s8072_s12] sm:$0xff]  }
0x36ad   :  { %v6457_v54 = vpop.f32.mrf.mxu0 }
0x36af   :  { %v4089_v38 = vpop.f32.mrf.mxu0 }
0x36b1   :  { %v6458_v50 = vpop.f32.mrf.mxu0 }
0x3715   :  { %v4150_v51 = vpop.xlane.xlu1 %4149 }
0x3716   :  { %6747 = vrcp.f32 %v4150_v51 }
0x3723   :  { %v6748_v53 = vpop.eup %6747 }
0x3724   :  { %v4152_v55 = vmul.f32 %v6748_v53, %v6746_v28 }
0x3726   :  { %v4153_v56 = vmul.f32 %v7578_v35, %v4152_v55 }
0x3728   :  { %v4154_v57 = vpack.c.bf16 %v4153_v56, %v4153_v56 }
0x372a   :  { %6468 = vmatmul.mubr.msk.bf16.vlgmr.msra.gmra.mxu0 %vm566_vm7, %v4154_v57 }
0x372b   :  { %6481 = vmatprep.mubr.msk.bf16.mxu0 %vm6804_vm2, %v6803_v10 }
0x37ea   :  { %v4194_v60 = vpop.f32.mrf.mxu0 }
0x37eb   :  { %v4195_v49 = vadd.f32 %v4194_v60, %v7768_v16 }
0x37ec   :  { %v6469_v61 = vpop.f32.mrf.mxu0 }
0x37ed   :  { %v4200_v43 = vpack.c.bf16 %v4195_v49, %v4195_v49  ;;  %v4553_v49 = vsel %vm2169_vm0, %v4489_v40, 0  ;;  %v7876_v61 = vld [vmem:[%s8074_s14] sm:$0xff] }
0x37ee   :  { %v4197_v62 = vpop.f32.mrf.mxu0 }
0x37ef   :  { %6476 = vmatmul.mubr.msk.bf16.vlgmr.msra.gmra.mxu1 %vm478_vm3, %v4200_v43 }
0x37f0   :  { %6486 = vmatpush3.bf16.xpose.msra.mxu1 %v4293_v63  ;;  %v6470_v48 = vpop.f32.mrf.mxu0  ;;  %6487 = vmatprep.mubr.msk.bf16.mxu1 %vm6804_vm2, %v6803_v10 }
0x37f1   :  { %6497 = vmatprep.subr.bf16.mxu1 %v6803_v10 }
0x37f7   :  { %6488 = vmatmul.mubr.msk.bf16.vlgmr.msra.gmra.mxu1 %vm478_vm3, %v4291_v52 }
0x37f8   :  { %6498 = vmatpush3.bf16.msra.mxu1 %v7543_v1  ;;  %6501 = vmatprep.mubr.msk.bf16.mxu1 %vm6804_vm2, %v6803_v10 }
0x37f9   :  { %6499 = vmatprep.subr.bf16.mxu1 %v6803_v10 }
0x37fc   :  { %6500 = vmatpush3.bf16.msra.mxu1 %v7552_v2  ;;  %v4355_v2 = vsel %vm570_vm4, %v4291_v52, 0 }
0x37fd   :  { %6511 = vmatprep.subr.bf16.mxu1 %v6803_v10 }
0x38af   :  { %v4238_v0 = vpop.f32.mrf.mxu1 }
0x38b0   :  { %v4239_v4 = vadd.f32 %v7609_v13, %v4238_v0 }
0x38b1   :  { %v6477_v5 = vpop.f32.mrf.mxu1 }
0x38b2   :  { %v4244_v8 = vmax.f32 %v4239_v4, 0.0 }
0x38b3   :  { %v4241_v9 = vpop.f32.mrf.mxu1 }
0x38b4   :  { %v4245_v11 = vpack.c.bf16 %v4244_v8, %v4244_v8 }
0x38b5   :  { %v6478_v15 = vpop.f32.mrf.mxu1 }
0x38b6   :  { %v4247_v16 = vsel %vm570_vm4, %v4245_v11, 0 }
0x38b7   :  { %6480 = vmatpush3.bf16.msra.mxu0 %v4247_v16  ;;  %v4329_v1 = vpop.f32.mrf.mxu1 }
0x38b8   :  { %vm4335_vm10 = vcmp.ge.f32.partialorder %v4329_v1, 0.0  ;;  %v4336_v17 = vmul.f32 0.01, %v4329_v1  ;;  %6491 = vmatprep.subr.bf16.mxu0 %v6803_v10 }
0x38b9   :  { %v6489_v18 = vpop.f32.mrf.mxu1 }
0x38ba   :  { %6482 = vmatmul.mubr.msk.bf16.vlgmr.msra.gmra.mxu0 %vm566_vm7, %v7624_v24  ;;  %v4337_v6 = vsel %vm4335_vm10, %v4329_v1, %v4336_v17  ;;  %v4641_v18 = vld [vmem:[#allocation2 + $0x28] sm:$0xff] }
0x38bb   :  { %v4332_v19 = vpop.f32.mrf.mxu1  ;;  %6492 = vmatpush3.bf16.msra.mxu0 %v4355_v2  ;;  %v4338_v23 = vadd.f32 %v7565_v21, %v4337_v6  ;;  %6493 = vmatprep.mubr.msk.bf16.mxu0 %vm6804_vm2, %v6803_v10  ;;  %v7889_v6 = vld [vmem:[%s8075_s15] sm:$0xff] }
0x38bc   :  { %6505 = vmatprep.subr.bf16.mxu0 %v6803_v10 }
0x38bd   :  { %v6490_v20 = vpop.f32.mrf.mxu1  ;;  %v4339_v22 = vsel %vm552_vm6, %v4338_v23, -inf }
0x38be   :  { %4340 = vmax.xlane.f32.xlu0 %v4339_v22 }
0x3947   :  { %v4341_v7 = vpop.xlane.xlu0 %4340 }
0x3948   :  { %v4342_v36 = vsub.f32 %v4338_v23, %v4341_v7  ;;  %v4642_v23 = vpack.c.bf16 %v4641_v18, %v4641_v18 }
0x394a   :  { %v4343_v12 = vmul.f32 1.442695, %v4342_v36  ;;  %v4644_v22 = vsel %vm478_vm3, %v4642_v23, 0 }
0x394c   :  { %6749 = vpow2.f32 %v4343_v12 }
0x3959   :  { %v6750_v25 = vpop.eup %6749 }
0x395a   :  { %v4345_v26 = vsel %vm552_vm6, %v6750_v25, 0.0 }
0x395b   :  { %4346 = vadd.xlane.f32.xlu1 %v4345_v26 }
0x397a   :  { %v4283_v27 = vpop.f32.mrf.mxu0 }
0x397b   :  { %v7834_v21 = vadd.f32 %v4283_v27, %v7798_v14  ;;  %v4706_v27 = vsel %vm2169_vm0, %v4642_v23, 0 }
0x397c   :  { %v6483_v29 = vpop.f32.mrf.mxu0 }
0x397e   :  { %v4286_v45 = vpop.f32.mrf.mxu0 }
0x3980   :  { %v6484_v30 = vpop.f32.mrf.mxu0 }
0x39e4   :  { %v4347_v31 = vpop.xlane.xlu1 %4346 }
0x39e5   :  { %6751 = vrcp.f32 %v4347_v31 }
0x39f2   :  { %v6752_v46 = vpop.eup %6751 }
0x39f3   :  { %v4349_v32 = vmul.f32 %v6752_v46, %v6750_v25 }
0x39f5   :  { %v4350_v33 = vmul.f32 %v7578_v35, %v4349_v32  ;;  %v4491_v35 = vsel %vm478_vm3, %v4489_v40, 0 }
0x39f7   :  { %v4351_v34 = vpack.c.bf16 %v4350_v33, %v4350_v33 }
0x39f9   :  { %6494 = vmatmul.mubr.msk.bf16.vlgmr.msra.gmra.mxu0 %vm566_vm7, %v4351_v34 }
0x39fa   :  { %6507 = vmatprep.mubr.msk.bf16.mxu0 %vm6804_vm2, %v6803_v10 }
0x3ab9   :  { %v4391_v37 = vpop.f32.mrf.mxu0 }
0x3aba   :  { %v4392_v39 = vadd.f32 %v4391_v37, %v7804_v59 }
0x3abb   :  { %v6495_v41 = vpop.f32.mrf.mxu0 }
0x3abc   :  { %v4397_v42 = vpack.c.bf16 %v4392_v39, %v4392_v39 }
0x3abd   :  { %v4394_v44 = vpop.f32.mrf.mxu0 }
0x3abe   :  { %6502 = vmatmul.mubr.msk.bf16.vlgmr.msra.gmra.mxu1 %vm478_vm3, %v4397_v42 }
0x3abf   :  { %6512 = vmatpush3.bf16.xpose.msra.mxu1 %v4491_v35  ;;  %v6496_v28 = vpop.f32.mrf.mxu0  ;;  %6513 = vmatprep.mubr.msk.bf16.mxu1 %vm6804_vm2, %v6803_v10 }
0x3ac0   :  { %6523 = vmatprep.subr.bf16.mxu1 %v6803_v10 }
0x3ac6   :  { %6514 = vmatmul.mubr.msk.bf16.vlgmr.msra.gmra.mxu1 %vm478_vm3, %v4489_v40 }
0x3ac7   :  { %6524 = vmatpush3.bf16.msra.mxu1 %v7854_v47  ;;  %6527 = vmatprep.mubr.msk.bf16.mxu1 %vm6804_vm2, %v6803_v10 }
0x3ac8   :  { %6525 = vmatprep.subr.bf16.mxu1 %v6803_v10 }
0x3acb   :  { %6526 = vmatpush3.bf16.msra.mxu1 %v7863_v3 }
0x3acc   :  { %6537 = vmatprep.subr.bf16.mxu1 %v6803_v10 }
0x3b7e   :  { %v4435_v14 = vpop.f32.mrf.mxu1 }
0x3b7f   :  { %v4436_v54 = vadd.f32 %v7609_v13, %v4435_v14 }
0x3b80   :  { %v6503_v38 = vpop.f32.mrf.mxu1 }
0x3b81   :  { %v4441_v50 = vmax.f32 %v4436_v54, 0.0 }
0x3b82   :  { %v4438_v51 = vpop.f32.mrf.mxu1 }
0x3b83   :  { %v4442_v53 = vpack.c.bf16 %v4441_v50, %v4441_v50 }
0x3b84   :  { %v6504_v55 = vpop.f32.mrf.mxu1 }
0x3b85   :  { %v4444_v56 = vsel %vm570_vm4, %v4442_v53, 0  ;;  %v7920_v53 = vld [vmem:[%s8073_s13] ss:$0 sm:$0xff] }
0x3b86   :  { %6506 = vmatpush3.bf16.msra.mxu0 %v4444_v56  ;;  %v4527_v57 = vpop.f32.mrf.mxu1 }
0x3b87   :  { %vm4533_vm6 = vcmp.ge.f32.partialorder %v4527_v57, 0.0  ;;  %v4534_v59 = vmul.f32 0.01, %v4527_v57  ;;  %6517 = vmatprep.subr.bf16.mxu0 %v6803_v10 }
0x3b88   :  { %v6515_v60 = vpop.f32.mrf.mxu1 }
0x3b89   :  { %6508 = vmatmul.mubr.msk.bf16.vlgmr.msra.gmra.mxu0 %vm566_vm7, %v7624_v24  ;;  %v4535_v13 = vsel %vm4533_vm6, %v4527_v57, %v4534_v59 }
0x3b8a   :  { %v4530_v52 = vpop.f32.mrf.mxu1  ;;  %6518 = vmatpush3.bf16.msra.mxu0 %v4553_v49  ;;  %v4536_v43 = vadd.f32 %v7876_v61, %v4535_v13  ;;  %6519 = vmatprep.mubr.msk.bf16.mxu0 %vm6804_vm2, %v6803_v10 }
0x3b8b   :  { %6531 = vmatprep.subr.bf16.mxu0 %v6803_v10 }
0x3b8c   :  { %v6516_v62 = vpop.f32.mrf.mxu1  ;;  %v4537_v24 = vsel %vm2152_vm1, %v4536_v43, -inf }
0x3b8d   :  { %4538 = vmax.xlane.f32.xlu0 %v4537_v24  ;;  %v7927_v24 = vld [vmem:[#allocation2 + $0x30] sm:$0xff] }
0x3c16   :  { %v4539_v63 = vpop.xlane.xlu0 %4538 }
0x3c17   :  { %v4540_v48 = vsub.f32 %v4536_v43, %v4539_v63  ;;  %v4881_v63 = vpack.c.bf16 %v7927_v24, %v7927_v24 }
0x3c19   :  { %v4541_v0 = vmul.f32 1.442695, %v4540_v48  ;;  %v7935_v48 = vld [vmem:[%s8076_s16] sm:$0x3] }
0x3c1b   :  { %6753 = vpow2.f32 %v4541_v0  ;;  %v4945_v0 = vsel %vm2169_vm0, %v4881_v63, 0 }
0x3c28   :  { %v6754_v4 = vpop.eup %6753 }
0x3c29   :  { %v4543_v5 = vsel %vm2152_vm1, %v6754_v4, 0.0 }
0x3c2a   :  { %4544 = vadd.xlane.f32.xlu1 %v4543_v5 }
0x3c49   :  { %v4480_v8 = vpop.f32.mrf.mxu0 }
0x3c4a   :  { %v4486_v9 = vadd.f32 %v4480_v8, %v7834_v21 }
0x3c4b   :  { %v6509_v11 = vpop.f32.mrf.mxu0 }
0x3c4c   :  { %4487 = vst.msk [vmem:[#allocation3 + $0x4] sm:$0xf] %vm2101_vm5, %v4486_v9 }
0x3c4d   :  { %v4483_v15 = vpop.f32.mrf.mxu0 }
0x3c4f   :  { %v6510_v16 = vpop.f32.mrf.mxu0 }
0x3cb3   :  { %v4545_v1 = vpop.xlane.xlu1 %4544 }
0x3cb4   :  { %6755 = vrcp.f32 %v4545_v1 }
0x3cc1   :  { %v6756_v17 = vpop.eup %6755 }
0x3cc2   :  { %v4547_v2 = vmul.f32 %v6756_v17, %v6754_v4  ;;  %v4883_v17 = vsel %vm478_vm3, %v4881_v63, 0 }
0x3cc4   :  { %v4548_v19 = vmul.f32 %v7889_v6, %v4547_v2 }
0x3cc6   :  { %v4549_v20 = vpack.c.bf16 %v4548_v19, %v4548_v19 }
0x3cc8   :  { %6520 = vmatmul.mubr.msk.bf16.vlgmr.msra.gmra.mxu0 %vm2152_vm1, %v4549_v20 }
0x3cc9   :  { %6532 = vmatpush3.bf16.xpose.msra.mxu0 %v4644_v22  ;;  %6533 = vmatprep.mubr.msk.bf16.mxu0 %vm6804_vm2, %v6803_v10 }
0x3cca   :  { %6543 = vmatprep.subr.bf16.mxu0 %v6803_v10 }
0x3cd0   :  { %6534 = vmatmul.mubr.msk.bf16.vlgmr.msra.gmra.mxu0 %vm478_vm3, %v4642_v23 }
0x3cd1   :  { %6544 = vmatpush3.bf16.msra.mxu0 %v7854_v47  ;;  %6547 = vmatprep.mubr.msk.bf16.mxu0 %vm6804_vm2, %v6803_v10 }
0x3cd2   :  { %6545 = vmatprep.subr.bf16.mxu0 %v6803_v10 }
0x3cd5   :  { %6546 = vmatpush3.bf16.msra.mxu0 %v7863_v3 }
0x3cd6   :  { %6557 = vmatprep.subr.bf16.mxu0 %v6803_v10 }
0x3d88   :  { %v4589_v7 = vpop.f32.mrf.mxu0 }
0x3d89   :  { %v4590_v36 = vadd.f32 %v4589_v7, %v7840_v58 }
0x3d8a   :  { %v6521_v12 = vpop.f32.mrf.mxu0 }
0x3d8b   :  { %v4595_v25 = vpack.c.bf16 %v4590_v36, %v4590_v36 }
0x3d8c   :  { %v4592_v26 = vpop.f32.mrf.mxu0 }
0x3d8d   :  { %6528 = vmatmul.mubr.msk.bf16.vlgmr.msra.gmra.mxu1 %vm478_vm3, %v4595_v25 }
0x3d8e   :  { %6538 = vmatpush3.bf16.msra.mxu1 %v4706_v27  ;;  %v6522_v21 = vpop.f32.mrf.mxu0  ;;  %6539 = vmatprep.mubr.msk.bf16.mxu1 %vm6804_vm2, %v6803_v10 }
0x3d8f   :  { %6551 = vmatprep.subr.bf16.mxu1 %v6803_v10 }
0x3d90   :  { %v4680_v29 = vpop.f32.mrf.mxu0 }
0x3d91   :  { %vm4686_vm4 = vcmp.ge.f32.partialorder %v4680_v29, 0.0  ;;  %v4687_v45 = vmul.f32 0.01, %v4680_v29 }
0x3d92   :  { %v6535_v30 = vpop.f32.mrf.mxu0 }
0x3d93   :  { %v4688_v31 = vsel %vm4686_vm4, %v4680_v29, %v4687_v45 }
0x3d94   :  { %v4683_v46 = vpop.f32.mrf.mxu0  ;;  %v4689_v32 = vadd.f32 %v7876_v61, %v4688_v31 }
0x3d96   :  { %v6536_v33 = vpop.f32.mrf.mxu0  ;;  %v4690_v34 = vsel %vm2152_vm1, %v4689_v32, -inf }
0x3d97   :  { %4691 = vmax.xlane.f32.xlu0 %v4690_v34 }
0x3e20   :  { %v4692_v58 = vpop.xlane.xlu0 %4691 }
0x3e21   :  { %v4693_v37 = vsub.f32 %v4689_v32, %v4692_v58 }
0x3e23   :  { %v4694_v39 = vmul.f32 1.442695, %v4693_v37 }
0x3e25   :  { %6757 = vpow2.f32 %v4694_v39 }
0x3e32   :  { %v6758_v40 = vpop.eup %6757 }
0x3e33   :  { %v4696_v41 = vsel %vm2152_vm1, %v6758_v40, 0.0 }
0x3e34   :  { %4697 = vadd.xlane.f32.xlu1 %v4696_v41 }
0x3e4d   :  { %v4633_v42 = vpop.f32.mrf.mxu1 }
0x3e4e   :  { %v4634_v55 = vadd.f32 %v7920_v53, %v4633_v42  ;;  %v7970_v42 = vld [vmem:[#allocation2 + $0x38] sm:$0xff] }
0x3e4f   :  { %v6529_v44 = vpop.f32.mrf.mxu1 }
0x3e50   :  { %v4639_v56 = vmax.f32 %v4634_v55, 0.0 }
0x3e51   :  { %v4636_v35 = vpop.f32.mrf.mxu1 }
0x3e52   :  { %v4640_v59 = vpack.c.bf16 %v4639_v56, %v4639_v56 }
0x3e53   :  { %v6530_v28 = vpop.f32.mrf.mxu1 }
0x3e54   :  { %v4838_v43 = vsel %vm2169_vm0, %v4640_v59, 0  ;;  %v5078_v28 = vpack.c.bf16 %v7970_v42, %v7970_v42 }
0x3ebd   :  { %v4698_v14 = vpop.xlane.xlu1 %4697 }
0x3ebe   :  { %6759 = vrcp.f32 %v4698_v14 }
0x3ecb   :  { %v6760_v54 = vpop.eup %6759 }
0x3ecc   :  { %v4700_v38 = vmul.f32 %v6760_v54, %v6758_v40 }
0x3ece   :  { %v4701_v50 = vmul.f32 %v7889_v6, %v4700_v38 }
0x3ed0   :  { %v4702_v51 = vpack.c.bf16 %v4701_v50, %v4701_v50  ;;  %v5080_v50 = vsel %vm478_vm3, %v5078_v28, 0 }
0x3ed2   :  { %6540 = vmatmul.mubr.msk.bf16.vlgmr.msra.gmra.mxu1 %vm2152_vm1, %v4702_v51 }
0x3ed3   :  { %6553 = vmatprep.mubr.msk.bf16.mxu1 %vm6804_vm2, %v6803_v10 }
0x3f92   :  { %v4742_v57 = vpop.f32.mrf.mxu1 }
0x3f93   :  { %v4743_v60 = vadd.f32 %v4742_v57, %v4641_v18 }
0x3f94   :  { %v6541_v49 = vpop.f32.mrf.mxu1 }
0x3f95   :  { %v4748_v13 = vpack.c.bf16 %v4743_v60, %v4743_v60 }
0x3f96   :  { %v4745_v52 = vpop.f32.mrf.mxu1 }
0x3f97   :  { %6548 = vmatmul.mubr.msk.bf16.vlgmr.msra.gmra.mxu0 %vm478_vm3, %v4748_v13 }
0x3f98   :  { %6558 = vmatpush3.bf16.msra.mxu0 %v4838_v43  ;;  %v6542_v62 = vpop.f32.mrf.mxu1  ;;  %6559 = vmatprep.mubr.msk.bf16.mxu0 %vm6804_vm2, %v6803_v10 }
0x3f99   :  { %6569 = vmatprep.subr.bf16.mxu0 %v6803_v10 }
0x3f9f   :  { %6560 = vmatmul.mubr.msk.bf16.vlgmr.msra.gmra.mxu0 %vm2152_vm1, %v7935_v48 }
0x3fa0   :  { %6570 = vmatpush3.bf16.msra.mxu0 %v4945_v0  ;;  %6571 = vmatprep.mubr.msk.bf16.mxu0 %vm6804_vm2, %v6803_v10 }
0x3fa1   :  { %6583 = vmatprep.subr.bf16.mxu0 %v6803_v10 }
0x4057   :  { %v4786_v4 = vpop.f32.mrf.mxu0 }
0x4058   :  { %v4787_v5 = vadd.f32 %v7920_v53, %v4786_v4 }
0x4059   :  { %v6549_v8 = vpop.f32.mrf.mxu0 }
0x405a   :  { %v4792_v9 = vmax.f32 %v4787_v5, 0.0 }
0x405b   :  { %v4789_v11 = vpop.f32.mrf.mxu0 }
0x405c   :  { %v4793_v15 = vpack.c.bf16 %v4792_v9, %v4792_v9 }
0x405d   :  { %v6550_v16 = vpop.f32.mrf.mxu0 }
0x405e   :  { %v4795_v1 = vsel %vm2169_vm0, %v4793_v15, 0 }
0x405f   :  { %6552 = vmatpush3.bf16.msra.mxu1 %v4795_v1  ;;  %v7959_v18 = vpop.f32.mrf.mxu0 }
0x4060   :  { %6563 = vmatprep.subr.bf16.mxu1 %v6803_v10 }
0x4061   :  { %v6561_v2 = vpop.f32.mrf.mxu0 }
0x4062   :  { %6554 = vmatmul.mubr.msk.bf16.vlgmr.msra.gmra.mxu1 %vm2152_vm1, %v7935_v48 }
0x4063   :  { %6564 = vmatpush3.bf16.xpose.msra.mxu1 %v4883_v17  ;;  %6565 = vmatprep.mubr.msk.bf16.mxu1 %vm6804_vm2, %v6803_v10  ;;  %v4877_v19 = vpop.f32.mrf.mxu0 }
0x4064   :  { %6575 = vmatprep.subr.bf16.mxu1 %v6803_v10 }
0x4065   :  { %v6562_v23 = vpop.f32.mrf.mxu0 }
0x406a   :  { %6566 = vmatmul.mubr.msk.bf16.vlgmr.msra.gmra.mxu1 %vm478_vm3, %v4881_v63 }
0x406b   :  { %6576 = vmatpush3.bf16.msra.mxu1 %v7854_v47  ;;  %6579 = vmatprep.mubr.msk.bf16.mxu1 %vm6804_vm2, %v6803_v10 }
0x406c   :  { %6577 = vmatprep.subr.bf16.mxu1 %v6803_v10 }
0x406f   :  { %6578 = vmatpush3.bf16.msra.mxu1 %v7863_v3 }
0x4070   :  { %6589 = vmatprep.subr.bf16.mxu1 %v6803_v10 }
0x4122   :  { %v7961_v20 = vpop.f32.mrf.mxu1 }
0x4124   :  { %v6555_v22 = vpop.f32.mrf.mxu1 }
0x4126   :  { %v4834_v7 = vpop.f32.mrf.mxu1 }
0x4128   :  { %v6556_v36 = vpop.f32.mrf.mxu1 }
0x412a   :  { %v4919_v12 = vpop.f32.mrf.mxu1 }
0x412b   :  { %vm4925_vm7 = vcmp.ge.f32.partialorder %v4919_v12, 0.0  ;;  %v4926_v25 = vmul.f32 0.01, %v4919_v12 }
0x412c   :  { %v6567_v26 = vpop.f32.mrf.mxu1 }
0x412d   :  { %v4927_v27 = vsel %vm4925_vm7, %v4919_v12, %v4926_v25 }
0x412e   :  { %v4922_v21 = vpop.f32.mrf.mxu1  ;;  %v4928_v29 = vadd.f32 %v7876_v61, %v4927_v27 }
0x4130   :  { %v6568_v45 = vpop.f32.mrf.mxu1  ;;  %v4929_v30 = vsel %vm2152_vm1, %v4928_v29, -inf }
0x4131   :  { %4930 = vmax.xlane.f32.xlu0 %v4929_v30 }
0x41ba   :  { %v4931_v31 = vpop.xlane.xlu0 %4930 }
0x41bb   :  { %v4932_v46 = vsub.f32 %v4928_v29, %v4931_v31 }
0x41bd   :  { %v4933_v32 = vmul.f32 1.442695, %v4932_v46 }
0x41bf   :  { %6761 = vpow2.f32 %v4933_v32 }
0x41cc   :  { %v6762_v33 = vpop.eup %6761 }
0x41cd   :  { %v4935_v34 = vsel %vm2152_vm1, %v6762_v33, 0.0 }
0x41ce   :  { %4936 = vadd.xlane.f32.xlu1 %v4935_v34 }
0x4257   :  { %v4937_v58 = vpop.xlane.xlu1 %4936 }
0x4258   :  { %6763 = vrcp.f32 %v4937_v58  ;;  %v6667_v58 = vld [vmem:[%s8077_s17] sm:$0xff]  }
0x4265   :  { %v6764_v37 = vpop.eup %6763 }
0x4266   :  { %v4939_v39 = vmul.f32 %v6764_v37, %v6762_v33 }
0x4268   :  { %v4940_v40 = vmul.f32 %v7889_v6, %v4939_v39  ;;  %v6668_v39 = vld [vmem:[%s8078_s18] sm:$0xff]  }
0x426a   :  { %v4941_v41 = vpack.c.bf16 %v4940_v40, %v4940_v40 }
0x426c   :  { %6572 = vmatmul.mubr.msk.bf16.vlgmr.msra.gmra.mxu0 %vm2152_vm1, %v4941_v41 }
0x426d   :  { %6585 = vmatprep.mubr.msk.bf16.mxu0 %vm6804_vm2, %v6803_v10 }
0x432c   :  { %v4981_v44 = vpop.f32.mrf.mxu0 }
0x432d   :  { %v4982_v35 = vadd.f32 %v4981_v44, %v7927_v24 }
0x432e   :  { %v6573_v14 = vpop.f32.mrf.mxu0 }
0x432f   :  { %v4987_v54 = vpack.c.bf16 %v4982_v35, %v4982_v35 }
0x4330   :  { %v4984_v38 = vpop.f32.mrf.mxu0 }
0x4331   :  { %6580 = vmatmul.mubr.msk.bf16.vlgmr.msra.gmra.mxu1 %vm478_vm3, %v4987_v54 }
0x4332   :  { %6590 = vmatpush3.bf16.xpose.msra.mxu1 %v5080_v50  ;;  %v6574_v51 = vpop.f32.mrf.mxu0  ;;  %6591 = vmatprep.mubr.msk.bf16.mxu1 %vm6804_vm2, %v6803_v10 }
0x4333   :  { %6601 = vmatprep.subr.bf16.mxu1 %v6803_v10  ;;  %v6669_v51 = vld [vmem:[%s8080_s20 + $0x8] sm:$0xff]  }
0x4339   :  { %6592 = vmatmul.mubr.msk.bf16.vlgmr.msra.gmra.mxu1 %vm478_vm3, %v5078_v28 }
0x433a   :  { %6602 = vmatpush3.bf16.msra.mxu1 %v7854_v47  ;;  %6605 = vmatprep.mubr.msk.bf16.mxu1 %vm6804_vm2, %v6803_v10 }
0x433b   :  { %6603 = vmatprep.subr.bf16.mxu1 %v6803_v10 }
0x433e   :  { %6604 = vmatpush3.bf16.msra.mxu1 %v7863_v3  ;;  %v5142_v3 = vsel %vm2169_vm0, %v5078_v28, 0 }
0x433f   :  { %6615 = vmatprep.subr.bf16.mxu1 %v6803_v10 }
0x43f1   :  { %v5025_v55 = vpop.f32.mrf.mxu1 }
0x43f2   :  { %v5026_v56 = vadd.f32 %v7920_v53, %v5025_v55  ;;  %v6670_v55 = vld [vmem:[%s8080_s20] sm:$0xff]  }
0x43f3   :  { %v6581_v57 = vpop.f32.mrf.mxu1 }
0x43f4   :  { %v5031_v59 = vmax.f32 %v5026_v56, 0.0  ;;  %v5669_v57 = vld [vmem:[%s8079_s19] ss:$0 sm:$0xff] }
0x43f5   :  { %v5028_v60 = vpop.f32.mrf.mxu1 }
0x43f6   :  { %v5032_v49 = vpack.c.bf16 %v5031_v59, %v5031_v59 }
0x43f7   :  { %v6582_v13 = vpop.f32.mrf.mxu1 }
0x43f8   :  { %v5034_v52 = vsel %vm2169_vm0, %v5032_v49, 0 }
0x43f9   :  { %6584 = vmatpush3.bf16.msra.mxu0 %v5034_v52  ;;  %v5116_v47 = vpop.f32.mrf.mxu1 }
0x43fa   :  { %vm5122_vm11 = vcmp.ge.f32.partialorder %v5116_v47, 0.0  ;;  %v5123_v43 = vmul.f32 0.01, %v5116_v47  ;;  %6595 = vmatprep.subr.bf16.mxu0 %v6803_v10 }
0x43fb   :  { %v6593_v62 = vpop.f32.mrf.mxu1 }
0x43fc   :  { %6586 = vmatmul.mubr.msk.bf16.vlgmr.msra.gmra.mxu0 %vm2152_vm1, %v7935_v48  ;;  %v5124_v24 = vsel %vm5122_vm11, %v5116_v47, %v5123_v43  ;;  %v6671_v62 = vld [vmem:[%s8082_s22 + $0x8] sm:$0xff]  }
0x43fd   :  { %v5119_v63 = vpop.f32.mrf.mxu1  ;;  %6596 = vmatpush3.bf16.msra.mxu0 %v5142_v3  ;;  %v5125_v0 = vadd.f32 %v7876_v61, %v5124_v24  ;;  %6597 = vmatprep.mubr.msk.bf16.mxu0 %vm6804_vm2, %v6803_v10  ;;  %v4875_v61 = vadd.f32 %v7959_v18, %v7961_v20  ;;  %v6672_v3 = vld [vmem:[%s8082_s22] sm:$0xff]   ;;  %s6805_s22 = smov [#allocation5]  }
0x43fe   :  { %6609 = vmatprep.subr.bf16.mxu0 %v6803_v10  ;;  %v5670_v24 = vld [vmem:[%s8081_s21] ss:$0 sm:$0xff]  ;;  %s5533_s5 = sshll.u32 %s6805_s22, 4  ;;  %s5534_s5 = int_to_ptr.vmem [resolvable:$true] %s5533_s5 }
0x43ff   :  { %v6594_v4 = vpop.f32.mrf.mxu1  ;;  %v5126_v5 = vsel %vm2152_vm1, %v5125_v0, -inf  ;;  %s6781_s21 = scalar_lea.vmem %s5534_s5, 128  ;;  %p6786_p1 = scmp.lt.s32.totalorder %s5534_s5, %s5534_s5 }
0x4400   :  { %5127 = vmax.xlane.f32.xlu0 %v5126_v5  ;;  %p6782_p0 = scmp.ne.s32.totalorder %s5534_s5, %s6781_s21  ;;  %p6787_p2 = scmp.lt.s32.totalorder %s6781_s21, %s6781_s21 }
0x4402   :  { %p6788_p3 = por %p6787_p2, %p6786_p1 }
0x4404   :  { %p6789_p4 = pnand %p6788_p3, %p6782_p0 }
0x4489   :  { %v5128_v8 = vpop.xlane.xlu0 %5127 }
0x448a   :  { %v5129_v9 = vsub.f32 %v5125_v0, %v5128_v8 }
0x448c   :  { %v5130_v11 = vmul.f32 1.442695, %v5129_v9 }
0x448e   :  { %6765 = vpow2.f32 %v5130_v11 }
0x449b   :  { %v6766_v15 = vpop.eup %6765 }
0x449c   :  { %v5132_v16 = vsel %vm2152_vm1, %v6766_v15, 0.0 }
0x449d   :  { %5133 = vadd.xlane.f32.xlu1 %v5132_v16 }
0x44bc   :  { %v5070_v1 = vpop.f32.mrf.mxu0 }
0x44bd   :  { %v5076_v17 = vadd.f32 %v5070_v1, %v4875_v61 }
0x44be   :  { %v6587_v2 = vpop.f32.mrf.mxu0 }
0x44c0   :  { %v5073_v19 = vpop.f32.mrf.mxu0 }
0x44c2   :  { %v6588_v23 = vpop.f32.mrf.mxu0 }
0x4526   :  { %v5134_v22 = vpop.xlane.xlu1 %5133 }
0x4527   :  { %6767 = vrcp.f32 %v5134_v22 }
0x4534   :  { %v6768_v7 = vpop.eup %6767 }
0x4535   :  { %v5136_v36 = vmul.f32 %v6768_v7, %v6766_v15  ;;  %v5674_v15 = vld [vmem:[%s8083_s23] ss:$0 sm:$0xff] }
0x4537   :  { %v5137_v12 = vmul.f32 %v7889_v6, %v5136_v36 }
0x4539   :  { %v5138_v25 = vpack.c.bf16 %v5137_v12, %v5137_v12 }
0x453b   :  { %6598 = vmatmul.mubr.msk.bf16.vlgmr.msra.gmra.mxu0 %vm2152_vm1, %v5138_v25 }
0x453c   :  { %6611 = vmatprep.mubr.msk.bf16.mxu0 %vm6804_vm2, %v6803_v10 }
0x45fb   :  { %v5178_v26 = vpop.f32.mrf.mxu0 }
0x45fc   :  { %v5179_v18 = vadd.f32 %v5178_v26, %v7970_v42 }
0x45fd   :  { %v6599_v20 = vpop.f32.mrf.mxu0 }
0x45fe   :  { %v5184_v27 = vpack.c.bf16 %v5179_v18, %v5179_v18 }
0x45ff   :  { %v5181_v21 = vpop.f32.mrf.mxu0 }
0x4600   :  { %6606 = vmatmul.mubr.msk.bf16.vlgmr.msra.gmra.mxu1 %vm478_vm3, %v5184_v27 }
0x4601   :  { %v6600_v29 = vpop.f32.mrf.mxu0  ;;  %6617 = vmatprep.mubr.msk.bf16.mxu1 %vm6804_vm2, %v6803_v10  ;;  %6616 = vmatpush3.bf16.msra.mxu1 %v6668_v39 }
0x4602   :  { %6627 = vmatprep.subr.bf16.mxu1 %v6803_v10 }
0x46c0   :  { %v5222_v45 = vpop.f32.mrf.mxu1 }
0x46c1   :  { %v5223_v6 = vadd.f32 %v7920_v53, %v5222_v45  ;;  %v5275_v53 = vld [vmem:[#allocation3] sm:$0xff] }
0x46c2   :  { %v6607_v30 = vpop.f32.mrf.mxu1  ;;  %v5276_v37 = vpack.c.bf16 %v5275_v53, %v5275_v53 }
0x46c3   :  { %v5228_v31 = vmax.f32 %v5223_v6, 0.0 }
0x46c4   :  { %v5225_v46 = vpop.f32.mrf.mxu1 }
0x46c5   :  { %v5229_v32 = vpack.c.bf16 %v5228_v31, %v5228_v31 }
0x46c6   :  { %v6608_v33 = vpop.f32.mrf.mxu1 }
0x46c7   :  { %v5231_v34 = vsel %vm2169_vm0, %v5229_v32, 0 }
0x46c8   :  { %6610 = vmatpush3.bf16.msra.mxu0 %v5231_v34 }
0x46c9   :  { %6621 = vmatprep.subr.bf16.mxu0 %v6803_v10 }
0x46cb   :  { %6612 = vmatmul.mubr.msk.bf16.vlgmr.msra.gmra.mxu0 %vm2152_vm1, %v7935_v48 }
0x46cc   :  { %6622 = vmatpush3.bf16.msra.mxu0 %v6667_v58  ;;  %6623 = vmatprep.mubr.msk.bf16.mxu0 %vm6804_vm2, %v6803_v10 }
0x46cd   :  { %6635 = vmatprep.subr.bf16.mxu0 %v6803_v10 }
0x46d3   :  { %6624 = vmatmul.mubr.msk.bf16.vlgmr.msra.gmra.mxu0 %vm5289_vm12, %v5276_v37 }
0x46d4   :  { %6639 = vmatprep.mubr.msk.bf16.mxu0 %vm6804_vm2, %v6803_v10  ;;  %6636 = vmatpush3.bf16.msra.mxu0 %v6671_v62 }
0x46d5   :  { %6637 = vmatprep.subr.bf16.mxu0 %v6803_v10 }
0x46d8   :  { %6638 = vmatpush3.bf16.msra.mxu0 %v6672_v3 }
0x478b   :  { %v5267_v48 = vpop.f32.mrf.mxu0 }
0x478c   :  { %v5273_v40 = vadd.f32 %v5267_v48, %v5076_v17 }
0x478d   :  { %v6613_v41 = vpop.f32.mrf.mxu0 }
0x478e   :  { %5274 = vst.msk [vmem:[#allocation4 + $0x4] sm:$0xf] %vm2101_vm5, %v5273_v40 }
0x478f   :  { %v5270_v42 = vpop.f32.mrf.mxu0 }
0x4791   :  { %v6614_v44 = vpop.f32.mrf.mxu0 }
0x4793   :  { %v5376_v35 = vpop.f32.mrf.mxu0 }
0x4795   :  { %v6625_v28 = vpop.f32.mrf.mxu0  ;;  %v5279_v14 = vld [vmem:[#allocation4] sm:$0xff] }
0x4796   :  { %v5280_v54 = vpack.c.bf16 %v5279_v14, %v5279_v14 }
0x4797   :  { %v5379_v38 = vpop.f32.mrf.mxu0 }
0x4798   :  { %6618 = vmatmul.mubr.msk.bf16.vlgmr.msra.gmra.mxu1 %vm5289_vm12, %v5280_v54 }
0x4799   :  { %v6626_v50 = vpop.f32.mrf.mxu0  ;;  %6631 = vmatprep.mubr.msk.bf16.mxu1 %vm6804_vm2, %v6803_v10  ;;  %6628 = vmatpush3.bf16.msra.mxu1 %v6669_v51 }
0x479a   :  { %6629 = vmatprep.subr.bf16.mxu1 %v6803_v10 }
0x479d   :  { %6630 = vmatpush3.bf16.msra.mxu1 %v6670_v55 }
0x4858   :  { %v5327_v56 = vpop.f32.mrf.mxu1 }
0x4859   :  { %v5377_v59 = vadd.f32 %v5376_v35, %v5327_v56 }
0x485a   :  { %v6619_v60 = vpop.f32.mrf.mxu1 }
0x485b   :  { %v5389_v49 = vadd.f32 %v5669_v57, %v5377_v59 }
0x485c   :  { %v5330_v13 = vpop.f32.mrf.mxu1 }
0x485d   :  { %v5390_v52 = vmax.f32 %v5389_v49, 0.0 }
0x485e   :  { %v6620_v47 = vpop.f32.mrf.mxu1 }
0x485f   :  { %v5391_v43 = vpack.c.bf16 %v5390_v52, %v5390_v52 }
0x4861   :  { %6632 = vmatmul.mubr.msk.bf16.vlgmr.msra.gmra.mxu1 %vm478_vm3, %v5391_v43 }
0x4921   :  { %v5452_v63 = vpop.f32.mrf.mxu1 }
0x4922   :  { %v5453_v0 = vadd.f32 %v5670_v24, %v5452_v63 }
0x4923   :  { %v6633_v4 = vpop.f32.mrf.mxu1 }
0x4924   :  { %v5458_v5 = vmax.f32 %v5453_v0, 0.0 }
0x4925   :  { %v5455_v8 = vpop.f32.mrf.mxu1 }
0x4926   :  { %v5459_v9 = vpack.c.bf16 %v5458_v5, %v5458_v5 }
0x4927   :  { %v6634_v11 = vpop.f32.mrf.mxu1 }
0x4928   :  { %6640 = vmatmul.mubr.msk.bf16.vlgmr.msra.gmra.mxu0 %vm478_vm3, %v5459_v9 }
0x49e8   :  { %v5520_v10 = vpop.f32.mrf.mxu0 }
0x49e9   :  { %v5521_v16 = vadd.f32 %v5674_v15, %v5520_v10 }
0x49ea   :  { %v6641_v61 = vpop.f32.mrf.mxu0 }
0x49eb   :  { %5526 = vst.msk [vmem:[#allocation5] sm:$0xff] %vm5289_vm12, %v5521_v16 }
0x49ec   :  { %v5523_v1 = vpop.f32.mrf.mxu0 }
0x49ed   :  { %6792 = shalt.err (!%p6789_p4)
}
0x49ee   :  { %5536 = dma.vmem_to_hbm [thread:$0]  %s5534_s5, 128, %s8084_s24, [#allocation6]   ;;  %v6642_v17 = vpop.f32.mrf.mxu0 }
0x49ef   :  { %6801 = dma.done.wait [#allocation6], 128  }
0x49f0   :  { %6802 = vsyncadd [#allocation6], 4294967168 }
0x49f1   :  { %5540 = vsyncpa [#allocation6], 1 }

</bundles_post_ra>
